<compile_context>
chip_gen: v7x
topology: tpu7x:2x2x1
jax: 0.10.0
libtpu: 0.0.40
codegen_flags: <defaults>
</compile_context>

<pallas_src>
import functools

import jax
import jax.numpy as jnp
from jax import lax
from jax.experimental import pallas as pl
from jax.experimental.pallas import tpu as pltpu

_LANE = 128
_B_SUBLANE = 16  # bf16 activation storage -> 16-row sublane quantum


def _round_up(x, m):
    return ((x + m - 1) // m) * m


def _make_lstm_kernel(T, b_tile, Hp, num_layers, n_seq_bufs, t_chunk,
                      max_unrolled_steps, fori_unroll):
    n_chunks = -(-T // t_chunk)

    def kernel(*refs):
        x_ref = refs[0]                              # (T*b_tile, in_size) bf16, time-major
        layer_refs = refs[1:1 + 3 * num_layers]      # (w_ih, w_hh, b) per layer
        fc_w_ref = refs[1 + 3 * num_layers]          # (Hp, Cp) bf16
        fc_b_ref = refs[2 + 3 * num_layers]          # (1, Cp)  f32
        out_ref = refs[3 + 3 * num_layers]           # (b_tile, Cp) f32
        gates_ref = refs[4 + 3 * num_layers]         # (t_chunk*b_tile, 4Hp) f32 scratch
        seq_refs = refs[5 + 3 * num_layers:]         # n_seq_bufs x (T*b_tile, Hp) bf16

        def sigmoid(x):
            # One EUP tanh per element instead of exp + divide on the serial path.
            return 0.5 * jnp.tanh(0.5 * x) + 0.5

        def gate_step(gates, c):
            # Gate order is (i, f, o, g): one sigmoid slab + one tanh slab.
            sig = sigmoid(gates[:, 0:3 * Hp])
            g_g = jnp.tanh(gates[:, 3 * Hp:4 * Hp])
            i_g = sig[:, 0:Hp]
            f_g = sig[:, Hp:2 * Hp]
            o_g = sig[:, 2 * Hp:3 * Hp]
            c_new = f_g * c + i_g * g_g
            h_new = o_g * jnp.tanh(c_new)
            return h_new, c_new

        h = None
        for l in range(num_layers):
            w_ih = layer_refs[3 * l][...]            # (F_in, 4Hp) bf16
            w_hh = layer_refs[3 * l + 1][...]        # (Hp, 4Hp)  bf16
            b = layer_refs[3 * l + 2][...]           # (1, 4Hp)   f32

            x_all_ref = x_ref if l == 0 else seq_refs[(l - 1) % n_seq_bufs]
            write_seq = l < num_layers - 1
            seq_out = seq_refs[l % n_seq_bufs] if write_seq else None

            c_state = jnp.zeros((b_tile, Hp), jnp.float32)

            for ci in range(n_chunks):
                t0 = ci * t_chunk
                clen = min(t_chunk, T - t0)

                # Hoisted input projection for this time chunk: one fat MXU pass.
                x_chunk = x_all_ref[t0 * b_tile:(t0 + clen) * b_tile, :]
                gates_ref[0:clen * b_tile, :] = (
                    jnp.dot(x_chunk, w_ih, preferred_element_type=jnp.float32) + b)

                def recur(t_local, h_in, c_in, *, static):
                    if static:
                        g = gates_ref[t_local * b_tile:(t_local + 1) * b_tile, :]
                    else:
                        off = pl.multiple_of(t_local * b_tile, b_tile)
                        g = gates_ref[pl.ds(off, b_tile), :]
                    g = g + jnp.dot(h_in.astype(w_hh.dtype), w_hh,
                                    preferred_element_type=jnp.float32)
                    h_new, c_new = gate_step(g, c_in)
                    if write_seq:
                        if static:
                            seq_out[(t0 + t_local) * b_tile:
                                    (t0 + t_local + 1) * b_tile, :] = (
                                h_new.astype(seq_out.dtype))
                        else:
                            soff = pl.multiple_of((t0 + t_local) * b_tile, b_tile)
                            seq_out[pl.ds(soff, b_tile), :] = h_new.astype(seq_out.dtype)
                    return h_new, c_new

                t_start = 0
                if ci == 0:
                    # t = 0 peeled: h0 == 0, so no recurrent matmul on the first step.
                    h, c_state = gate_step(gates_ref[0:b_tile, :], c_state)
                    if write_seq:
                        seq_out[0:b_tile, :] = h.astype(seq_out.dtype)
                    t_start = 1

                if clen <= max_unrolled_steps:
                    # Short chunk: fully unrolled, static slices.
                    for t_local in range(t_start, clen):
                        h, c_state = recur(t_local, h, c_state, static=True)
                else:
                    # Long chunk: fori_loop bounds live ranges / compile time.
                    def body(t_local, carry):
                        hh, cc = carry
                        return recur(t_local, hh, cc, static=False)

                    h, c_state = lax.fori_loop(t_start, clen, body, (h, c_state),
                                               unroll=fori_unroll)

        # Classifier head on the last timestep of the top layer (lane-dense Cp).
        out_ref[...] = (
            jnp.dot(h.astype(fc_w_ref.dtype), fc_w_ref[...],
                    preferred_element_type=jnp.float32) + fc_b_ref[...])

    return kernel


def lstm_classifier_forward(x, params, *, hidden_size, num_layers, num_classes,
                            b_tile=None, t_chunk=None,
                            max_unrolled_steps=16, fori_unroll=4,
                            gates_budget_bytes=4 << 20):
    """x: (B, T, input_size) float32, batch-first like PyTorch nn.LSTM."""
    B, T, in_size = x.shape
    H = hidden_size
    Hp = _round_up(H, _LANE)
    Cp = _round_up(num_classes, _LANE)

    # Batch tile: as fat as practical (MXU rows per timestep), 16-row quantum
    # for bf16 sublane alignment. On v7x, pass b_tile explicitly so nbt >= 2
    # splits batch tiles across the two TensorCores when B is large enough.
    if b_tile is None:
        b_tile = min(128, _round_up(B, _B_SUBLANE))
    else:
        b_tile = _round_up(b_tile, _B_SUBLANE)
    nbt = -(-B // b_tile)                 # number of batch tiles
    b_pad = nbt * b_tile

    # Time chunk for the hoisted input projection: keep the f32 gates scratch
    # within a fixed VMEM budget instead of scaling with full T.
    if t_chunk is None:
        row_bytes = b_tile * 4 * Hp * 4
        t_chunk = max(1, min(T, gates_budget_bytes // row_bytes))
    t_chunk = max(1, min(t_chunk, T))

    # Time-major, pad batch, bf16 storage, group rows so each grid step sees one
    # contiguous (T*b_tile, in_size) time-major slab.
    x_tm = jnp.transpose(x, (1, 0, 2))                       # (T, B, in)
    if b_pad != B:
        x_tm = jnp.pad(x_tm, ((0, 0), (0, b_pad - B), (0, 0)))
    x_blk = (x_tm.reshape(T, nbt, b_tile, in_size)
                 .transpose(1, 0, 2, 3)
                 .reshape(nbt, T * b_tile, in_size)
                 .astype(jnp.bfloat16))

    args = [x_blk]
    in_specs = [pl.BlockSpec((None, T * b_tile, in_size), lambda i: (i, 0, 0))]
    for (w_ih, w_hh, b) in params["layers"]:
        args += [w_ih, w_hh, b]
        in_specs += [
            pl.BlockSpec(w_ih.shape, lambda i: (0, 0)),      # (F_in, 4Hp)
            pl.BlockSpec(w_hh.shape, lambda i: (0, 0)),      # (Hp, 4Hp)
            pl.BlockSpec(b.shape, lambda i: (0, 0)),         # (1, 4Hp)
        ]
    args += [params["fc_w"], params["fc_b"]]
    in_specs += [
        pl.BlockSpec(params["fc_w"].shape, lambda i: (0, 0)),  # (Hp, Cp)
        pl.BlockSpec(params["fc_b"].shape, lambda i: (0, 0)),  # (1, Cp)
    ]

    n_seq_bufs = min(2, num_layers - 1)
    scratch = [pltpu.VMEM((t_chunk * b_tile, 4 * Hp), jnp.float32)]
    scratch += [pltpu.VMEM((T * b_tile, Hp), jnp.bfloat16)] * n_seq_bufs

    # Advisory cost estimate (helps XLA schedule around a recurrence-bound kernel).
    flops = 0
    transcendentals = 0
    for l in range(num_layers):
        f_in = in_size if l == 0 else Hp
        flops += 2 * T * b_pad * f_in * 4 * Hp              # hoisted input projection
        flops += 2 * max(T - 1, 0) * b_pad * Hp * 4 * Hp    # recurrent matmuls
        transcendentals += 5 * Hp * T * b_pad               # 3 sig + 2 tanh per elem
    flops += 2 * b_pad * Hp * Cp                            # classifier head
    bytes_accessed = x_blk.size * x_blk.dtype.itemsize
    for a in args[1:]:
        bytes_accessed += a.size * a.dtype.itemsize
    bytes_accessed += b_pad * Cp * 4

    kernel = _make_lstm_kernel(T, b_tile, Hp, num_layers, n_seq_bufs, t_chunk,
                               max_unrolled_steps, fori_unroll)

    out = pl.pallas_call(
        kernel,
        out_shape=jax.ShapeDtypeStruct((b_pad, Cp), jnp.float32),
        grid=(nbt,),
        in_specs=in_specs,
        out_specs=pl.BlockSpec((b_tile, Cp), lambda i: (i, 0)),
        scratch_shapes=scratch,
        compiler_params=pltpu.CompilerParams(
            dimension_semantics=("parallel",)),
        cost_estimate=pl.CostEstimate(flops=int(flops),
                                      transcendentals=int(transcendentals),
                                      bytes_accessed=int(bytes_accessed)),
    )(*args)
    return out[:B, :num_classes]


def _permute_pad_gates(w, H, Hp):
    """PyTorch gate order (i, f, g, o) on the leading 4H axis -> (i, f, o, g),
    each gate slab zero-padded from H to Hp."""
    i, f, g, o = w[0:H], w[H:2 * H], w[2 * H:3 * H], w[3 * H:4 * H]
    pad = ((0, Hp - H),) + ((0, 0),) * (w.ndim - 1)
    return jnp.concatenate([jnp.pad(s, pad) for s in (i, f, o, g)], axis=0)


def init_torch_params(key, input_size, hidden_size, num_layers, num_classes):
    """PyTorch-layout params (uniform +/- 1/sqrt(H), same shapes as nn.LSTM/nn.Linear)."""
    H = hidden_size
    k = 1.0 / jnp.sqrt(jnp.float32(H))
    layers = []
    for l in range(num_layers):
        in_f = input_size if l == 0 else H
        key, k1, k2, k3, k4 = jax.random.split(key, 5)
        w_ih = jax.random.uniform(k1, (4 * H, in_f), jnp.float32, -k, k)
        w_hh = jax.random.uniform(k2, (4 * H, H), jnp.float32, -k, k)
        b_ih = jax.random.uniform(k3, (4 * H,), jnp.float32, -k, k)
        b_hh = jax.random.uniform(k4, (4 * H,), jnp.float32, -k, k)
        layers.append((w_ih, w_hh, b_ih, b_hh))
    key, k5, k6 = jax.random.split(key, 3)
    fc_w = jax.random.uniform(k5, (num_classes, H), jnp.float32, -k, k)
    fc_b = jax.random.uniform(k6, (num_classes,), jnp.float32, -k, k)
    return {"layers": layers, "fc_w": fc_w, "fc_b": fc_b}


def pack_params(torch_params, hidden_size):
    """Pre-transpose weights, permute gates to (i, f, o, g), fold the two biases,
    pad H -> Hp (128-lane multiple) and C -> Cp, store matmul operands in bf16."""
    H = hidden_size
    Hp = _round_up(H, _LANE)
    layers = []
    for l, (w_ih, w_hh, b_ih, b_hh) in enumerate(torch_params["layers"]):
        if l > 0 and Hp != H:
            # Input of layers > 0 is the (padded) previous-layer hidden state.
            w_ih = jnp.pad(w_ih, ((0, 0), (0, Hp - H)))
        if Hp != H:
            w_hh = jnp.pad(w_hh, ((0, 0), (0, Hp - H)))
        layers.append((
            _permute_pad_gates(w_ih, H, Hp).T.astype(jnp.bfloat16),          # (F_in, 4Hp)
            _permute_pad_gates(w_hh, H, Hp).T.astype(jnp.bfloat16),          # (Hp, 4Hp)
            _permute_pad_gates(b_ih + b_hh, H, Hp)[None, :].astype(jnp.float32),  # (1, 4Hp)
        ))
    C = torch_params["fc_w"].shape[0]
    Cp = _round_up(C, _LANE)
    fc_w = jnp.pad(torch_params["fc_w"], ((0, Cp - C), (0, Hp - H)))
    fc_b = jnp.pad(torch_params["fc_b"], ((0, Cp - C),))
    return {
        "layers": layers,
        "fc_w": fc_w.T.astype(jnp.bfloat16),    # (Hp, Cp)
        "fc_b": fc_b[None, :].astype(jnp.float32),  # (1, Cp)
    }


def reference_forward(x, torch_params):
    """Pure-JAX f32 reference in PyTorch layout / gate order (sanity check)."""
    seq = x  # (B, T, F)
    for (w_ih, w_hh, b_ih, b_hh) in torch_params["layers"]:
        B, T, _ = seq.shape
        H = w_hh.shape[1]
        h = jnp.zeros((B, H), jnp.float32)
        c = jnp.zeros((B, H), jnp.float32)
        outs = []
        for t in range(T):
            gates = seq[:, t, :] @ w_ih.T + h @ w_hh.T + b_ih + b_hh
            i_g = jax.nn.sigmoid(gates[:, 0 * H:1 * H])
            f_g = jax.nn.sigmoid(gates[:, 1 * H:2 * H])
            g_g = jnp.tanh(gates[:, 2 * H:3 * H])
            o_g = jax.nn.sigmoid(gates[:, 3 * H:4 * H])
            c = f_g * c + i_g * g_g
            h = o_g * jnp.tanh(c)
            outs.append(h)
        seq = jnp.stack(outs, axis=1)
    return seq[:, -1, :] @ torch_params["fc_w"].T + torch_params["fc_b"][None, :]


def _check(B, T, IN, H, L, C, seed, **fwd_kwargs):
    key = jax.random.PRNGKey(seed)
    key, kx = jax.random.split(key)
    x = jax.random.normal(kx, (B, T, IN), jnp.float32)
    torch_params = init_torch_params(key, IN, H, L, C)
    kernel_params = pack_params(torch_params, H)

    fwd = jax.jit(functools.partial(
        lstm_classifier_forward, hidden_size=H, num_layers=L, num_classes=C,
        **fwd_kwargs))
    out = fwd(x, kernel_params)
    jax.block_until_ready(out)

    ref = reference_forward(x, torch_params)
    assert out.shape == (B, C)
    err = float(jnp.max(jnp.abs(out - ref)))
    # bf16 weight/activation storage -> loosened tolerance vs the f32 reference.
    assert err < 5e-2, f"mismatch vs reference: max abs err {err}"


if __name__ == "__main__":
    # Main config: batch=4, seq=8, input_size=16, hidden=32, num_layers=2, classes=8.
    # Exercises the fully-unrolled short-T path.
    _check(4, 8, 16, 32, 2, 8, seed=0)
    # Longer sequence: exercises the time-chunked projection (2 chunks) and the
    # lax.fori_loop recurrence path.
    _check(4, 40, 16, 32, 2, 8, seed=1, t_chunk=20)
    print("KERNEL_OK")
</pallas_src>

<mosaic_0001>
module attributes {stable_mosaic.version = 11 : i64} {
  func.func @kernel(%arg0: i32, %arg1: memref<1x128x16xbf16, #tpu.memory_space<vmem>>, %arg2: memref<16x512xbf16, #tpu.memory_space<vmem>>, %arg3: memref<128x512xbf16, #tpu.memory_space<vmem>>, %arg4: memref<1x512xf32, #tpu.memory_space<vmem>>, %arg5: memref<128x512xbf16, #tpu.memory_space<vmem>>, %arg6: memref<128x512xbf16, #tpu.memory_space<vmem>>, %arg7: memref<1x512xf32, #tpu.memory_space<vmem>>, %arg8: memref<128x128xbf16, #tpu.memory_space<vmem>>, %arg9: memref<1x128xf32, #tpu.memory_space<vmem>>, %arg10: memref<16x128xf32, #tpu.memory_space<vmem>>, %arg11: memref<128x512xf32, #tpu.memory_space<vmem>>, %arg12: memref<128x128xbf16, #tpu.memory_space<vmem>>) attributes {dimension_semantics = [#tpu.dimension_semantics<parallel>], iteration_bounds = array<i64: 1>, scalar_prefetch = 0 : i64, scratch_operands = 2 : i64, tpu.core_type = #tpu.core_type<tc>, window_params = [{transform_indices = @transform_0, window_bounds = array<i64: 1, 128, 16>}, {pipeline_mode = #tpu.pipeline_mode<synchronous>, transform_indices = @transform_1, window_bounds = array<i64: 16, 512>}, {pipeline_mode = #tpu.pipeline_mode<synchronous>, transform_indices = @transform_2, window_bounds = array<i64: 128, 512>}, {pipeline_mode = #tpu.pipeline_mode<synchronous>, transform_indices = @transform_3, window_bounds = array<i64: 1, 512>}, {pipeline_mode = #tpu.pipeline_mode<synchronous>, transform_indices = @transform_4, window_bounds = array<i64: 128, 512>}, {pipeline_mode = #tpu.pipeline_mode<synchronous>, transform_indices = @transform_5, window_bounds = array<i64: 128, 512>}, {pipeline_mode = #tpu.pipeline_mode<synchronous>, transform_indices = @transform_6, window_bounds = array<i64: 1, 512>}, {pipeline_mode = #tpu.pipeline_mode<synchronous>, transform_indices = @transform_7, window_bounds = array<i64: 128, 128>}, {pipeline_mode = #tpu.pipeline_mode<synchronous>, transform_indices = @transform_8, window_bounds = array<i64: 1, 128>}, {transform_indices = @transform_9, window_bounds = array<i64: 16, 128>}]} {
    %c0 = arith.constant 0 : index
    %c0_0 = arith.constant 0 : index
    %0 = vector.load %arg2[%c0, %c0_0] : memref<16x512xbf16, #tpu.memory_space<vmem>>, vector<16x512xbf16>
    %c0_1 = arith.constant 0 : index
    %c0_2 = arith.constant 0 : index
    %1 = vector.load %arg3[%c0_1, %c0_2] : memref<128x512xbf16, #tpu.memory_space<vmem>>, vector<128x512xbf16>
    %c0_3 = arith.constant 0 : index
    %c0_4 = arith.constant 0 : index
    %2 = vector.load %arg4[%c0_3, %c0_4] : memref<1x512xf32, #tpu.memory_space<vmem>>, vector<1x512xf32>
    %cst = arith.constant 0.000000e+00 : f32
    %3 = vector.broadcast %cst : f32 to vector<16x128xf32>
    %c0_5 = arith.constant 0 : index
    %c0_6 = arith.constant 0 : index
    %c0_7 = arith.constant 0 : index
    %4 = vector.load %arg1[%c0_5, %c0_6, %c0_7] : memref<1x128x16xbf16, #tpu.memory_space<vmem>>, vector<1x128x16xbf16>
    %5 = vector.shape_cast %4 : vector<1x128x16xbf16> to vector<128x16xbf16>
    %cst_8 = arith.constant dense<0.000000e+00> : vector<128x512xf32>
    %6 = tpu.matmul %5, %0, %cst_8 {dimension_numbers = #tpu.dot_dimension_numbers<[1], [0], [0], [1], [0, 0, 1, 1], [], []>} : vector<128x16xbf16>, vector<16x512xbf16>, vector<128x512xf32> -> vector<128x512xf32>
    %7 = vector.broadcast %2 : vector<1x512xf32> to vector<128x512xf32>
    %8 = arith.addf %6, %7 : vector<128x512xf32>
    %c0_9 = arith.constant 0 : index
    %c0_10 = arith.constant 0 : index
    %9 = vector.load %arg11[%c0_9, %c0_10] : memref<128x512xf32, #tpu.memory_space<vmem>>, vector<128x512xf32>
    tpu.vector_store %arg11[%c0_9, %c0_10], %8 {strides = array<i32>} : memref<128x512xf32, #tpu.memory_space<vmem>>, vector<128x512xf32>,
    %c0_11 = arith.constant 0 : index
    %c0_12 = arith.constant 0 : index
    %10 = vector.load %arg11[%c0_11, %c0_12] : memref<128x512xf32, #tpu.memory_space<vmem>>, vector<16x512xf32>
    %11 = vector.extract_strided_slice %10 {offsets = [0, 0], sizes = [16, 384], strides = [1, 1]} : vector<16x512xf32> to vector<16x384xf32>
    %cst_13 = arith.constant 5.000000e-01 : f32
    %12 = vector.broadcast %cst_13 : f32 to vector<16x384xf32>
    %13 = arith.mulf %12, %11 : vector<16x384xf32>
    %14 = math.tanh %13 : vector<16x384xf32>
    %cst_14 = arith.constant 5.000000e-01 : f32
    %15 = vector.broadcast %cst_14 : f32 to vector<16x384xf32>
    %16 = arith.mulf %15, %14 : vector<16x384xf32>
    %cst_15 = arith.constant 5.000000e-01 : f32
    %17 = vector.broadcast %cst_15 : f32 to vector<16x384xf32>
    %18 = arith.addf %16, %17 : vector<16x384xf32>
    %19 = vector.extract_strided_slice %10 {offsets = [0, 384], sizes = [16, 128], strides = [1, 1]} : vector<16x512xf32> to vector<16x128xf32>
    %20 = math.tanh %19 : vector<16x128xf32>
    %21 = vector.extract_strided_slice %18 {offsets = [0, 0], sizes = [16, 128], strides = [1, 1]} : vector<16x384xf32> to vector<16x128xf32>
    %22 = vector.extract_strided_slice %18 {offsets = [0, 128], sizes = [16, 128], strides = [1, 1]} : vector<16x384xf32> to vector<16x128xf32>
    %23 = vector.extract_strided_slice %18 {offsets = [0, 256], sizes = [16, 128], strides = [1, 1]} : vector<16x384xf32> to vector<16x128xf32>
    %24 = arith.mulf %22, %3 : vector<16x128xf32>
    %25 = arith.mulf %21, %20 : vector<16x128xf32>
    %26 = arith.addf %24, %25 : vector<16x128xf32>
    %27 = math.tanh %26 : vector<16x128xf32>
    %28 = arith.mulf %23, %27 : vector<16x128xf32>
    %29 = arith.truncf %28 : vector<16x128xf32> to vector<16x128xbf16>
    %c0_16 = arith.constant 0 : index
    %c0_17 = arith.constant 0 : index
    %30 = vector.load %arg12[%c0_16, %c0_17] : memref<128x128xbf16, #tpu.memory_space<vmem>>, vector<16x128xbf16>
    tpu.vector_store %arg12[%c0_16, %c0_17], %29 {strides = array<i32>} : memref<128x128xbf16, #tpu.memory_space<vmem>>, vector<16x128xbf16>,
    %c16 = arith.constant 16 : index
    %c0_18 = arith.constant 0 : index
    %31 = vector.load %arg11[%c16, %c0_18] : memref<128x512xf32, #tpu.memory_space<vmem>>, vector<16x512xf32>
    %32 = arith.truncf %28 : vector<16x128xf32> to vector<16x128xbf16>
    %cst_19 = arith.constant dense<0.000000e+00> : vector<16x512xf32>
    %33 = tpu.matmul %32, %1, %cst_19 {dimension_numbers = #tpu.dot_dimension_numbers<[1], [0], [0], [1], [0, 0, 1, 1], [], []>} : vector<16x128xbf16>, vector<128x512xbf16>, vector<16x512xf32> -> vector<16x512xf32>
    %34 = arith.addf %31, %33 : vector<16x512xf32>
    %35 = vector.extract_strided_slice %34 {offsets = [0, 0], sizes = [16, 384], strides = [1, 1]} : vector<16x512xf32> to vector<16x384xf32>
    %cst_20 = arith.constant 5.000000e-01 : f32
    %36 = vector.broadcast %cst_20 : f32 to vector<16x384xf32>
    %37 = arith.mulf %36, %35 : vector<16x384xf32>
    %38 = math.tanh %37 : vector<16x384xf32>
    %cst_21 = arith.constant 5.000000e-01 : f32
    %39 = vector.broadcast %cst_21 : f32 to vector<16x384xf32>
    %40 = arith.mulf %39, %38 : vector<16x384xf32>
    %cst_22 = arith.constant 5.000000e-01 : f32
    %41 = vector.broadcast %cst_22 : f32 to vector<16x384xf32>
    %42 = arith.addf %40, %41 : vector<16x384xf32>
    %43 = vector.extract_strided_slice %34 {offsets = [0, 384], sizes = [16, 128], strides = [1, 1]} : vector<16x512xf32> to vector<16x128xf32>
    %44 = math.tanh %43 : vector<16x128xf32>
    %45 = vector.extract_strided_slice %42 {offsets = [0, 0], sizes = [16, 128], strides = [1, 1]} : vector<16x384xf32> to vector<16x128xf32>
    %46 = vector.extract_strided_slice %42 {offsets = [0, 128], sizes = [16, 128], strides = [1, 1]} : vector<16x384xf32> to vector<16x128xf32>
    %47 = vector.extract_strided_slice %42 {offsets = [0, 256], sizes = [16, 128], strides = [1, 1]} : vector<16x384xf32> to vector<16x128xf32>
    %48 = arith.mulf %46, %26 : vector<16x128xf32>
    %49 = arith.mulf %45, %44 : vector<16x128xf32>
    %50 = arith.addf %48, %49 : vector<16x128xf32>
    %51 = math.tanh %50 : vector<16x128xf32>
    %52 = arith.mulf %47, %51 : vector<16x128xf32>
    %53 = arith.truncf %52 : vector<16x128xf32> to vector<16x128xbf16>
    %c16_23 = arith.constant 16 : index
    %c0_24 = arith.constant 0 : index
    %54 = vector.load %arg12[%c16_23, %c0_24] : memref<128x128xbf16, #tpu.memory_space<vmem>>, vector<16x128xbf16>
    tpu.vector_store %arg12[%c16_23, %c0_24], %53 {strides = array<i32>} : memref<128x128xbf16, #tpu.memory_space<vmem>>, vector<16x128xbf16>,
    %c32 = arith.constant 32 : index
    %c0_25 = arith.constant 0 : index
    %55 = vector.load %arg11[%c32, %c0_25] : memref<128x512xf32, #tpu.memory_space<vmem>>, vector<16x512xf32>
    %56 = arith.truncf %52 : vector<16x128xf32> to vector<16x128xbf16>
    %cst_26 = arith.constant dense<0.000000e+00> : vector<16x512xf32>
    %57 = tpu.matmul %56, %1, %cst_26 {dimension_numbers = #tpu.dot_dimension_numbers<[1], [0], [0], [1], [0, 0, 1, 1], [], []>} : vector<16x128xbf16>, vector<128x512xbf16>, vector<16x512xf32> -> vector<16x512xf32>
    %58 = arith.addf %55, %57 : vector<16x512xf32>
    %59 = vector.extract_strided_slice %58 {offsets = [0, 0], sizes = [16, 384], strides = [1, 1]} : vector<16x512xf32> to vector<16x384xf32>
    %cst_27 = arith.constant 5.000000e-01 : f32
    %60 = vector.broadcast %cst_27 : f32 to vector<16x384xf32>
    %61 = arith.mulf %60, %59 : vector<16x384xf32>
    %62 = math.tanh %61 : vector<16x384xf32>
    %cst_28 = arith.constant 5.000000e-01 : f32
    %63 = vector.broadcast %cst_28 : f32 to vector<16x384xf32>
    %64 = arith.mulf %63, %62 : vector<16x384xf32>
    %cst_29 = arith.constant 5.000000e-01 : f32
    %65 = vector.broadcast %cst_29 : f32 to vector<16x384xf32>
    %66 = arith.addf %64, %65 : vector<16x384xf32>
    %67 = vector.extract_strided_slice %58 {offsets = [0, 384], sizes = [16, 128], strides = [1, 1]} : vector<16x512xf32> to vector<16x128xf32>
    %68 = math.tanh %67 : vector<16x128xf32>
    %69 = vector.extract_strided_slice %66 {offsets = [0, 0], sizes = [16, 128], strides = [1, 1]} : vector<16x384xf32> to vector<16x128xf32>
    %70 = vector.extract_strided_slice %66 {offsets = [0, 128], sizes = [16, 128], strides = [1, 1]} : vector<16x384xf32> to vector<16x128xf32>
    %71 = vector.extract_strided_slice %66 {offsets = [0, 256], sizes = [16, 128], strides = [1, 1]} : vector<16x384xf32> to vector<16x128xf32>
    %72 = arith.mulf %70, %50 : vector<16x128xf32>
    %73 = arith.mulf %69, %68 : vector<16x128xf32>
    %74 = arith.addf %72, %73 : vector<16x128xf32>
    %75 = math.tanh %74 : vector<16x128xf32>
    %76 = arith.mulf %71, %75 : vector<16x128xf32>
    %77 = arith.truncf %76 : vector<16x128xf32> to vector<16x128xbf16>
    %c32_30 = arith.constant 32 : index
    %c0_31 = arith.constant 0 : index
    %78 = vector.load %arg12[%c32_30, %c0_31] : memref<128x128xbf16, #tpu.memory_space<vmem>>, vector<16x128xbf16>
    tpu.vector_store %arg12[%c32_30, %c0_31], %77 {strides = array<i32>} : memref<128x128xbf16, #tpu.memory_space<vmem>>, vector<16x128xbf16>,
    %c48 = arith.constant 48 : index
    %c0_32 = arith.constant 0 : index
    %79 = vector.load %arg11[%c48, %c0_32] : memref<128x512xf32, #tpu.memory_space<vmem>>, vector<16x512xf32>
    %80 = arith.truncf %76 : vector<16x128xf32> to vector<16x128xbf16>
    %cst_33 = arith.constant dense<0.000000e+00> : vector<16x512xf32>
    %81 = tpu.matmul %80, %1, %cst_33 {dimension_numbers = #tpu.dot_dimension_numbers<[1], [0], [0], [1], [0, 0, 1, 1], [], []>} : vector<16x128xbf16>, vector<128x512xbf16>, vector<16x512xf32> -> vector<16x512xf32>
    %82 = arith.addf %79, %81 : vector<16x512xf32>
    %83 = vector.extract_strided_slice %82 {offsets = [0, 0], sizes = [16, 384], strides = [1, 1]} : vector<16x512xf32> to vector<16x384xf32>
    %cst_34 = arith.constant 5.000000e-01 : f32
    %84 = vector.broadcast %cst_34 : f32 to vector<16x384xf32>
    %85 = arith.mulf %84, %83 : vector<16x384xf32>
    %86 = math.tanh %85 : vector<16x384xf32>
    %cst_35 = arith.constant 5.000000e-01 : f32
    %87 = vector.broadcast %cst_35 : f32 to vector<16x384xf32>
    %88 = arith.mulf %87, %86 : vector<16x384xf32>
    %cst_36 = arith.constant 5.000000e-01 : f32
    %89 = vector.broadcast %cst_36 : f32 to vector<16x384xf32>
    %90 = arith.addf %88, %89 : vector<16x384xf32>
    %91 = vector.extract_strided_slice %82 {offsets = [0, 384], sizes = [16, 128], strides = [1, 1]} : vector<16x512xf32> to vector<16x128xf32>
    %92 = math.tanh %91 : vector<16x128xf32>
    %93 = vector.extract_strided_slice %90 {offsets = [0, 0], sizes = [16, 128], strides = [1, 1]} : vector<16x384xf32> to vector<16x128xf32>
    %94 = vector.extract_strided_slice %90 {offsets = [0, 128], sizes = [16, 128], strides = [1, 1]} : vector<16x384xf32> to vector<16x128xf32>
    %95 = vector.extract_strided_slice %90 {offsets = [0, 256], sizes = [16, 128], strides = [1, 1]} : vector<16x384xf32> to vector<16x128xf32>
    %96 = arith.mulf %94, %74 : vector<16x128xf32>
    %97 = arith.mulf %93, %92 : vector<16x128xf32>
    %98 = arith.addf %96, %97 : vector<16x128xf32>
    %99 = math.tanh %98 : vector<16x128xf32>
    %100 = arith.mulf %95, %99 : vector<16x128xf32>
    %101 = arith.truncf %100 : vector<16x128xf32> to vector<16x128xbf16>
    %c48_37 = arith.constant 48 : index
    %c0_38 = arith.constant 0 : index
    %102 = vector.load %arg12[%c48_37, %c0_38] : memref<128x128xbf16, #tpu.memory_space<vmem>>, vector<16x128xbf16>
    tpu.vector_store %arg12[%c48_37, %c0_38], %101 {strides = array<i32>} : memref<128x128xbf16, #tpu.memory_space<vmem>>, vector<16x128xbf16>,
    %c64 = arith.constant 64 : index
    %c0_39 = arith.constant 0 : index
    %103 = vector.load %arg11[%c64, %c0_39] : memref<128x512xf32, #tpu.memory_space<vmem>>, vector<16x512xf32>
    %104 = arith.truncf %100 : vector<16x128xf32> to vector<16x128xbf16>
    %cst_40 = arith.constant dense<0.000000e+00> : vector<16x512xf32>
    %105 = tpu.matmul %104, %1, %cst_40 {dimension_numbers = #tpu.dot_dimension_numbers<[1], [0], [0], [1], [0, 0, 1, 1], [], []>} : vector<16x128xbf16>, vector<128x512xbf16>, vector<16x512xf32> -> vector<16x512xf32>
    %106 = arith.addf %103, %105 : vector<16x512xf32>
    %107 = vector.extract_strided_slice %106 {offsets = [0, 0], sizes = [16, 384], strides = [1, 1]} : vector<16x512xf32> to vector<16x384xf32>
    %cst_41 = arith.constant 5.000000e-01 : f32
    %108 = vector.broadcast %cst_41 : f32 to vector<16x384xf32>
    %109 = arith.mulf %108, %107 : vector<16x384xf32>
    %110 = math.tanh %109 : vector<16x384xf32>
    %cst_42 = arith.constant 5.000000e-01 : f32
    %111 = vector.broadcast %cst_42 : f32 to vector<16x384xf32>
    %112 = arith.mulf %111, %110 : vector<16x384xf32>
    %cst_43 = arith.constant 5.000000e-01 : f32
    %113 = vector.broadcast %cst_43 : f32 to vector<16x384xf32>
    %114 = arith.addf %112, %113 : vector<16x384xf32>
    %115 = vector.extract_strided_slice %106 {offsets = [0, 384], sizes = [16, 128], strides = [1, 1]} : vector<16x512xf32> to vector<16x128xf32>
    %116 = math.tanh %115 : vector<16x128xf32>
    %117 = vector.extract_strided_slice %114 {offsets = [0, 0], sizes = [16, 128], strides = [1, 1]} : vector<16x384xf32> to vector<16x128xf32>
    %118 = vector.extract_strided_slice %114 {offsets = [0, 128], sizes = [16, 128], strides = [1, 1]} : vector<16x384xf32> to vector<16x128xf32>
    %119 = vector.extract_strided_slice %114 {offsets = [0, 256], sizes = [16, 128], strides = [1, 1]} : vector<16x384xf32> to vector<16x128xf32>
    %120 = arith.mulf %118, %98 : vector<16x128xf32>
    %121 = arith.mulf %117, %116 : vector<16x128xf32>
    %122 = arith.addf %120, %121 : vector<16x128xf32>
    %123 = math.tanh %122 : vector<16x128xf32>
    %124 = arith.mulf %119, %123 : vector<16x128xf32>
    %125 = arith.truncf %124 : vector<16x128xf32> to vector<16x128xbf16>
    %c64_44 = arith.constant 64 : index
    %c0_45 = arith.constant 0 : index
    %126 = vector.load %arg12[%c64_44, %c0_45] : memref<128x128xbf16, #tpu.memory_space<vmem>>, vector<16x128xbf16>
    tpu.vector_store %arg12[%c64_44, %c0_45], %125 {strides = array<i32>} : memref<128x128xbf16, #tpu.memory_space<vmem>>, vector<16x128xbf16>,
    %c80 = arith.constant 80 : index
    %c0_46 = arith.constant 0 : index
    %127 = vector.load %arg11[%c80, %c0_46] : memref<128x512xf32, #tpu.memory_space<vmem>>, vector<16x512xf32>
    %128 = arith.truncf %124 : vector<16x128xf32> to vector<16x128xbf16>
    %cst_47 = arith.constant dense<0.000000e+00> : vector<16x512xf32>
    %129 = tpu.matmul %128, %1, %cst_47 {dimension_numbers = #tpu.dot_dimension_numbers<[1], [0], [0], [1], [0, 0, 1, 1], [], []>} : vector<16x128xbf16>, vector<128x512xbf16>, vector<16x512xf32> -> vector<16x512xf32>
    %130 = arith.addf %127, %129 : vector<16x512xf32>
    %131 = vector.extract_strided_slice %130 {offsets = [0, 0], sizes = [16, 384], strides = [1, 1]} : vector<16x512xf32> to vector<16x384xf32>
    %cst_48 = arith.constant 5.000000e-01 : f32
    %132 = vector.broadcast %cst_48 : f32 to vector<16x384xf32>
    %133 = arith.mulf %132, %131 : vector<16x384xf32>
    %134 = math.tanh %133 : vector<16x384xf32>
    %cst_49 = arith.constant 5.000000e-01 : f32
    %135 = vector.broadcast %cst_49 : f32 to vector<16x384xf32>
    %136 = arith.mulf %135, %134 : vector<16x384xf32>
    %cst_50 = arith.constant 5.000000e-01 : f32
    %137 = vector.broadcast %cst_50 : f32 to vector<16x384xf32>
    %138 = arith.addf %136, %137 : vector<16x384xf32>
    %139 = vector.extract_strided_slice %130 {offsets = [0, 384], sizes = [16, 128], strides = [1, 1]} : vector<16x512xf32> to vector<16x128xf32>
    %140 = math.tanh %139 : vector<16x128xf32>
    %141 = vector.extract_strided_slice %138 {offsets = [0, 0], sizes = [16, 128], strides = [1, 1]} : vector<16x384xf32> to vector<16x128xf32>
    %142 = vector.extract_strided_slice %138 {offsets = [0, 128], sizes = [16, 128], strides = [1, 1]} : vector<16x384xf32> to vector<16x128xf32>
    %143 = vector.extract_strided_slice %138 {offsets = [0, 256], sizes = [16, 128], strides = [1, 1]} : vector<16x384xf32> to vector<16x128xf32>
    %144 = arith.mulf %142, %122 : vector<16x128xf32>
    %145 = arith.mulf %141, %140 : vector<16x128xf32>
    %146 = arith.addf %144, %145 : vector<16x128xf32>
    %147 = math.tanh %146 : vector<16x128xf32>
    %148 = arith.mulf %143, %147 : vector<16x128xf32>
    %149 = arith.truncf %148 : vector<16x128xf32> to vector<16x128xbf16>
    %c80_51 = arith.constant 80 : index
    %c0_52 = arith.constant 0 : index
    %150 = vector.load %arg12[%c80_51, %c0_52] : memref<128x128xbf16, #tpu.memory_space<vmem>>, vector<16x128xbf16>
    tpu.vector_store %arg12[%c80_51, %c0_52], %149 {strides = array<i32>} : memref<128x128xbf16, #tpu.memory_space<vmem>>, vector<16x128xbf16>,
    %c96 = arith.constant 96 : index
    %c0_53 = arith.constant 0 : index
    %151 = vector.load %arg11[%c96, %c0_53] : memref<128x512xf32, #tpu.memory_space<vmem>>, vector<16x512xf32>
    %152 = arith.truncf %148 : vector<16x128xf32> to vector<16x128xbf16>
    %cst_54 = arith.constant dense<0.000000e+00> : vector<16x512xf32>
    %153 = tpu.matmul %152, %1, %cst_54 {dimension_numbers = #tpu.dot_dimension_numbers<[1], [0], [0], [1], [0, 0, 1, 1], [], []>} : vector<16x128xbf16>, vector<128x512xbf16>, vector<16x512xf32> -> vector<16x512xf32>
    %154 = arith.addf %151, %153 : vector<16x512xf32>
    %155 = vector.extract_strided_slice %154 {offsets = [0, 0], sizes = [16, 384], strides = [1, 1]} : vector<16x512xf32> to vector<16x384xf32>
    %cst_55 = arith.constant 5.000000e-01 : f32
    %156 = vector.broadcast %cst_55 : f32 to vector<16x384xf32>
    %157 = arith.mulf %156, %155 : vector<16x384xf32>
    %158 = math.tanh %157 : vector<16x384xf32>
    %cst_56 = arith.constant 5.000000e-01 : f32
    %159 = vector.broadcast %cst_56 : f32 to vector<16x384xf32>
    %160 = arith.mulf %159, %158 : vector<16x384xf32>
    %cst_57 = arith.constant 5.000000e-01 : f32
    %161 = vector.broadcast %cst_57 : f32 to vector<16x384xf32>
    %162 = arith.addf %160, %161 : vector<16x384xf32>
    %163 = vector.extract_strided_slice %154 {offsets = [0, 384], sizes = [16, 128], strides = [1, 1]} : vector<16x512xf32> to vector<16x128xf32>
    %164 = math.tanh %163 : vector<16x128xf32>
    %165 = vector.extract_strided_slice %162 {offsets = [0, 0], sizes = [16, 128], strides = [1, 1]} : vector<16x384xf32> to vector<16x128xf32>
    %166 = vector.extract_strided_slice %162 {offsets = [0, 128], sizes = [16, 128], strides = [1, 1]} : vector<16x384xf32> to vector<16x128xf32>
    %167 = vector.extract_strided_slice %162 {offsets = [0, 256], sizes = [16, 128], strides = [1, 1]} : vector<16x384xf32> to vector<16x128xf32>
    %168 = arith.mulf %166, %146 : vector<16x128xf32>
    %169 = arith.mulf %165, %164 : vector<16x128xf32>
    %170 = arith.addf %168, %169 : vector<16x128xf32>
    %171 = math.tanh %170 : vector<16x128xf32>
    %172 = arith.mulf %167, %171 : vector<16x128xf32>
    %173 = arith.truncf %172 : vector<16x128xf32> to vector<16x128xbf16>
    %c96_58 = arith.constant 96 : index
    %c0_59 = arith.constant 0 : index
    %174 = vector.load %arg12[%c96_58, %c0_59] : memref<128x128xbf16, #tpu.memory_space<vmem>>, vector<16x128xbf16>
    tpu.vector_store %arg12[%c96_58, %c0_59], %173 {strides = array<i32>} : memref<128x128xbf16, #tpu.memory_space<vmem>>, vector<16x128xbf16>,
    %c112 = arith.constant 112 : index
    %c0_60 = arith.constant 0 : index
    %175 = vector.load %arg11[%c112, %c0_60] : memref<128x512xf32, #tpu.memory_space<vmem>>, vector<16x512xf32>
    %176 = arith.truncf %172 : vector<16x128xf32> to vector<16x128xbf16>
    %cst_61 = arith.constant dense<0.000000e+00> : vector<16x512xf32>
    %177 = tpu.matmul %176, %1, %cst_61 {dimension_numbers = #tpu.dot_dimension_numbers<[1], [0], [0], [1], [0, 0, 1, 1], [], []>} : vector<16x128xbf16>, vector<128x512xbf16>, vector<16x512xf32> -> vector<16x512xf32>
    %178 = arith.addf %175, %177 : vector<16x512xf32>
    %179 = vector.extract_strided_slice %178 {offsets = [0, 0], sizes = [16, 384], strides = [1, 1]} : vector<16x512xf32> to vector<16x384xf32>
    %cst_62 = arith.constant 5.000000e-01 : f32
    %180 = vector.broadcast %cst_62 : f32 to vector<16x384xf32>
    %181 = arith.mulf %180, %179 : vector<16x384xf32>
    %182 = math.tanh %181 : vector<16x384xf32>
    %cst_63 = arith.constant 5.000000e-01 : f32
    %183 = vector.broadcast %cst_63 : f32 to vector<16x384xf32>
    %184 = arith.mulf %183, %182 : vector<16x384xf32>
    %cst_64 = arith.constant 5.000000e-01 : f32
    %185 = vector.broadcast %cst_64 : f32 to vector<16x384xf32>
    %186 = arith.addf %184, %185 : vector<16x384xf32>
    %187 = vector.extract_strided_slice %178 {offsets = [0, 384], sizes = [16, 128], strides = [1, 1]} : vector<16x512xf32> to vector<16x128xf32>
    %188 = math.tanh %187 : vector<16x128xf32>
    %189 = vector.extract_strided_slice %186 {offsets = [0, 0], sizes = [16, 128], strides = [1, 1]} : vector<16x384xf32> to vector<16x128xf32>
    %190 = vector.extract_strided_slice %186 {offsets = [0, 128], sizes = [16, 128], strides = [1, 1]} : vector<16x384xf32> to vector<16x128xf32>
    %191 = vector.extract_strided_slice %186 {offsets = [0, 256], sizes = [16, 128], strides = [1, 1]} : vector<16x384xf32> to vector<16x128xf32>
    %192 = arith.mulf %190, %170 : vector<16x128xf32>
    %193 = arith.mulf %189, %188 : vector<16x128xf32>
    %194 = arith.addf %192, %193 : vector<16x128xf32>
    %195 = math.tanh %194 : vector<16x128xf32>
    %196 = arith.mulf %191, %195 : vector<16x128xf32>
    %197 = arith.truncf %196 : vector<16x128xf32> to vector<16x128xbf16>
    %c112_65 = arith.constant 112 : index
    %c0_66 = arith.constant 0 : index
    %198 = vector.load %arg12[%c112_65, %c0_66] : memref<128x128xbf16, #tpu.memory_space<vmem>>, vector<16x128xbf16>
    tpu.vector_store %arg12[%c112_65, %c0_66], %197 {strides = array<i32>} : memref<128x128xbf16, #tpu.memory_space<vmem>>, vector<16x128xbf16>,
    %c0_67 = arith.constant 0 : index
    %c0_68 = arith.constant 0 : index
    %199 = vector.load %arg5[%c0_67, %c0_68] : memref<128x512xbf16, #tpu.memory_space<vmem>>, vector<128x512xbf16>
    %c0_69 = arith.constant 0 : index
    %c0_70 = arith.constant 0 : index
    %200 = vector.load %arg6[%c0_69, %c0_70] : memref<128x512xbf16, #tpu.memory_space<vmem>>, vector<128x512xbf16>
    %c0_71 = arith.constant 0 : index
    %c0_72 = arith.constant 0 : index
    %201 = vector.load %arg7[%c0_71, %c0_72] : memref<1x512xf32, #tpu.memory_space<vmem>>, vector<1x512xf32>
    %cst_73 = arith.constant 0.000000e+00 : f32
    %202 = vector.broadcast %cst_73 : f32 to vector<16x128xf32>
    %c0_74 = arith.constant 0 : index
    %c0_75 = arith.constant 0 : index
    %203 = vector.load %arg12[%c0_74, %c0_75] : memref<128x128xbf16, #tpu.memory_space<vmem>>, vector<128x128xbf16>
    %cst_76 = arith.constant dense<0.000000e+00> : vector<128x512xf32>
    %204 = tpu.matmul %203, %199, %cst_76 {dimension_numbers = #tpu.dot_dimension_numbers<[1], [0], [0], [1], [0, 0, 1, 1], [], []>} : vector<128x128xbf16>, vector<128x512xbf16>, vector<128x512xf32> -> vector<128x512xf32>
    %205 = vector.broadcast %201 : vector<1x512xf32> to vector<128x512xf32>
    %206 = arith.addf %204, %205 : vector<128x512xf32>
    %c0_77 = arith.constant 0 : index
    %c0_78 = arith.constant 0 : index
    %207 = vector.load %arg11[%c0_77, %c0_78] : memref<128x512xf32, #tpu.memory_space<vmem>>, vector<128x512xf32>
    tpu.vector_store %arg11[%c0_77, %c0_78], %206 {strides = array<i32>} : memref<128x512xf32, #tpu.memory_space<vmem>>, vector<128x512xf32>,
    %c0_79 = arith.constant 0 : index
    %c0_80 = arith.constant 0 : index
    %208 = vector.load %arg11[%c0_79, %c0_80] : memref<128x512xf32, #tpu.memory_space<vmem>>, vector<16x512xf32>
    %209 = vector.extract_strided_slice %208 {offsets = [0, 0], sizes = [16, 384], strides = [1, 1]} : vector<16x512xf32> to vector<16x384xf32>
    %cst_81 = arith.constant 5.000000e-01 : f32
    %210 = vector.broadcast %cst_81 : f32 to vector<16x384xf32>
    %211 = arith.mulf %210, %209 : vector<16x384xf32>
    %212 = math.tanh %211 : vector<16x384xf32>
    %cst_82 = arith.constant 5.000000e-01 : f32
    %213 = vector.broadcast %cst_82 : f32 to vector<16x384xf32>
    %214 = arith.mulf %213, %212 : vector<16x384xf32>
    %cst_83 = arith.constant 5.000000e-01 : f32
    %215 = vector.broadcast %cst_83 : f32 to vector<16x384xf32>
    %216 = arith.addf %214, %215 : vector<16x384xf32>
    %217 = vector.extract_strided_slice %208 {offsets = [0, 384], sizes = [16, 128], strides = [1, 1]} : vector<16x512xf32> to vector<16x128xf32>
    %218 = math.tanh %217 : vector<16x128xf32>
    %219 = vector.extract_strided_slice %216 {offsets = [0, 0], sizes = [16, 128], strides = [1, 1]} : vector<16x384xf32> to vector<16x128xf32>
    %220 = vector.extract_strided_slice %216 {offsets = [0, 128], sizes = [16, 128], strides = [1, 1]} : vector<16x384xf32> to vector<16x128xf32>
    %221 = vector.extract_strided_slice %216 {offsets = [0, 256], sizes = [16, 128], strides = [1, 1]} : vector<16x384xf32> to vector<16x128xf32>
    %222 = arith.mulf %220, %202 : vector<16x128xf32>
    %223 = arith.mulf %219, %218 : vector<16x128xf32>
    %224 = arith.addf %222, %223 : vector<16x128xf32>
    %225 = math.tanh %224 : vector<16x128xf32>
    %226 = arith.mulf %221, %225 : vector<16x128xf32>
    %c16_84 = arith.constant 16 : index
    %c0_85 = arith.constant 0 : index
    %227 = vector.load %arg11[%c16_84, %c0_85] : memref<128x512xf32, #tpu.memory_space<vmem>>, vector<16x512xf32>
    %228 = arith.truncf %226 : vector<16x128xf32> to vector<16x128xbf16>
    %cst_86 = arith.constant dense<0.000000e+00> : vector<16x512xf32>
    %229 = tpu.matmul %228, %200, %cst_86 {dimension_numbers = #tpu.dot_dimension_numbers<[1], [0], [0], [1], [0, 0, 1, 1], [], []>} : vector<16x128xbf16>, vector<128x512xbf16>, vector<16x512xf32> -> vector<16x512xf32>
    %230 = arith.addf %227, %229 : vector<16x512xf32>
    %231 = vector.extract_strided_slice %230 {offsets = [0, 0], sizes = [16, 384], strides = [1, 1]} : vector<16x512xf32> to vector<16x384xf32>
    %cst_87 = arith.constant 5.000000e-01 : f32
    %232 = vector.broadcast %cst_87 : f32 to vector<16x384xf32>
    %233 = arith.mulf %232, %231 : vector<16x384xf32>
    %234 = math.tanh %233 : vector<16x384xf32>
    %cst_88 = arith.constant 5.000000e-01 : f32
    %235 = vector.broadcast %cst_88 : f32 to vector<16x384xf32>
    %236 = arith.mulf %235, %234 : vector<16x384xf32>
    %cst_89 = arith.constant 5.000000e-01 : f32
    %237 = vector.broadcast %cst_89 : f32 to vector<16x384xf32>
    %238 = arith.addf %236, %237 : vector<16x384xf32>
    %239 = vector.extract_strided_slice %230 {offsets = [0, 384], sizes = [16, 128], strides = [1, 1]} : vector<16x512xf32> to vector<16x128xf32>
    %240 = math.tanh %239 : vector<16x128xf32>
    %241 = vector.extract_strided_slice %238 {offsets = [0, 0], sizes = [16, 128], strides = [1, 1]} : vector<16x384xf32> to vector<16x128xf32>
    %242 = vector.extract_strided_slice %238 {offsets = [0, 128], sizes = [16, 128], strides = [1, 1]} : vector<16x384xf32> to vector<16x128xf32>
    %243 = vector.extract_strided_slice %238 {offsets = [0, 256], sizes = [16, 128], strides = [1, 1]} : vector<16x384xf32> to vector<16x128xf32>
    %244 = arith.mulf %242, %224 : vector<16x128xf32>
    %245 = arith.mulf %241, %240 : vector<16x128xf32>
    %246 = arith.addf %244, %245 : vector<16x128xf32>
    %247 = math.tanh %246 : vector<16x128xf32>
    %248 = arith.mulf %243, %247 : vector<16x128xf32>
    %c32_90 = arith.constant 32 : index
    %c0_91 = arith.constant 0 : index
    %249 = vector.load %arg11[%c32_90, %c0_91] : memref<128x512xf32, #tpu.memory_space<vmem>>, vector<16x512xf32>
    %250 = arith.truncf %248 : vector<16x128xf32> to vector<16x128xbf16>
    %cst_92 = arith.constant dense<0.000000e+00> : vector<16x512xf32>
    %251 = tpu.matmul %250, %200, %cst_92 {dimension_numbers = #tpu.dot_dimension_numbers<[1], [0], [0], [1], [0, 0, 1, 1], [], []>} : vector<16x128xbf16>, vector<128x512xbf16>, vector<16x512xf32> -> vector<16x512xf32>
    %252 = arith.addf %249, %251 : vector<16x512xf32>
    %253 = vector.extract_strided_slice %252 {offsets = [0, 0], sizes = [16, 384], strides = [1, 1]} : vector<16x512xf32> to vector<16x384xf32>
    %cst_93 = arith.constant 5.000000e-01 : f32
    %254 = vector.broadcast %cst_93 : f32 to vector<16x384xf32>
    %255 = arith.mulf %254, %253 : vector<16x384xf32>
    %256 = math.tanh %255 : vector<16x384xf32>
    %cst_94 = arith.constant 5.000000e-01 : f32
    %257 = vector.broadcast %cst_94 : f32 to vector<16x384xf32>
    %258 = arith.mulf %257, %256 : vector<16x384xf32>
    %cst_95 = arith.constant 5.000000e-01 : f32
    %259 = vector.broadcast %cst_95 : f32 to vector<16x384xf32>
    %260 = arith.addf %258, %259 : vector<16x384xf32>
    %261 = vector.extract_strided_slice %252 {offsets = [0, 384], sizes = [16, 128], strides = [1, 1]} : vector<16x512xf32> to vector<16x128xf32>
    %262 = math.tanh %261 : vector<16x128xf32>
    %263 = vector.extract_strided_slice %260 {offsets = [0, 0], sizes = [16, 128], strides = [1, 1]} : vector<16x384xf32> to vector<16x128xf32>
    %264 = vector.extract_strided_slice %260 {offsets = [0, 128], sizes = [16, 128], strides = [1, 1]} : vector<16x384xf32> to vector<16x128xf32>
    %265 = vector.extract_strided_slice %260 {offsets = [0, 256], sizes = [16, 128], strides = [1, 1]} : vector<16x384xf32> to vector<16x128xf32>
    %266 = arith.mulf %264, %246 : vector<16x128xf32>
    %267 = arith.mulf %263, %262 : vector<16x128xf32>
    %268 = arith.addf %266, %267 : vector<16x128xf32>
    %269 = math.tanh %268 : vector<16x128xf32>
    %270 = arith.mulf %265, %269 : vector<16x128xf32>
    %c48_96 = arith.constant 48 : index
    %c0_97 = arith.constant 0 : index
    %271 = vector.load %arg11[%c48_96, %c0_97] : memref<128x512xf32, #tpu.memory_space<vmem>>, vector<16x512xf32>
    %272 = arith.truncf %270 : vector<16x128xf32> to vector<16x128xbf16>
    %cst_98 = arith.constant dense<0.000000e+00> : vector<16x512xf32>
    %273 = tpu.matmul %272, %200, %cst_98 {dimension_numbers = #tpu.dot_dimension_numbers<[1], [0], [0], [1], [0, 0, 1, 1], [], []>} : vector<16x128xbf16>, vector<128x512xbf16>, vector<16x512xf32> -> vector<16x512xf32>
    %274 = arith.addf %271, %273 : vector<16x512xf32>
    %275 = vector.extract_strided_slice %274 {offsets = [0, 0], sizes = [16, 384], strides = [1, 1]} : vector<16x512xf32> to vector<16x384xf32>
    %cst_99 = arith.constant 5.000000e-01 : f32
    %276 = vector.broadcast %cst_99 : f32 to vector<16x384xf32>
    %277 = arith.mulf %276, %275 : vector<16x384xf32>
    %278 = math.tanh %277 : vector<16x384xf32>
    %cst_100 = arith.constant 5.000000e-01 : f32
    %279 = vector.broadcast %cst_100 : f32 to vector<16x384xf32>
    %280 = arith.mulf %279, %278 : vector<16x384xf32>
    %cst_101 = arith.constant 5.000000e-01 : f32
    %281 = vector.broadcast %cst_101 : f32 to vector<16x384xf32>
    %282 = arith.addf %280, %281 : vector<16x384xf32>
    %283 = vector.extract_strided_slice %274 {offsets = [0, 384], sizes = [16, 128], strides = [1, 1]} : vector<16x512xf32> to vector<16x128xf32>
    %284 = math.tanh %283 : vector<16x128xf32>
    %285 = vector.extract_strided_slice %282 {offsets = [0, 0], sizes = [16, 128], strides = [1, 1]} : vector<16x384xf32> to vector<16x128xf32>
    %286 = vector.extract_strided_slice %282 {offsets = [0, 128], sizes = [16, 128], strides = [1, 1]} : vector<16x384xf32> to vector<16x128xf32>
    %287 = vector.extract_strided_slice %282 {offsets = [0, 256], sizes = [16, 128], strides = [1, 1]} : vector<16x384xf32> to vector<16x128xf32>
    %288 = arith.mulf %286, %268 : vector<16x128xf32>
    %289 = arith.mulf %285, %284 : vector<16x128xf32>
    %290 = arith.addf %288, %289 : vector<16x128xf32>
    %291 = math.tanh %290 : vector<16x128xf32>
    %292 = arith.mulf %287, %291 : vector<16x128xf32>
    %c64_102 = arith.constant 64 : index
    %c0_103 = arith.constant 0 : index
    %293 = vector.load %arg11[%c64_102, %c0_103] : memref<128x512xf32, #tpu.memory_space<vmem>>, vector<16x512xf32>
    %294 = arith.truncf %292 : vector<16x128xf32> to vector<16x128xbf16>
    %cst_104 = arith.constant dense<0.000000e+00> : vector<16x512xf32>
    %295 = tpu.matmul %294, %200, %cst_104 {dimension_numbers = #tpu.dot_dimension_numbers<[1], [0], [0], [1], [0, 0, 1, 1], [], []>} : vector<16x128xbf16>, vector<128x512xbf16>, vector<16x512xf32> -> vector<16x512xf32>
    %296 = arith.addf %293, %295 : vector<16x512xf32>
    %297 = vector.extract_strided_slice %296 {offsets = [0, 0], sizes = [16, 384], strides = [1, 1]} : vector<16x512xf32> to vector<16x384xf32>
    %cst_105 = arith.constant 5.000000e-01 : f32
    %298 = vector.broadcast %cst_105 : f32 to vector<16x384xf32>
    %299 = arith.mulf %298, %297 : vector<16x384xf32>
    %300 = math.tanh %299 : vector<16x384xf32>
    %cst_106 = arith.constant 5.000000e-01 : f32
    %301 = vector.broadcast %cst_106 : f32 to vector<16x384xf32>
    %302 = arith.mulf %301, %300 : vector<16x384xf32>
    %cst_107 = arith.constant 5.000000e-01 : f32
    %303 = vector.broadcast %cst_107 : f32 to vector<16x384xf32>
    %304 = arith.addf %302, %303 : vector<16x384xf32>
    %305 = vector.extract_strided_slice %296 {offsets = [0, 384], sizes = [16, 128], strides = [1, 1]} : vector<16x512xf32> to vector<16x128xf32>
    %306 = math.tanh %305 : vector<16x128xf32>
    %307 = vector.extract_strided_slice %304 {offsets = [0, 0], sizes = [16, 128], strides = [1, 1]} : vector<16x384xf32> to vector<16x128xf32>
    %308 = vector.extract_strided_slice %304 {offsets = [0, 128], sizes = [16, 128], strides = [1, 1]} : vector<16x384xf32> to vector<16x128xf32>
    %309 = vector.extract_strided_slice %304 {offsets = [0, 256], sizes = [16, 128], strides = [1, 1]} : vector<16x384xf32> to vector<16x128xf32>
    %310 = arith.mulf %308, %290 : vector<16x128xf32>
    %311 = arith.mulf %307, %306 : vector<16x128xf32>
    %312 = arith.addf %310, %311 : vector<16x128xf32>
    %313 = math.tanh %312 : vector<16x128xf32>
    %314 = arith.mulf %309, %313 : vector<16x128xf32>
    %c80_108 = arith.constant 80 : index
    %c0_109 = arith.constant 0 : index
    %315 = vector.load %arg11[%c80_108, %c0_109] : memref<128x512xf32, #tpu.memory_space<vmem>>, vector<16x512xf32>
    %316 = arith.truncf %314 : vector<16x128xf32> to vector<16x128xbf16>
    %cst_110 = arith.constant dense<0.000000e+00> : vector<16x512xf32>
    %317 = tpu.matmul %316, %200, %cst_110 {dimension_numbers = #tpu.dot_dimension_numbers<[1], [0], [0], [1], [0, 0, 1, 1], [], []>} : vector<16x128xbf16>, vector<128x512xbf16>, vector<16x512xf32> -> vector<16x512xf32>
    %318 = arith.addf %315, %317 : vector<16x512xf32>
    %319 = vector.extract_strided_slice %318 {offsets = [0, 0], sizes = [16, 384], strides = [1, 1]} : vector<16x512xf32> to vector<16x384xf32>
    %cst_111 = arith.constant 5.000000e-01 : f32
    %320 = vector.broadcast %cst_111 : f32 to vector<16x384xf32>
    %321 = arith.mulf %320, %319 : vector<16x384xf32>
    %322 = math.tanh %321 : vector<16x384xf32>
    %cst_112 = arith.constant 5.000000e-01 : f32
    %323 = vector.broadcast %cst_112 : f32 to vector<16x384xf32>
    %324 = arith.mulf %323, %322 : vector<16x384xf32>
    %cst_113 = arith.constant 5.000000e-01 : f32
    %325 = vector.broadcast %cst_113 : f32 to vector<16x384xf32>
    %326 = arith.addf %324, %325 : vector<16x384xf32>
    %327 = vector.extract_strided_slice %318 {offsets = [0, 384], sizes = [16, 128], strides = [1, 1]} : vector<16x512xf32> to vector<16x128xf32>
    %328 = math.tanh %327 : vector<16x128xf32>
    %329 = vector.extract_strided_slice %326 {offsets = [0, 0], sizes = [16, 128], strides = [1, 1]} : vector<16x384xf32> to vector<16x128xf32>
    %330 = vector.extract_strided_slice %326 {offsets = [0, 128], sizes = [16, 128], strides = [1, 1]} : vector<16x384xf32> to vector<16x128xf32>
    %331 = vector.extract_strided_slice %326 {offsets = [0, 256], sizes = [16, 128], strides = [1, 1]} : vector<16x384xf32> to vector<16x128xf32>
    %332 = arith.mulf %330, %312 : vector<16x128xf32>
    %333 = arith.mulf %329, %328 : vector<16x128xf32>
    %334 = arith.addf %332, %333 : vector<16x128xf32>
    %335 = math.tanh %334 : vector<16x128xf32>
    %336 = arith.mulf %331, %335 : vector<16x128xf32>
    %c96_114 = arith.constant 96 : index
    %c0_115 = arith.constant 0 : index
    %337 = vector.load %arg11[%c96_114, %c0_115] : memref<128x512xf32, #tpu.memory_space<vmem>>, vector<16x512xf32>
    %338 = arith.truncf %336 : vector<16x128xf32> to vector<16x128xbf16>
    %cst_116 = arith.constant dense<0.000000e+00> : vector<16x512xf32>
    %339 = tpu.matmul %338, %200, %cst_116 {dimension_numbers = #tpu.dot_dimension_numbers<[1], [0], [0], [1], [0, 0, 1, 1], [], []>} : vector<16x128xbf16>, vector<128x512xbf16>, vector<16x512xf32> -> vector<16x512xf32>
    %340 = arith.addf %337, %339 : vector<16x512xf32>
    %341 = vector.extract_strided_slice %340 {offsets = [0, 0], sizes = [16, 384], strides = [1, 1]} : vector<16x512xf32> to vector<16x384xf32>
    %cst_117 = arith.constant 5.000000e-01 : f32
    %342 = vector.broadcast %cst_117 : f32 to vector<16x384xf32>
    %343 = arith.mulf %342, %341 : vector<16x384xf32>
    %344 = math.tanh %343 : vector<16x384xf32>
    %cst_118 = arith.constant 5.000000e-01 : f32
    %345 = vector.broadcast %cst_118 : f32 to vector<16x384xf32>
    %346 = arith.mulf %345, %344 : vector<16x384xf32>
    %cst_119 = arith.constant 5.000000e-01 : f32
    %347 = vector.broadcast %cst_119 : f32 to vector<16x384xf32>
    %348 = arith.addf %346, %347 : vector<16x384xf32>
    %349 = vector.extract_strided_slice %340 {offsets = [0, 384], sizes = [16, 128], strides = [1, 1]} : vector<16x512xf32> to vector<16x128xf32>
    %350 = math.tanh %349 : vector<16x128xf32>
    %351 = vector.extract_strided_slice %348 {offsets = [0, 0], sizes = [16, 128], strides = [1, 1]} : vector<16x384xf32> to vector<16x128xf32>
    %352 = vector.extract_strided_slice %348 {offsets = [0, 128], sizes = [16, 128], strides = [1, 1]} : vector<16x384xf32> to vector<16x128xf32>
    %353 = vector.extract_strided_slice %348 {offsets = [0, 256], sizes = [16, 128], strides = [1, 1]} : vector<16x384xf32> to vector<16x128xf32>
    %354 = arith.mulf %352, %334 : vector<16x128xf32>
    %355 = arith.mulf %351, %350 : vector<16x128xf32>
    %356 = arith.addf %354, %355 : vector<16x128xf32>
    %357 = math.tanh %356 : vector<16x128xf32>
    %358 = arith.mulf %353, %357 : vector<16x128xf32>
    %c112_120 = arith.constant 112 : index
    %c0_121 = arith.constant 0 : index
    %359 = vector.load %arg11[%c112_120, %c0_121] : memref<128x512xf32, #tpu.memory_space<vmem>>, vector<16x512xf32>
    %360 = arith.truncf %358 : vector<16x128xf32> to vector<16x128xbf16>
    %cst_122 = arith.constant dense<0.000000e+00> : vector<16x512xf32>
    %361 = tpu.matmul %360, %200, %cst_122 {dimension_numbers = #tpu.dot_dimension_numbers<[1], [0], [0], [1], [0, 0, 1, 1], [], []>} : vector<16x128xbf16>, vector<128x512xbf16>, vector<16x512xf32> -> vector<16x512xf32>
    %362 = arith.addf %359, %361 : vector<16x512xf32>
    %363 = vector.extract_strided_slice %362 {offsets = [0, 0], sizes = [16, 384], strides = [1, 1]} : vector<16x512xf32> to vector<16x384xf32>
    %cst_123 = arith.constant 5.000000e-01 : f32
    %364 = vector.broadcast %cst_123 : f32 to vector<16x384xf32>
    %365 = arith.mulf %364, %363 : vector<16x384xf32>
    %366 = math.tanh %365 : vector<16x384xf32>
    %cst_124 = arith.constant 5.000000e-01 : f32
    %367 = vector.broadcast %cst_124 : f32 to vector<16x384xf32>
    %368 = arith.mulf %367, %366 : vector<16x384xf32>
    %cst_125 = arith.constant 5.000000e-01 : f32
    %369 = vector.broadcast %cst_125 : f32 to vector<16x384xf32>
    %370 = arith.addf %368, %369 : vector<16x384xf32>
    %371 = vector.extract_strided_slice %362 {offsets = [0, 384], sizes = [16, 128], strides = [1, 1]} : vector<16x512xf32> to vector<16x128xf32>
    %372 = math.tanh %371 : vector<16x128xf32>
    %373 = vector.extract_strided_slice %370 {offsets = [0, 0], sizes = [16, 128], strides = [1, 1]} : vector<16x384xf32> to vector<16x128xf32>
    %374 = vector.extract_strided_slice %370 {offsets = [0, 128], sizes = [16, 128], strides = [1, 1]} : vector<16x384xf32> to vector<16x128xf32>
    %375 = vector.extract_strided_slice %370 {offsets = [0, 256], sizes = [16, 128], strides = [1, 1]} : vector<16x384xf32> to vector<16x128xf32>
    %376 = arith.mulf %374, %356 : vector<16x128xf32>
    %377 = arith.mulf %373, %372 : vector<16x128xf32>
    %378 = arith.addf %376, %377 : vector<16x128xf32>
    %379 = math.tanh %378 : vector<16x128xf32>
    %380 = arith.mulf %375, %379 : vector<16x128xf32>
    %381 = arith.truncf %380 : vector<16x128xf32> to vector<16x128xbf16>
    %c0_126 = arith.constant 0 : index
    %c0_127 = arith.constant 0 : index
    %382 = vector.load %arg8[%c0_126, %c0_127] : memref<128x128xbf16, #tpu.memory_space<vmem>>, vector<128x128xbf16>
    %cst_128 = arith.constant dense<0.000000e+00> : vector<16x128xf32>
    %383 = tpu.matmul %381, %382, %cst_128 {dimension_numbers = #tpu.dot_dimension_numbers<[1], [0], [0], [1], [0, 0, 1, 1], [], []>} : vector<16x128xbf16>, vector<128x128xbf16>, vector<16x128xf32> -> vector<16x128xf32>
    %c0_129 = arith.constant 0 : index
    %c0_130 = arith.constant 0 : index
    %384 = vector.load %arg9[%c0_129, %c0_130] : memref<1x128xf32, #tpu.memory_space<vmem>>, vector<1x128xf32>
    %385 = vector.broadcast %384 : vector<1x128xf32> to vector<16x128xf32>
    %386 = arith.addf %383, %385 : vector<16x128xf32>
    %c0_131 = arith.constant 0 : index
    %c0_132 = arith.constant 0 : index
    %387 = vector.load %arg10[%c0_131, %c0_132] : memref<16x128xf32, #tpu.memory_space<vmem>>, vector<16x128xf32>
    tpu.vector_store %arg10[%c0_131, %c0_132], %386 {strides = array<i32>} : memref<16x128xf32, #tpu.memory_space<vmem>>, vector<16x128xf32>,
    return
  }
  func.func @transform_0(%arg0: i32) -> (i32, i32, i32) {
    %c0_i32 = arith.constant 0 : i32
    %c0_i32_0 = arith.constant 0 : i32
    %c0_i32_1 = arith.constant 0 : i32
    return %arg0, %c0_i32, %c0_i32_0 : i32, i32, i32
  }
  func.func @transform_1(%arg0: i32) -> (i32, i32) {
    %c0_i32 = arith.constant 0 : i32
    %c0_i32_0 = arith.constant 0 : i32
    %c0_i32_1 = arith.constant 0 : i32
    return %c0_i32, %c0_i32_0 : i32, i32
  }
  func.func @transform_2(%arg0: i32) -> (i32, i32) {
    %c0_i32 = arith.constant 0 : i32
    %c0_i32_0 = arith.constant 0 : i32
    %c0_i32_1 = arith.constant 0 : i32
    return %c0_i32, %c0_i32_0 : i32, i32
  }
  func.func @transform_3(%arg0: i32) -> (i32, i32) {
    %c0_i32 = arith.constant 0 : i32
    %c0_i32_0 = arith.constant 0 : i32
    %c0_i32_1 = arith.constant 0 : i32
    return %c0_i32, %c0_i32_0 : i32, i32
  }
  func.func @transform_4(%arg0: i32) -> (i32, i32) {
    %c0_i32 = arith.constant 0 : i32
    %c0_i32_0 = arith.constant 0 : i32
    %c0_i32_1 = arith.constant 0 : i32
    return %c0_i32, %c0_i32_0 : i32, i32
  }
  func.func @transform_5(%arg0: i32) -> (i32, i32) {
    %c0_i32 = arith.constant 0 : i32
    %c0_i32_0 = arith.constant 0 : i32
    %c0_i32_1 = arith.constant 0 : i32
    return %c0_i32, %c0_i32_0 : i32, i32
  }
  func.func @transform_6(%arg0: i32) -> (i32, i32) {
    %c0_i32 = arith.constant 0 : i32
    %c0_i32_0 = arith.constant 0 : i32
    %c0_i32_1 = arith.constant 0 : i32
    return %c0_i32, %c0_i32_0 : i32, i32
  }
  func.func @transform_7(%arg0: i32) -> (i32, i32) {
    %c0_i32 = arith.constant 0 : i32
    %c0_i32_0 = arith.constant 0 : i32
    %c0_i32_1 = arith.constant 0 : i32
    return %c0_i32, %c0_i32_0 : i32, i32
  }
  func.func @transform_8(%arg0: i32) -> (i32, i32) {
    %c0_i32 = arith.constant 0 : i32
    %c0_i32_0 = arith.constant 0 : i32
    %c0_i32_1 = arith.constant 0 : i32
    return %c0_i32, %c0_i32_0 : i32, i32
  }
  func.func @transform_9(%arg0: i32) -> (i32, i32) {
    %c0_i32 = arith.constant 0 : i32
    %c0_i32_0 = arith.constant 0 : i32
    return %arg0, %c0_i32 : i32, i32
  }
}

</mosaic_0001>

<bundles_post_ra>
// kernel: lstm_classifier_forward.1
= control target key start
LH: loop header
LB: loop body
LE: loop exit
PB: predicated region body
PF: predicated region fallthrough
CT: control target
= control target key end

     0   :  { %14 = vsyncpa [#allocation5], 0  ;;  %s5881_s0 = inlined_call_operand.vmem [shape: bf16[1,128,16], index: 0, kind: input, shape index: {}]   ;;  %s5882_s1 = inlined_call_operand.vmem [shape: bf16[16,512], index: 1, kind: input, shape index: {}]   ;;  %s5883_s2 = inlined_call_operand.hbm [shape: bf16[128,512], index: 2, kind: input, shape index: {}]   ;;  %s5884_s3 = inlined_call_operand.vmem [shape: f32[1,512], index: 3, kind: input, shape index: {}]   ;;  %s5885_s4 = inlined_call_operand.hbm [shape: bf16[128,512], index: 4, kind: input, shape index: {}]   ;;  %s5886_s5 = inlined_call_operand.hbm [shape: bf16[128,512], index: 5, kind: input, shape index: {}]   ;;  %s5887_s6 = inlined_call_operand.vmem [shape: f32[1,512], index: 6, kind: input, shape index: {}]   ;;  %s5888_s7 = inlined_call_operand.vmem [shape: bf16[128,128], index: 7, kind: input, shape index: {}]   ;;  %s5889_s8 = inlined_call_operand.vmem [shape: f32[1,128], index: 8, kind: input, shape index: {}]   ;;  %s5890_s9 = inlined_call_operand.vmem [shape: f32[16,128], index: 9, kind: output, shape index: {}]  }
   0x1   :  { %15 = vsyncpa [#allocation7], 0  ;;  %s4567_s30 = smov [#allocation6]   ;;  %s4568_s11 = smov [#allocation4]  }
   0x2   :  { %s39_s10 = sshll.u32 %s4567_s30, 4  ;;  %s25_s12 = sshll.u32 %s4568_s11, 4  ;;  %s40_s10 = int_to_ptr.vmem [resolvable:$true] %s39_s10  ;;  %s4625_s12 = int_to_ptr.vmem [resolvable:$true] %s25_s12 }
   0x3   :  { %s4497_s15 = scalar_lea.hbm %s5885_s4, 4096 }
   0x4   :  { %p4498_p0 = scmp.ne.s32.totalorder %s5885_s4, %s4497_s15  ;;  %p4501_p1 = scmp.lt.u32.totalorder %s4497_s15, %s5885_s4 }
   0x6   :  { %p4503_p2 = pnand %p4501_p1, %p4498_p0 }
   0x8   :  { %4506 = shalt.err (!%p4503_p2)
}
   0x9   :  { %s4507_s20 = scalar_lea.vmem %s40_s10, 4096  ;;  %p4512_p4 = scmp.lt.s32.totalorder %s40_s10, %s40_s10 }
   0xa   :  { %p4508_p3 = scmp.ne.s32.totalorder %s40_s10, %s4507_s20  ;;  %p4513_p5 = scmp.lt.s32.totalorder %s4507_s20, %s4507_s20 }
   0xc   :  { %p4514_p6 = por %p4513_p5, %p4512_p4 }
   0xe   :  { %p4515_p7 = pnand %p4514_p6, %p4508_p3 }
  0x10   :  { %4518 = shalt.err (!%p4515_p7)
}
  0x11   :  { %s4569_s21 = smov 256   ;;  %s4570_s22 = smov 16  }
  0x12   :  { %45 = dma.hbm_to_vmem [thread:$0]  %s5885_s4, 4096, %s40_s10, [#allocation7], %s4569_s21, %s4569_s21, %s4570_s22  }
  0x13   :  { %s4519_s27 = scalar_lea.hbm %s5883_s2, 4096 }
  0x14   :  { %p4520_p8 = scmp.ne.s32.totalorder %s5883_s2, %s4519_s27  ;;  %p4523_p9 = scmp.lt.u32.totalorder %s4519_s27, %s5883_s2 }
  0x16   :  { %p4525_p10 = pnand %p4523_p9, %p4520_p8 }
  0x18   :  { %4528 = shalt.err (!%p4525_p10)
}
  0x19   :  { %s4529_s13 = scalar_lea.vmem %s4625_s12, 4096  ;;  %p4534_p12 = scmp.lt.s32.totalorder %s4625_s12, %s4625_s12 }
  0x1a   :  { %p4530_p11 = scmp.ne.s32.totalorder %s4625_s12, %s4529_s13  ;;  %p4535_p13 = scmp.lt.s32.totalorder %s4529_s13, %s4529_s13 }
  0x1c   :  { %p4536_p0 = por %p4535_p13, %p4534_p12 }
  0x1e   :  { %p4537_p1 = pnand %p4536_p0, %p4530_p11 }
  0x20   :  { %4540 = shalt.err (!%p4537_p1)
}
  0x21   :  { %31 = dma.hbm_to_vmem [thread:$0]  %s5883_s2, 4096, %s4625_s12, [#allocation5], %s4569_s21, %s4569_s21, %s4570_s22  }
  0x22   :  { %s4571_s14 = smov [#allocation8]   ;;  %s4541_s18 = scalar_lea.hbm %s5886_s5, 4096 }
  0x23   :  { %s51_s15 = sshll.u32 %s4571_s14, 4  ;;  %p4542_p2 = scmp.ne.s32.totalorder %s5886_s5, %s4541_s18  ;;  %s52_s15 = int_to_ptr.vmem [resolvable:$true] %s51_s15 }
  0x24   :  { %p4545_p3 = scmp.lt.u32.totalorder %s4541_s18, %s5886_s5 }
  0x26   :  { %p4547_p4 = pnand %p4545_p3, %p4542_p2 }
  0x28   :  { %4550 = shalt.err (!%p4547_p4)
}
  0x29   :  { %s4551_s25 = scalar_lea.vmem %s52_s15, 4096  ;;  %p4556_p6 = scmp.lt.s32.totalorder %s52_s15, %s52_s15 }
  0x2a   :  { %p4552_p5 = scmp.ne.s32.totalorder %s52_s15, %s4551_s25  ;;  %p4557_p7 = scmp.lt.s32.totalorder %s4551_s25, %s4551_s25 }
  0x2c   :  { %p4558_p8 = por %p4557_p7, %p4556_p6 }
  0x2e   :  { %p4559_p9 = pnand %p4558_p8, %p4552_p5 }
  0x30   :  { %4562 = shalt.err (!%p4559_p9)
}
  0x31   :  { %57 = dma.hbm_to_vmem [thread:$0]  %s5886_s5, 4096, %s52_s15, [#allocation7], %s4569_s21, %s4569_s21, %s4570_s22  }
  0x32   :  { %4563 = dma.done.wait [#allocation5], 4096  }
  0x33   :  { %4564 = vsyncadd [#allocation5], 4294963200 }
  0x34   :  { %4565 = dma.done.wait [#allocation7], 8192  }
  0x35   :  { %4566 = vsyncadd [#allocation7], 4294959104  ;;  %v5895_v0 = vmov 0   ;;  %v3947_v1 = vld [vmem:[%s5882_s1 + $0x4] ss:$16 sps:$4 sm:$0xff]   ;;  %vm208_vm0 = vcmask 130048   ;;  %v128_v45 = vlaneseq }
  0x36   :  { %325 = vmatprep.mubr.bf16.mxu1 %v5895_v0  ;;  %265 = vmatprep.mubr.bf16.mxu0 %v5895_v0  ;;  %v3949_v2 = vld [vmem:[%s5882_s1] ss:$16 sps:$4 sm:$0xff]   ;;  %v3951_v4 = vld [vmem:[%s5882_s1 + $0x8] ss:$16 sps:$4 sm:$0xff]   ;;  %v3953_v5 = vld [vmem:[%s5882_s1 + $0xc] ss:$16 sps:$4 sm:$0xff]  }
  0x37   :  { %3713 = vmatprep.subr.bf16.mxu1 %v3947_v1  ;;  %v4688_v3 = vld [vmem:[%s5881_s0 + $0x30] sm:$0xff]   ;;  %233 = vmatprep.subr.bf16.mxu0 %v3947_v1  ;;  %v3954_v6 = vld [vmem:[%s5881_s0] sm:$0xff]   ;;  %v4702_v7 = vld [vmem:[#allocation4 + $0xc] ss:$16 sps:$4 sm:$0xff]   ;;  %v4853_v46 = vshrl.u32 %v128_v45, 7  ;;  %vm4574_vm1 = vmmov 0  }
  0x38   :  { %3714 = vmatpush1.bf16.msra.mxu1 %v3949_v2  ;;  %234 = vmatpush1.bf16.msra.mxu0 %v3949_v2  ;;  %v4708_v8 = vld [vmem:[%s5881_s0 + $0x38] sm:$0xff]   ;;  %v3959_v9 = vld [vmem:[%s5881_s0 + $0x8] sm:$0xff]   ;;  %v3963_v11 = vld [vmem:[%s5881_s0 + $0x10] sm:$0xff]  }
  0x39   :  { %346 = vmatprep.subr.bf16.mxu1 %v3953_v5  ;;  %v4720_v10 = vld [vmem:[#allocation4 + $0x8] ss:$16 sps:$4 sm:$0xff]   ;;  %v4730_v12 = vld [vmem:[#allocation4 + $0x2c] ss:$16 sps:$4 sm:$0xff]   ;;  %v4735_v14 = vld [vmem:[#allocation4 + $0x4] ss:$16 sps:$4 sm:$0xff]  }
  0x3a   :  { %v4732_v13 = vld [vmem:[#allocation4 + $0x28] ss:$16 sps:$4 sm:$0xff]   ;;  %v4737_v15 = vld [vmem:[#allocation4] ss:$16 sps:$4 sm:$0xff]   ;;  %737 = vmatprep.subr.bf16.mxu0 %v4735_v14  ;;  %v4758_v18 = vld [vmem:[#allocation4 + $0x24] ss:$16 sps:$4 sm:$0xff]  }
  0x3b   :  { %3569 = vmatmul.mubr.msk.bf16.vlgmr.msra.gmra.mrb[0].mxu1 %vm208_vm0, %v4688_v3  ;;  %3563 = vmatmul.mubr.msk.bf16.vlgmr.msra.gmra.mrb[0].mxu0 %vm208_vm0, %v3954_v6  ;;  %v3973_v16 = vld [vmem:[%s5881_s0 + $0x18] sm:$0xff]   ;;  %v3980_v17 = vld [vmem:[%s5881_s0 + $0x20] sm:$0xff]   ;;  %v3987_v23 = vld [vmem:[%s5881_s0 + $0x28] sm:$0xff]   ;;  %5903 = vst [vmem:[#allocation11_spill] sm:$0xff] %v4853_v46  ;;  %v5894_v47 = vsub.s32 0, %v4853_v46  ;;  %v5893_v48 = vsub.s32 1, %v4853_v46 }
  0x3c   :  { %347 = vmatpush1.bf16.msra.mxu1 %v3951_v4  ;;  %335 = vmatprep.mubr.bf16.mxu1 %v5895_v0  ;;  %v4760_v19 = vld [vmem:[#allocation4 + $0x4c] ss:$16 sps:$4 sm:$0xff]   ;;  %v4766_v20 = vld [vmem:[#allocation4 + $0x20] ss:$16 sps:$4 sm:$0xff]   ;;  %v4768_v21 = vld [vmem:[#allocation4 + $0x48] ss:$16 sps:$4 sm:$0xff]  }
  0x3d   :  { %780 = vmatprep.subr.bf16.mxu1 %v4702_v7  ;;  %275 = vmatprep.mubr.bf16.mxu0 %v5895_v0  ;;  %v4772_v22 = vld [vmem:[#allocation4 + $0x44] ss:$16 sps:$4 sm:$0xff]   ;;  %v4777_v24 = vld [vmem:[#allocation4 + $0x40] ss:$16 sps:$4 sm:$0xff]   ;;  %v4783_v25 = vld [vmem:[#allocation4 + $0x6c] ss:$16 sps:$4 sm:$0xff]  }
  0x3e   :  { %738 = vmatpush1.bf16.msra.mxu0 %v4737_v15  ;;  %v4785_v26 = vld [vmem:[#allocation4 + $0x64] ss:$16 sps:$4 sm:$0xff]   ;;  %v4788_v27 = vld [vmem:[#allocation4 + $0x68] ss:$16 sps:$4 sm:$0xff]   ;;  %v4790_v28 = vld [vmem:[#allocation4 + $0x60] ss:$16 sps:$4 sm:$0xff]  }
  0x3f   :  { %739 = vmatprep.subr.bf16.mxu0 %v4758_v18  ;;  %v4797_v29 = vld [vmem:[#allocation4 + $0x8c] ss:$16 sps:$4 sm:$0xff]   ;;  %v4799_v30 = vld [vmem:[#allocation4 + $0x84] ss:$16 sps:$4 sm:$0xff]   ;;  %v4801_v31 = vld [vmem:[#allocation4 + $0x88] ss:$16 sps:$4 sm:$0xff]  }
  0x40   :  { %v4803_v32 = vld [vmem:[#allocation4 + $0x80] ss:$16 sps:$4 sm:$0xff]   ;;  %v4809_v33 = vld [vmem:[#allocation4 + $0xa4] ss:$16 sps:$4 sm:$0xff]   ;;  %v4811_v34 = vld [vmem:[#allocation4 + $0xac] ss:$16 sps:$4 sm:$0xff]  }
  0x41   :  { %v4813_v35 = vld [vmem:[#allocation4 + $0xa0] ss:$16 sps:$4 sm:$0xff]   ;;  %v4815_v36 = vld [vmem:[#allocation4 + $0xa8] ss:$16 sps:$4 sm:$0xff]   ;;  %v4819_v37 = vld [vmem:[#allocation4 + $0xc4] ss:$16 sps:$4 sm:$0xff]  }
  0x42   :  { %740 = vmatpush1.bf16.msra.mxu0 %v4766_v20  ;;  %v4823_v38 = vld [vmem:[#allocation4 + $0xcc] ss:$16 sps:$4 sm:$0xff]   ;;  %v4828_v39 = vld [vmem:[#allocation4 + $0xc0] ss:$16 sps:$4 sm:$0xff]   ;;  %v4830_v40 = vld [vmem:[#allocation4 + $0xc8] ss:$16 sps:$4 sm:$0xff]  }
  0x43   :  { %3570 = vmatmul.mubr.msk.bf16.gmra.mrb[4].mxu1 %vm208_vm0, %v4708_v8  ;;  %3564 = vmatmul.mubr.msk.bf16.gmra.mrb[4].mxu0 %vm208_vm0, %v3959_v9  ;;  %v4834_v41 = vld [vmem:[#allocation4 + $0xe4] ss:$16 sps:$4 sm:$0xff]   ;;  %v4836_v42 = vld [vmem:[#allocation4 + $0xec] ss:$16 sps:$4 sm:$0xff]   ;;  %v4840_v43 = vld [vmem:[#allocation4 + $0xe0] ss:$16 sps:$4 sm:$0xff]  }
  0x44   :  { %378 = vmatprep.mubr.bf16.mxu1 %v5895_v0  ;;  %285 = vmatprep.mubr.bf16.mxu0 %v5895_v0  ;;  %v4842_v44 = vld [vmem:[#allocation4 + $0xe8] ss:$16 sps:$4 sm:$0xff]   ;;  %v110_v49 = vld [vmem:[%s5884_s3] sm:$0xf] }
  0x45   :  { %741 = vmatprep.subr.bf16.mxu0 %v4772_v22  ;;  %v4862_v50 = vrot.slane %v110_v49, %v5894_v47  ;;  %v4868_v52 = vrot.slane %v110_v49, %v5893_v48 }
  0x46   :  { %742 = vmatpush1.bf16.msra.mxu0 %v4777_v24 }
  0x47   :  { %743 = vmatprep.subr.bf16.mxu0 %v4785_v26 }
  0x4a   :  { %744 = vmatpush1.bf16.msra.mxu0 %v4790_v28 }
  0x4b   :  { %3571 = vmatmul.mubr.msk.bf16.vlgmr.msra.gmra.mrb[8].mxu1 %vm208_vm0, %v3954_v6  ;;  %3565 = vmatmul.mubr.msk.bf16.gmra.mrb[8].mxu0 %vm208_vm0, %v3963_v11 }
  0x4c   :  { %388 = vmatprep.mubr.bf16.mxu1 %v5895_v0  ;;  %781 = vmatpush1.bf16.msra.mxu1 %v4720_v10 }
  0x4d   :  { %782 = vmatprep.subr.bf16.mxu1 %v4730_v12  ;;  %295 = vmatprep.mubr.bf16.mxu0 %v5895_v0 }
  0x4e   :  { %745 = vmatprep.subr.bf16.mxu0 %v4799_v30 }
  0x4f   :  { %746 = vmatpush1.bf16.msra.mxu0 %v4803_v32 }
  0x50   :  { %783 = vmatpush1.bf16.msra.mxu1 %v4732_v13  ;;  %747 = vmatprep.subr.bf16.mxu0 %v4809_v33 }
  0x51   :  { %784 = vmatprep.subr.bf16.mxu1 %v4760_v19 }
  0x53   :  { %3572 = vmatmul.mubr.msk.bf16.gmra.mrb[12].mxu1 %vm208_vm0, %v3959_v9  ;;  %3566 = vmatmul.mubr.msk.bf16.gmra.mrb[12].mxu0 %vm208_vm0, %v3973_v16  ;;  %v5892_v9 = vsub.s32 3, %v4853_v46 }
  0x54   :  { %398 = vmatprep.mubr.bf16.mxu1 %v5895_v0  ;;  %305 = vmatprep.mubr.bf16.mxu0 %v5895_v0 }
  0x55   :  { %785 = vmatpush1.bf16.msra.mxu1 %v4768_v21  ;;  %748 = vmatpush1.bf16.msra.mxu0 %v4813_v35 }
  0x56   :  { %786 = vmatprep.subr.bf16.mxu1 %v4783_v25  ;;  %749 = vmatprep.subr.bf16.mxu0 %v4819_v37 }
  0x59   :  { %787 = vmatpush1.bf16.msra.mxu1 %v4788_v27  ;;  %750 = vmatpush1.bf16.msra.mxu0 %v4828_v39 }
  0x5a   :  { %788 = vmatprep.subr.bf16.mxu1 %v4797_v29  ;;  %751 = vmatprep.subr.bf16.mxu0 %v4834_v41 }
  0x5b   :  { %3573 = vmatmul.mubr.msk.bf16.gmra.mrb[16].mxu1 %vm208_vm0, %v3963_v11  ;;  %3567 = vmatmul.mubr.msk.bf16.gmra.mrb[16].mxu0 %vm208_vm0, %v3980_v17 }
  0x5c   :  { %408 = vmatprep.mubr.bf16.mxu1 %v5895_v0  ;;  %315 = vmatprep.mubr.bf16.mxu0 %v5895_v0 }
  0x5d   :  { %789 = vmatpush1.bf16.msra.mxu1 %v4801_v31  ;;  %752 = vmatpush1.bf16.msra.mxu0 %v4840_v43 }
  0x5e   :  { %790 = vmatprep.subr.bf16.mxu1 %v4811_v34  ;;  %877 = vmatprep.subr.bf16.mxu0 %v4735_v14 }
  0x61   :  { %791 = vmatpush1.bf16.msra.mxu1 %v4815_v36 }
  0x62   :  { %792 = vmatprep.subr.bf16.mxu1 %v4823_v38 }
  0x63   :  { %3574 = vmatmul.mubr.msk.bf16.gmra.mrb[20].mxu1 %vm208_vm0, %v3973_v16  ;;  %3568 = vmatmul.mubr.msk.bf16.gmra.mrb[20].mxu0 %vm208_vm0, %v3987_v23  ;;  %v5891_v16 = vsub.s32 2, %v4853_v46 }
  0x64   :  { %418 = vmatprep.mubr.bf16.mxu1 %v5895_v0  ;;  %769 = vmatprep.mubr.bf16.mxu0 %v5895_v0 }
  0x65   :  { %793 = vmatpush1.bf16.msra.mxu1 %v4830_v40 }
  0x66   :  { %794 = vmatprep.subr.bf16.mxu1 %v4836_v42 }
  0x69   :  { %795 = vmatpush1.bf16.msra.mxu1 %v4842_v44 }
  0x6a   :  { %920 = vmatprep.subr.bf16.mxu1 %v4702_v7 }
  0x6b   :  { %3575 = vmatmul.mubr.msk.bf16.gmra.mrb[24].mxu1 %vm208_vm0, %v3980_v17  ;;  %v4892_v17 = vrot.slane %v110_v49, %v5892_v9 }
  0x6c   :  { %428 = vmatprep.mubr.bf16.mxu1 %v5895_v0 }
  0x73   :  { %3576 = vmatmul.mubr.msk.bf16.gmra.mrb[28].mxu1 %vm208_vm0, %v3987_v23  ;;  %v4896_v23 = vrot.slane %v110_v49, %v5891_v16 }
  0x74   :  { %438 = vmatprep.mubr.bf16.mxu1 %v5895_v0 }
  0x7b   :  { %3577 = vmatmul.mubr.msk.bf16.gmra.mrb[32].mxu1 %vm208_vm0, %v4688_v3 }
  0x7c   :  { %448 = vmatprep.mubr.bf16.mxu1 %v5895_v0 }
  0x83   :  { %3578 = vmatmul.mubr.msk.bf16.gmra.mrb[36].mxu1 %vm208_vm0, %v4708_v8 }
  0x84   :  { %812 = vmatprep.mubr.bf16.mxu1 %v5895_v0 }
 0x10e   :  { %v4864_v51 = vpop.f32.mrb[0].mxu1  ;;  %v267_v53 = vpop.f32.mrb[0].mxu0 }
 0x10f   :  { %v4870_v54 = vpop.f32.mrb[1].mxu1  ;;  %v269_v55 = vpop.f32.mrb[1].mxu0  ;;  %v268_v57 = vadd.f32 %v267_v53, %v4862_v50 }
 0x110   :  { %v4872_v56 = vpop.f32.mrb[2].mxu1  ;;  %v270_v58 = vadd.f32 %v269_v55, %v4868_v52  ;;  %v271_v59 = vpop.f32.mrb[2].mxu0 }
 0x111   :  { %v4876_v60 = vpop.f32.mrb[3].mxu1  ;;  %v273_v61 = vpop.f32.mrb[3].mxu0  ;;  %v531_v1 = vmul.f32 0.5, %v268_v57  ;;  %v272_v2 = vadd.f32 %v271_v59, %v4862_v50 }
 0x112   :  { %v532_v62 = vmul.f32 0.5, %v270_v58  ;;  %v274_v63 = vadd.f32 %v273_v61, %v4868_v52 }
 0x113   :  { %v534_v6 = vmul.f32 0.5, %v272_v2 }
 0x114   :  { %4113 = vtanh.f32 %v532_v62  ;;  %v535_v4 = vmul.f32 0.5, %v274_v63 }
 0x115   :  { %4115 = vtanh.f32 %v531_v1 }
 0x116   :  { %v4880_v3 = vpop.f32.mrb[4].mxu1  ;;  %4117 = vtanh.f32 %v535_v4 }
 0x117   :  { %5904 = vst [vmem:[#allocation12_spill] sm:$0xff] %v4880_v3  ;;  %v4882_v5 = vpop.f32.mrb[5].mxu1  ;;  %4119 = vtanh.f32 %v534_v6 }
 0x118   :  { %5905 = vst [vmem:[#allocation13_spill] sm:$0xff] %v4882_v5  ;;  %v4884_v8 = vpop.f32.mrb[6].mxu1 }
 0x119   :  { %5906 = vst [vmem:[#allocation14_spill] sm:$0xff] %v4884_v8  ;;  %v4887_v11 = vpop.f32.mrb[7].mxu1 }
 0x11a   :  { %5907 = vst [vmem:[#allocation15_spill] sm:$0xff] %v4887_v11 }
 0x11e   :  { %v380_v45 = vpop.f32.mrb[8].mxu1  ;;  %v4114_v55 = vpop.eup %4113 }
 0x11f   :  { %v382_v53 = vpop.f32.mrb[9].mxu1  ;;  %v4116_v61 = vpop.eup %4115  ;;  %v381_v62 = vadd.f32 %v380_v45, %v4896_v23  ;;  %v544_v1 = vmul.f32 0.5, %v4114_v55 }
 0x120   :  { %v383_v57 = vadd.f32 %v382_v53, %v4892_v17  ;;  %v384_v58 = vpop.f32.mrb[10].mxu1  ;;  %v4118_v4 = vpop.eup %4117  ;;  %v543_v49 = vmul.f32 0.5, %v4116_v61 }
 0x121   :  { %v386_v59 = vpop.f32.mrb[11].mxu1  ;;  %v385_v2 = vadd.f32 %v384_v58, %v4896_v23  ;;  %v4120_v6 = vpop.eup %4119  ;;  %v533_v16 = vmul.f32 0.5, %v381_v62  ;;  %v550_v9 = vadd.f32 0.5, %v544_v1  ;;  %v547_v48 = vmul.f32 0.5, %v4118_v4 }
 0x122   :  { %4121 = vtanh.f32 %v383_v57  ;;  %v387_v63 = vadd.f32 %v386_v59, %v4892_v17  ;;  %v549_v53 = vadd.f32 0.5, %v543_v49  ;;  %v546_v0 = vmul.f32 0.5, %v4120_v6 }
 0x123   :  { %v536_v47 = vmul.f32 0.5, %v385_v2  ;;  %v557_v46 = vmul.f32 0.0, %v550_v9  ;;  %v553_v11 = vadd.f32 0.5, %v547_v48 }
 0x124   :  { %4123 = vtanh.f32 %v387_v63  ;;  %v552_v57 = vadd.f32 0.5, %v546_v0 }
 0x125   :  { %4125 = vtanh.f32 %v533_v16  ;;  %v558_v8 = vmul.f32 0.0, %v553_v11 }
 0x126   :  { %4127 = vtanh.f32 %v536_v47 }
 0x12c   :  { %v4122_v45 = vpop.eup %4121 }
 0x12d   :  { %v559_v59 = vmul.f32 %v4122_v45, %v549_v53 }
 0x12e   :  { %v4124_v55 = vpop.eup %4123 }
 0x12f   :  { %v4902_v58 = vadd.f32 %v559_v59, %v557_v46  ;;  %v560_v63 = vmul.f32 %v4124_v55, %v552_v57  ;;  %v4126_v62 = vpop.eup %4125  ;;  %v5908_v46 = vmov 0  }
 0x130   :  { %v4128_v1 = vpop.eup %4127  ;;  %v545_v16 = vmul.f32 0.5, %v4126_v62 }
 0x131   :  { %4129 = vtanh.f32 %v4902_v58  ;;  %v4905_v61 = vadd.f32 %v560_v63, %v558_v8  ;;  %v548_v9 = vmul.f32 0.5, %v4128_v1 }
 0x132   :  { %v551_v47 = vadd.f32 0.5, %v545_v16 }
 0x133   :  { %4131 = vtanh.f32 %v4905_v61  ;;  %v554_v2 = vadd.f32 0.5, %v548_v9 }
 0x13b   :  { %v4130_v48 = vpop.eup %4129 }
 0x13c   :  { %v565_v4 = vmul.f32 %v4130_v48, %v551_v47 }
 0x13d   :  { %v4132_v0 = vpop.eup %4131 }
 0x13e   :  { %v566_v49 = vmul.f32 %v4132_v0, %v554_v2 }
 0x140   :  { %v4908_v11 = vpack.c.bf16 %v566_v49, %v565_v4 }
 0x142   :  { %770 = vmatmul.mubr.bf16.vlgmr.msra.gmra.mrb[4].mxu0 %v4908_v11  ;;  %813 = vmatmul.mubr.bf16.vlgmr.msra.gmra.mrb[12].mxu1 %v4908_v11 }
 0x143   :  { %878 = vmatpush1.bf16.msra.mxu0 %v4737_v15  ;;  %921 = vmatpush1.bf16.msra.mxu1 %v4720_v10 }
 0x144   :  { %879 = vmatprep.subr.bf16.mxu0 %v4758_v18  ;;  %922 = vmatprep.subr.bf16.mxu1 %v4730_v12 }
 0x145   :  { %909 = vmatprep.mubr.bf16.mxu0 %v5908_v46  ;;  %952 = vmatprep.mubr.bf16.mxu1 %v5908_v46 }
 0x147   :  { %880 = vmatpush1.bf16.msra.mxu0 %v4766_v20  ;;  %923 = vmatpush1.bf16.msra.mxu1 %v4732_v13 }
 0x148   :  { %881 = vmatprep.subr.bf16.mxu0 %v4772_v22  ;;  %924 = vmatprep.subr.bf16.mxu1 %v4760_v19 }
 0x14b   :  { %882 = vmatpush1.bf16.msra.mxu0 %v4777_v24  ;;  %925 = vmatpush1.bf16.msra.mxu1 %v4768_v21 }
 0x14c   :  { %883 = vmatprep.subr.bf16.mxu0 %v4785_v26  ;;  %926 = vmatprep.subr.bf16.mxu1 %v4783_v25 }
 0x14f   :  { %884 = vmatpush1.bf16.msra.mxu0 %v4790_v28  ;;  %927 = vmatpush1.bf16.msra.mxu1 %v4788_v27 }
 0x150   :  { %885 = vmatprep.subr.bf16.mxu0 %v4799_v30  ;;  %928 = vmatprep.subr.bf16.mxu1 %v4797_v29 }
 0x153   :  { %886 = vmatpush1.bf16.msra.mxu0 %v4803_v32  ;;  %929 = vmatpush1.bf16.msra.mxu1 %v4801_v31 }
 0x154   :  { %887 = vmatprep.subr.bf16.mxu0 %v4809_v33  ;;  %930 = vmatprep.subr.bf16.mxu1 %v4811_v34 }
 0x157   :  { %888 = vmatpush1.bf16.msra.mxu0 %v4813_v35  ;;  %931 = vmatpush1.bf16.msra.mxu1 %v4815_v36 }
 0x158   :  { %889 = vmatprep.subr.bf16.mxu0 %v4819_v37  ;;  %932 = vmatprep.subr.bf16.mxu1 %v4823_v38 }
 0x15b   :  { %890 = vmatpush1.bf16.msra.mxu0 %v4828_v39  ;;  %933 = vmatpush1.bf16.msra.mxu1 %v4830_v40 }
 0x15c   :  { %891 = vmatprep.subr.bf16.mxu0 %v4834_v41  ;;  %934 = vmatprep.subr.bf16.mxu1 %v4836_v42 }
 0x15f   :  { %892 = vmatpush1.bf16.msra.mxu0 %v4840_v43  ;;  %935 = vmatpush1.bf16.msra.mxu1 %v4842_v44 }
 0x160   :  { %1017 = vmatprep.subr.bf16.mxu0 %v4735_v14  ;;  %1060 = vmatprep.subr.bf16.mxu1 %v4702_v7 }
 0x215   :  { %v771_v8 = vpop.f32.mrb[4].mxu0  ;;  %v814_v6 = vpop.f32.mrb[12].mxu1 }
 0x216   :  { %v3715_v53 = vadd.f32 %v771_v8, %v4862_v50  ;;  %v773_v45 = vpop.f32.mrb[5].mxu0  ;;  %v816_v57 = vpop.f32.mrb[13].mxu1  ;;  %v3751_v8 = vadd.f32 %v814_v6, %v4896_v23 }
 0x217   :  { %v3716_v59 = vadd.f32 %v773_v45, %v4868_v52  ;;  %v775_v55 = vpop.f32.mrb[6].mxu0  ;;  %v818_v63 = vpop.f32.mrb[14].mxu1  ;;  %v3752_v2 = vadd.f32 %v816_v57, %v4892_v17 }
 0x218   :  { %v831_v62 = vmul.f32 0.5, %v3715_v53  ;;  %v3717_v1 = vadd.f32 %v775_v55, %v4862_v50  ;;  %v777_v16 = vpop.f32.mrb[7].mxu0  ;;  %v820_v9 = vpop.f32.mrb[15].mxu1  ;;  %v3753_v53 = vadd.f32 %v818_v63, %v4896_v23  ;;  %v833_v55 = vmul.f32 0.5, %v3751_v8 }
 0x219   :  { %v832_v48 = vmul.f32 0.5, %v3716_v59  ;;  %v3718_v47 = vadd.f32 %v777_v16, %v4868_v52  ;;  %v3754_v49 = vadd.f32 %v820_v9, %v4892_v17 }
 0x21a   :  { %4133 = vtanh.f32 %v831_v62  ;;  %v834_v0 = vmul.f32 0.5, %v3717_v1  ;;  %v836_v62 = vmul.f32 0.5, %v3753_v53 }
 0x21b   :  { %v835_v4 = vmul.f32 0.5, %v3718_v47  ;;  %4135 = vtanh.f32 %v832_v48 }
 0x21c   :  { %4137 = vtanh.f32 %v834_v0 }
 0x21d   :  { %4139 = vtanh.f32 %v3752_v2 }
 0x21e   :  { %4141 = vtanh.f32 %v835_v4 }
 0x21f   :  { %4143 = vtanh.f32 %v3754_v49 }
 0x220   :  { %4145 = vtanh.f32 %v833_v55 }
 0x221   :  { %4147 = vtanh.f32 %v836_v62 }
 0x224   :  { %v4134_v45 = vpop.eup %4133 }
 0x225   :  { %v843_v59 = vmul.f32 0.5, %v4134_v45  ;;  %v4136_v16 = vpop.eup %4135 }
 0x226   :  { %v4138_v5 = vpop.eup %4137  ;;  %v844_v1 = vmul.f32 0.5, %v4136_v16 }
 0x227   :  { %v849_v57 = vadd.f32 0.5, %v843_v59  ;;  %v4140_v47 = vpop.eup %4139  ;;  %v846_v48 = vmul.f32 0.5, %v4138_v5 }
 0x228   :  { %v4142_v0 = vpop.eup %4141  ;;  %v850_v9 = vadd.f32 0.5, %v844_v1 }
 0x229   :  { %v859_v2 = vmul.f32 %v4140_v47, %v849_v57  ;;  %v852_v4 = vadd.f32 0.5, %v846_v48  ;;  %v847_v6 = vmul.f32 0.5, %v4142_v0  ;;  %v4144_v49 = vpop.eup %4143 }
 0x22a   :  { %v857_v63 = vmul.f32 %v850_v9, %v4902_v58  ;;  %v4146_v5 = vpop.eup %4145 }
 0x22b   :  { %v853_v3 = vadd.f32 0.5, %v847_v6  ;;  %v860_v45 = vmul.f32 %v4144_v49, %v852_v4  ;;  %v4148_v55 = vpop.eup %4147  ;;  %v845_v16 = vmul.f32 0.5, %v4146_v5 }
 0x22c   :  { %v4955_v8 = vadd.f32 %v859_v2, %v857_v63  ;;  %v848_v62 = vmul.f32 0.5, %v4148_v55 }
 0x22d   :  { %v858_v53 = vmul.f32 %v853_v3, %v4905_v61  ;;  %v851_v1 = vadd.f32 0.5, %v845_v16 }
 0x22e   :  { %4149 = vtanh.f32 %v4955_v8  ;;  %v854_v47 = vadd.f32 0.5, %v848_v62 }
 0x22f   :  { %v4959_v59 = vadd.f32 %v860_v45, %v858_v53 }
 0x231   :  { %4151 = vtanh.f32 %v4959_v59 }
 0x238   :  { %v4150_v57 = vpop.eup %4149 }
 0x239   :  { %v865_v48 = vmul.f32 %v4150_v57, %v851_v1 }
 0x23b   :  { %v4152_v58 = vpop.eup %4151 }
 0x23c   :  { %v866_v0 = vmul.f32 %v4152_v58, %v854_v47 }
 0x23e   :  { %v4962_v9 = vpack.c.bf16 %v866_v0, %v865_v48 }
 0x240   :  { %910 = vmatmul.mubr.bf16.vlgmr.msra.gmra.mrb[8].mxu0 %v4962_v9  ;;  %953 = vmatmul.mubr.bf16.vlgmr.msra.gmra.mrb[16].mxu1 %v4962_v9 }
 0x241   :  { %1018 = vmatpush1.bf16.msra.mxu0 %v4737_v15  ;;  %1061 = vmatpush1.bf16.msra.mxu1 %v4720_v10 }
 0x242   :  { %1019 = vmatprep.subr.bf16.mxu0 %v4758_v18  ;;  %1062 = vmatprep.subr.bf16.mxu1 %v4730_v12 }
 0x243   :  { %1049 = vmatprep.mubr.bf16.mxu0 %v5908_v46  ;;  %1092 = vmatprep.mubr.bf16.mxu1 %v5908_v46 }
 0x245   :  { %1020 = vmatpush1.bf16.msra.mxu0 %v4766_v20  ;;  %1063 = vmatpush1.bf16.msra.mxu1 %v4732_v13 }
 0x246   :  { %1021 = vmatprep.subr.bf16.mxu0 %v4772_v22  ;;  %1064 = vmatprep.subr.bf16.mxu1 %v4760_v19 }
 0x249   :  { %1022 = vmatpush1.bf16.msra.mxu0 %v4777_v24  ;;  %1065 = vmatpush1.bf16.msra.mxu1 %v4768_v21 }
 0x24a   :  { %1023 = vmatprep.subr.bf16.mxu0 %v4785_v26  ;;  %1066 = vmatprep.subr.bf16.mxu1 %v4783_v25 }
 0x24d   :  { %1024 = vmatpush1.bf16.msra.mxu0 %v4790_v28  ;;  %1067 = vmatpush1.bf16.msra.mxu1 %v4788_v27 }
 0x24e   :  { %1025 = vmatprep.subr.bf16.mxu0 %v4799_v30  ;;  %1068 = vmatprep.subr.bf16.mxu1 %v4797_v29 }
 0x251   :  { %1026 = vmatpush1.bf16.msra.mxu0 %v4803_v32  ;;  %1069 = vmatpush1.bf16.msra.mxu1 %v4801_v31 }
 0x252   :  { %1027 = vmatprep.subr.bf16.mxu0 %v4809_v33  ;;  %1070 = vmatprep.subr.bf16.mxu1 %v4811_v34 }
 0x255   :  { %1028 = vmatpush1.bf16.msra.mxu0 %v4813_v35  ;;  %1071 = vmatpush1.bf16.msra.mxu1 %v4815_v36 }
 0x256   :  { %1029 = vmatprep.subr.bf16.mxu0 %v4819_v37  ;;  %1072 = vmatprep.subr.bf16.mxu1 %v4823_v38 }
 0x259   :  { %1030 = vmatpush1.bf16.msra.mxu0 %v4828_v39  ;;  %1073 = vmatpush1.bf16.msra.mxu1 %v4830_v40 }
 0x25a   :  { %1031 = vmatprep.subr.bf16.mxu0 %v4834_v41  ;;  %1074 = vmatprep.subr.bf16.mxu1 %v4836_v42 }
 0x25d   :  { %1032 = vmatpush1.bf16.msra.mxu0 %v4840_v43  ;;  %1075 = vmatpush1.bf16.msra.mxu1 %v4842_v44 }
 0x25e   :  { %1157 = vmatprep.subr.bf16.mxu0 %v4735_v14  ;;  %1200 = vmatprep.subr.bf16.mxu1 %v4702_v7 }
 0x313   :  { %v911_v3 = vpop.f32.mrb[8].mxu0  ;;  %v954_v61 = vpop.f32.mrb[16].mxu1 }
 0x314   :  { %v3719_v2 = vadd.f32 %v911_v3, %v4862_v50  ;;  %v913_v4 = vpop.f32.mrb[9].mxu0  ;;  %v956_v6 = vpop.f32.mrb[17].mxu1  ;;  %v3755_v48 = vadd.f32 %v954_v61, %v4896_v23 }
 0x315   :  { %v3720_v49 = vadd.f32 %v913_v4, %v4868_v52  ;;  %v915_v63 = vpop.f32.mrb[10].mxu0  ;;  %v958_v45 = vpop.f32.mrb[18].mxu1  ;;  %v3756_v7 = vadd.f32 %v956_v6, %v4892_v17 }
 0x316   :  { %v971_v53 = vmul.f32 0.5, %v3719_v2  ;;  %v3721_v5 = vadd.f32 %v915_v63, %v4862_v50  ;;  %v917_v55 = vpop.f32.mrb[11].mxu0  ;;  %v960_v16 = vpop.f32.mrb[19].mxu1  ;;  %v3757_v0 = vadd.f32 %v958_v45, %v4896_v23  ;;  %v973_v4 = vmul.f32 0.5, %v3755_v48 }
 0x317   :  { %v972_v62 = vmul.f32 0.5, %v3720_v49  ;;  %v3722_v57 = vadd.f32 %v917_v55, %v4868_v52  ;;  %v3758_v58 = vadd.f32 %v960_v16, %v4892_v17 }
 0x318   :  { %4153 = vtanh.f32 %v971_v53  ;;  %v974_v1 = vmul.f32 0.5, %v3721_v5  ;;  %v976_v63 = vmul.f32 0.5, %v3757_v0 }
 0x319   :  { %v975_v47 = vmul.f32 0.5, %v3722_v57  ;;  %4155 = vtanh.f32 %v972_v62 }
 0x31a   :  { %4157 = vtanh.f32 %v974_v1 }
 0x31b   :  { %4159 = vtanh.f32 %v3756_v7 }
 0x31c   :  { %4161 = vtanh.f32 %v975_v47 }
 0x31d   :  { %4163 = vtanh.f32 %v3758_v58 }
 0x31e   :  { %4165 = vtanh.f32 %v973_v4 }
 0x31f   :  { %4167 = vtanh.f32 %v976_v63 }
 0x322   :  { %v4154_v3 = vpop.eup %4153 }
 0x323   :  { %v983_v2 = vmul.f32 0.5, %v4154_v3  ;;  %v4156_v49 = vpop.eup %4155 }
 0x324   :  { %v4158_v53 = vpop.eup %4157  ;;  %v984_v5 = vmul.f32 0.5, %v4156_v49 }
 0x325   :  { %v989_v6 = vadd.f32 0.5, %v983_v2  ;;  %v4160_v55 = vpop.eup %4159  ;;  %v986_v62 = vmul.f32 0.5, %v4158_v53 }
 0x326   :  { %v4162_v57 = vpop.eup %4161  ;;  %v990_v16 = vadd.f32 0.5, %v984_v5 }
 0x327   :  { %v999_v7 = vmul.f32 %v4160_v55, %v989_v6  ;;  %v992_v1 = vadd.f32 0.5, %v986_v62  ;;  %v987_v61 = vmul.f32 0.5, %v4162_v57  ;;  %v4164_v47 = vpop.eup %4163 }
 0x328   :  { %v997_v45 = vmul.f32 %v990_v16, %v4955_v8  ;;  %v4166_v4 = vpop.eup %4165 }
 0x329   :  { %v993_v58 = vadd.f32 0.5, %v987_v61  ;;  %v1000_v3 = vmul.f32 %v4164_v47, %v992_v1  ;;  %v4168_v49 = vpop.eup %4167  ;;  %v985_v53 = vmul.f32 0.5, %v4166_v4 }
 0x32a   :  { %v5009_v48 = vadd.f32 %v999_v7, %v997_v45  ;;  %v988_v63 = vmul.f32 0.5, %v4168_v49 }
 0x32b   :  { %v998_v0 = vmul.f32 %v993_v58, %v4959_v59  ;;  %v991_v5 = vadd.f32 0.5, %v985_v53 }
 0x32c   :  { %4169 = vtanh.f32 %v5009_v48  ;;  %v994_v55 = vadd.f32 0.5, %v988_v63 }
 0x32d   :  { %v5013_v2 = vadd.f32 %v1000_v3, %v998_v0 }
 0x32f   :  { %4171 = vtanh.f32 %v5013_v2 }
 0x336   :  { %v4170_v6 = vpop.eup %4169 }
 0x337   :  { %v1005_v62 = vmul.f32 %v4170_v6, %v991_v5 }
 0x339   :  { %v4172_v8 = vpop.eup %4171 }
 0x33a   :  { %v1006_v57 = vmul.f32 %v4172_v8, %v994_v55 }
 0x33c   :  { %v5016_v16 = vpack.c.bf16 %v1006_v57, %v1005_v62 }
 0x33e   :  { %5909 = vst [vmem:[#allocation16_spill] sm:$0xff] %v5016_v16  ;;  %1050 = vmatmul.mubr.bf16.vlgmr.msra.gmra.mrb[12].mxu0 %v5016_v16  ;;  %1093 = vmatmul.mubr.bf16.vlgmr.msra.gmra.mrb[20].mxu1 %v5016_v16 }
 0x33f   :  { %1158 = vmatpush1.bf16.msra.mxu0 %v4737_v15  ;;  %1201 = vmatpush1.bf16.msra.mxu1 %v4720_v10  ;;  %v5053_v10 = vld [vmem:[#allocation4 + $0xc] ss:$16 sps:$4 sm:$0xff]  }
 0x340   :  { %1159 = vmatprep.subr.bf16.mxu0 %v4758_v18  ;;  %1202 = vmatprep.subr.bf16.mxu1 %v4730_v12 }
 0x341   :  { %1189 = vmatprep.mubr.bf16.mxu0 %v5908_v46  ;;  %1232 = vmatprep.mubr.bf16.mxu1 %v5908_v46 }
 0x343   :  { %1160 = vmatpush1.bf16.msra.mxu0 %v4766_v20  ;;  %1203 = vmatpush1.bf16.msra.mxu1 %v4732_v13 }
 0x344   :  { %1161 = vmatprep.subr.bf16.mxu0 %v4772_v22  ;;  %1204 = vmatprep.subr.bf16.mxu1 %v4760_v19 }
 0x347   :  { %1162 = vmatpush1.bf16.msra.mxu0 %v4777_v24  ;;  %1205 = vmatpush1.bf16.msra.mxu1 %v4768_v21 }
 0x348   :  { %1163 = vmatprep.subr.bf16.mxu0 %v4785_v26  ;;  %1206 = vmatprep.subr.bf16.mxu1 %v4783_v25 }
 0x34b   :  { %1164 = vmatpush1.bf16.msra.mxu0 %v4790_v28  ;;  %1207 = vmatpush1.bf16.msra.mxu1 %v4788_v27 }
 0x34c   :  { %1165 = vmatprep.subr.bf16.mxu0 %v4799_v30  ;;  %1208 = vmatprep.subr.bf16.mxu1 %v4797_v29 }
 0x34f   :  { %1166 = vmatpush1.bf16.msra.mxu0 %v4803_v32  ;;  %1209 = vmatpush1.bf16.msra.mxu1 %v4801_v31 }
 0x350   :  { %1167 = vmatprep.subr.bf16.mxu0 %v4809_v33  ;;  %1210 = vmatprep.subr.bf16.mxu1 %v4811_v34 }
 0x353   :  { %1168 = vmatpush1.bf16.msra.mxu0 %v4813_v35  ;;  %1211 = vmatpush1.bf16.msra.mxu1 %v4815_v36 }
 0x354   :  { %1169 = vmatprep.subr.bf16.mxu0 %v4819_v37  ;;  %1212 = vmatprep.subr.bf16.mxu1 %v4823_v38 }
 0x357   :  { %1170 = vmatpush1.bf16.msra.mxu0 %v4828_v39  ;;  %1213 = vmatpush1.bf16.msra.mxu1 %v4830_v40 }
 0x358   :  { %1171 = vmatprep.subr.bf16.mxu0 %v4834_v41  ;;  %1214 = vmatprep.subr.bf16.mxu1 %v4836_v42 }
 0x35b   :  { %1172 = vmatpush1.bf16.msra.mxu0 %v4840_v43  ;;  %1215 = vmatpush1.bf16.msra.mxu1 %v4842_v44 }
 0x35c   :  { %1297 = vmatprep.subr.bf16.mxu0 %v4735_v14  ;;  %1340 = vmatprep.subr.bf16.mxu1 %v5053_v10 }
 0x411   :  { %v1051_v59 = vpop.f32.mrb[12].mxu0  ;;  %v1094_v7 = vpop.f32.mrb[20].mxu1 }
 0x412   :  { %v3723_v1 = vadd.f32 %v1051_v59, %v4862_v50  ;;  %v1053_v61 = vpop.f32.mrb[13].mxu0  ;;  %v1096_v47 = vpop.f32.mrb[21].mxu1  ;;  %v3759_v57 = vadd.f32 %v1094_v7, %v4896_v23 }
 0x413   :  { %v3724_v45 = vadd.f32 %v1053_v61, %v4868_v52  ;;  %v1055_v58 = vpop.f32.mrb[14].mxu0  ;;  %v1098_v3 = vpop.f32.mrb[22].mxu1  ;;  %v3760_v5 = vadd.f32 %v1096_v47, %v4892_v17 }
 0x414   :  { %v1111_v0 = vmul.f32 0.5, %v3723_v1  ;;  %v3725_v4 = vadd.f32 %v1055_v58, %v4862_v50  ;;  %v1057_v49 = vpop.f32.mrb[15].mxu0  ;;  %v1100_v53 = vpop.f32.mrb[23].mxu1  ;;  %v3761_v59 = vadd.f32 %v1098_v3, %v4896_v23 }
 0x415   :  { %v1112_v63 = vmul.f32 0.5, %v3724_v45  ;;  %v3726_v6 = vadd.f32 %v1057_v49, %v4868_v52  ;;  %v3762_v62 = vadd.f32 %v1100_v53, %v4892_v17  ;;  %v1113_v45 = vmul.f32 0.5, %v3759_v57 }
 0x416   :  { %4173 = vtanh.f32 %v1111_v0  ;;  %v1114_v55 = vmul.f32 0.5, %v3725_v4  ;;  %v1116_v0 = vmul.f32 0.5, %v3761_v59 }
 0x417   :  { %v1115_v8 = vmul.f32 0.5, %v3726_v6  ;;  %4175 = vtanh.f32 %v1112_v63 }
 0x418   :  { %4177 = vtanh.f32 %v1114_v55 }
 0x419   :  { %4179 = vtanh.f32 %v3760_v5 }
 0x41a   :  { %4181 = vtanh.f32 %v1115_v8 }
 0x41b   :  { %4183 = vtanh.f32 %v3762_v62 }
 0x41c   :  { %4185 = vtanh.f32 %v1113_v45 }
 0x41d   :  { %4187 = vtanh.f32 %v1116_v0 }
 0x420   :  { %v4174_v1 = vpop.eup %4173 }
 0x421   :  { %v1123_v61 = vmul.f32 0.5, %v4174_v1  ;;  %v4176_v58 = vpop.eup %4175 }
 0x422   :  { %v4178_v49 = vpop.eup %4177  ;;  %v1124_v4 = vmul.f32 0.5, %v4176_v58 }
 0x423   :  { %v1129_v47 = vadd.f32 0.5, %v1123_v61  ;;  %v4180_v6 = vpop.eup %4179  ;;  %v1126_v63 = vmul.f32 0.5, %v4178_v49 }
 0x424   :  { %v4182_v55 = vpop.eup %4181  ;;  %v1130_v53 = vadd.f32 0.5, %v1124_v4 }
 0x425   :  { %v1139_v5 = vmul.f32 %v4180_v6, %v1129_v47  ;;  %v1132_v8 = vadd.f32 0.5, %v1126_v63  ;;  %v1127_v7 = vmul.f32 0.5, %v4182_v55  ;;  %v4184_v62 = vpop.eup %4183 }
 0x426   :  { %v1137_v3 = vmul.f32 %v1130_v53, %v5009_v48  ;;  %v4186_v45 = vpop.eup %4185 }
 0x427   :  { %v1133_v16 = vadd.f32 0.5, %v1127_v7  ;;  %v1140_v1 = vmul.f32 %v4184_v62, %v1132_v8  ;;  %v4188_v58 = vpop.eup %4187  ;;  %v1125_v49 = vmul.f32 0.5, %v4186_v45 }
 0x428   :  { %v5065_v57 = vadd.f32 %v1139_v5, %v1137_v3  ;;  %v1128_v0 = vmul.f32 0.5, %v4188_v58 }
 0x429   :  { %v1138_v59 = vmul.f32 %v1133_v16, %v5013_v2  ;;  %v1131_v4 = vadd.f32 0.5, %v1125_v49  ;;  %v5077_v2 = vld [vmem:[#allocation4 + $0x8] ss:$16 sps:$4 sm:$0xff]  }
 0x42a   :  { %4189 = vtanh.f32 %v5065_v57  ;;  %v1134_v6 = vadd.f32 0.5, %v1128_v0 }
 0x42b   :  { %v5069_v61 = vadd.f32 %v1140_v1, %v1138_v59 }
 0x42d   :  { %4191 = vtanh.f32 %v5069_v61 }
 0x434   :  { %v4190_v47 = vpop.eup %4189 }
 0x435   :  { %v1145_v63 = vmul.f32 %v4190_v47, %v1131_v4 }
 0x437   :  { %v4192_v48 = vpop.eup %4191 }
 0x438   :  { %v1146_v55 = vmul.f32 %v4192_v48, %v1134_v6 }
 0x43a   :  { %v5072_v53 = vpack.c.bf16 %v1146_v55, %v1145_v63 }
 0x43c   :  { %1190 = vmatmul.mubr.bf16.vlgmr.msra.gmra.mrb[16].mxu0 %v5072_v53  ;;  %1233 = vmatmul.mubr.bf16.vlgmr.msra.gmra.mrb[24].mxu1 %v5072_v53 }
 0x43d   :  { %1298 = vmatpush1.bf16.msra.mxu0 %v4737_v15  ;;  %1341 = vmatpush1.bf16.msra.mxu1 %v5077_v2 }
 0x43e   :  { %1299 = vmatprep.subr.bf16.mxu0 %v4758_v18  ;;  %1342 = vmatprep.subr.bf16.mxu1 %v4730_v12 }
 0x43f   :  { %1329 = vmatprep.mubr.bf16.mxu0 %v5908_v46  ;;  %1372 = vmatprep.mubr.bf16.mxu1 %v5908_v46 }
 0x441   :  { %1300 = vmatpush1.bf16.msra.mxu0 %v4766_v20  ;;  %1343 = vmatpush1.bf16.msra.mxu1 %v4732_v13 }
 0x442   :  { %1301 = vmatprep.subr.bf16.mxu0 %v4772_v22  ;;  %1344 = vmatprep.subr.bf16.mxu1 %v4760_v19 }
 0x445   :  { %1302 = vmatpush1.bf16.msra.mxu0 %v4777_v24  ;;  %1345 = vmatpush1.bf16.msra.mxu1 %v4768_v21 }
 0x446   :  { %1303 = vmatprep.subr.bf16.mxu0 %v4785_v26  ;;  %1346 = vmatprep.subr.bf16.mxu1 %v4783_v25 }
 0x449   :  { %1304 = vmatpush1.bf16.msra.mxu0 %v4790_v28  ;;  %1347 = vmatpush1.bf16.msra.mxu1 %v4788_v27 }
 0x44a   :  { %1305 = vmatprep.subr.bf16.mxu0 %v4799_v30  ;;  %1348 = vmatprep.subr.bf16.mxu1 %v4797_v29 }
 0x44d   :  { %1306 = vmatpush1.bf16.msra.mxu0 %v4803_v32  ;;  %1349 = vmatpush1.bf16.msra.mxu1 %v4801_v31 }
 0x44e   :  { %1307 = vmatprep.subr.bf16.mxu0 %v4809_v33  ;;  %1350 = vmatprep.subr.bf16.mxu1 %v4811_v34 }
 0x451   :  { %1308 = vmatpush1.bf16.msra.mxu0 %v4813_v35  ;;  %1351 = vmatpush1.bf16.msra.mxu1 %v4815_v36 }
 0x452   :  { %1309 = vmatprep.subr.bf16.mxu0 %v4819_v37  ;;  %1352 = vmatprep.subr.bf16.mxu1 %v4823_v38 }
 0x455   :  { %1310 = vmatpush1.bf16.msra.mxu0 %v4828_v39  ;;  %1353 = vmatpush1.bf16.msra.mxu1 %v4830_v40 }
 0x456   :  { %1311 = vmatprep.subr.bf16.mxu0 %v4834_v41  ;;  %1354 = vmatprep.subr.bf16.mxu1 %v4836_v42 }
 0x459   :  { %1312 = vmatpush1.bf16.msra.mxu0 %v4840_v43  ;;  %1355 = vmatpush1.bf16.msra.mxu1 %v4842_v44 }
 0x45a   :  { %1437 = vmatprep.subr.bf16.mxu0 %v4735_v14  ;;  %1480 = vmatprep.subr.bf16.mxu1 %v5053_v10 }
 0x50f   :  { %v1191_v12 = vpop.f32.mrb[16].mxu0  ;;  %v1234_v13 = vpop.f32.mrb[24].mxu1 }
 0x510   :  { %v3727_v15 = vadd.f32 %v1191_v12, %v4862_v50  ;;  %v1193_v18 = vpop.f32.mrb[17].mxu0  ;;  %v1236_v19 = vpop.f32.mrb[25].mxu1  ;;  %v3763_v33 = vadd.f32 %v1234_v13, %v4896_v23 }
 0x511   :  { %v3728_v20 = vadd.f32 %v1193_v18, %v4868_v52  ;;  %v1195_v21 = vpop.f32.mrb[18].mxu0  ;;  %v1238_v22 = vpop.f32.mrb[26].mxu1  ;;  %v3764_v29 = vadd.f32 %v1236_v19, %v4892_v17  ;;  %v5136_v19 = vld [vmem:[#allocation4 + $0x24] ss:$16 sps:$4 sm:$0xff]  }
 0x512   :  { %v1251_v24 = vmul.f32 0.5, %v3727_v15  ;;  %v3729_v25 = vadd.f32 %v1195_v21, %v4862_v50  ;;  %v1197_v26 = vpop.f32.mrb[19].mxu0  ;;  %v1240_v27 = vpop.f32.mrb[27].mxu1  ;;  %v3765_v34 = vadd.f32 %v1238_v22, %v4896_v23  ;;  %v1253_v37 = vmul.f32 0.5, %v3763_v33  ;;  %v5144_v21 = vld [vmem:[#allocation4 + $0x20] ss:$16 sps:$4 sm:$0xff]  }
 0x513   :  { %v1252_v28 = vmul.f32 0.5, %v3728_v20  ;;  %v3730_v14 = vadd.f32 %v1197_v26, %v4868_v52  ;;  %v3766_v32 = vadd.f32 %v1240_v27, %v4892_v17  ;;  %v5139_v20 = vld [vmem:[#allocation4 + $0x2c] ss:$16 sps:$4 sm:$0xff]   ;;  %v5147_v22 = vld [vmem:[#allocation4 + $0x28] ss:$16 sps:$4 sm:$0xff]  }
 0x514   :  { %4193 = vtanh.f32 %v1251_v24  ;;  %v1254_v30 = vmul.f32 0.5, %v3729_v25  ;;  %v1256_v39 = vmul.f32 0.5, %v3765_v34  ;;  %v5150_v24 = vld [vmem:[#allocation4 + $0x44] ss:$16 sps:$4 sm:$0xff]   ;;  %v5153_v25 = vld [vmem:[#allocation4 + $0x4c] ss:$16 sps:$4 sm:$0xff]  }
 0x515   :  { %v1255_v31 = vmul.f32 0.5, %v3730_v14  ;;  %4195 = vtanh.f32 %v1252_v28  ;;  %v5156_v26 = vld [vmem:[#allocation4 + $0x40] ss:$16 sps:$4 sm:$0xff]   ;;  %v5159_v27 = vld [vmem:[#allocation4 + $0x48] ss:$16 sps:$4 sm:$0xff]  }
 0x516   :  { %4197 = vtanh.f32 %v1254_v30  ;;  %v5162_v28 = vld [vmem:[#allocation4 + $0x64] ss:$16 sps:$4 sm:$0xff]   ;;  %v5165_v14 = vld [vmem:[#allocation4 + $0x6c] ss:$16 sps:$4 sm:$0xff]   ;;  %v5171_v30 = vld [vmem:[#allocation4 + $0x68] ss:$16 sps:$4 sm:$0xff]  }
 0x517   :  { %4199 = vtanh.f32 %v3764_v29  ;;  %v5168_v29 = vld [vmem:[#allocation4 + $0x60] ss:$16 sps:$4 sm:$0xff]   ;;  %v5183_v34 = vld [vmem:[#allocation4 + $0x88] ss:$16 sps:$4 sm:$0xff]  }
 0x518   :  { %4201 = vtanh.f32 %v1255_v31  ;;  %v5174_v31 = vld [vmem:[#allocation4 + $0x84] ss:$16 sps:$4 sm:$0xff]   ;;  %v5180_v33 = vld [vmem:[#allocation4 + $0x80] ss:$16 sps:$4 sm:$0xff]  }
 0x519   :  { %4203 = vtanh.f32 %v3766_v32  ;;  %v5177_v32 = vld [vmem:[#allocation4 + $0x8c] ss:$16 sps:$4 sm:$0xff]  }
 0x51a   :  { %4205 = vtanh.f32 %v1253_v37  ;;  %v5192_v37 = vld [vmem:[#allocation4 + $0xa0] ss:$16 sps:$4 sm:$0xff]  }
 0x51b   :  { %4207 = vtanh.f32 %v1256_v39  ;;  %v5198_v39 = vld [vmem:[#allocation4 + $0xc4] ss:$16 sps:$4 sm:$0xff]  }
 0x51e   :  { %v4194_v35 = vpop.eup %4193 }
 0x51f   :  { %v1263_v36 = vmul.f32 0.5, %v4194_v35  ;;  %v4196_v38 = vpop.eup %4195  ;;  %v5186_v35 = vld [vmem:[#allocation4 + $0xa4] ss:$16 sps:$4 sm:$0xff]  }
 0x520   :  { %v4198_v40 = vpop.eup %4197  ;;  %v1264_v42 = vmul.f32 0.5, %v4196_v38  ;;  %v5195_v38 = vld [vmem:[#allocation4 + $0xa8] ss:$16 sps:$4 sm:$0xff]  }
 0x521   :  { %v1269_v41 = vadd.f32 0.5, %v1263_v36  ;;  %v4200_v43 = vpop.eup %4199  ;;  %v1266_v44 = vmul.f32 0.5, %v4198_v40  ;;  %v5189_v36 = vld [vmem:[#allocation4 + $0xac] ss:$16 sps:$4 sm:$0xff]  }
 0x522   :  { %v4202_v16 = vpop.eup %4201  ;;  %v1270_v5 = vadd.f32 0.5, %v1264_v42  ;;  %v5201_v40 = vld [vmem:[#allocation4 + $0xcc] ss:$16 sps:$4 sm:$0xff]   ;;  %v5207_v42 = vld [vmem:[#allocation4 + $0xc8] ss:$16 sps:$4 sm:$0xff]  }
 0x523   :  { %v1279_v8 = vmul.f32 %v4200_v43, %v1269_v41  ;;  %v1272_v7 = vadd.f32 0.5, %v1266_v44  ;;  %v1267_v62 = vmul.f32 0.5, %v4202_v16  ;;  %v4204_v3 = vpop.eup %4203  ;;  %v5204_v41 = vld [vmem:[#allocation4 + $0xc0] ss:$16 sps:$4 sm:$0xff]   ;;  %v5210_v43 = vld [vmem:[#allocation4 + $0xe4] ss:$16 sps:$4 sm:$0xff]  }
 0x524   :  { %v1277_v1 = vmul.f32 %v1270_v5, %v5065_v57  ;;  %v4206_v47 = vpop.eup %4205  ;;  %v5213_v44 = vld [vmem:[#allocation4 + $0xec] ss:$16 sps:$4 sm:$0xff]   ;;  %v5216_v16 = vld [vmem:[#allocation4 + $0xe0] ss:$16 sps:$4 sm:$0xff]   ;;  %v5219_v5 = vld [vmem:[#allocation4 + $0xe8] ss:$16 sps:$4 sm:$0xff]  }
 0x525   :  { %v1273_v59 = vadd.f32 0.5, %v1267_v62  ;;  %v1280_v45 = vmul.f32 %v4204_v3, %v1272_v7  ;;  %v4208_v4 = vpop.eup %4207  ;;  %v1265_v6 = vmul.f32 0.5, %v4206_v47 }
 0x526   :  { %v5121_v58 = vadd.f32 %v1279_v8, %v1277_v1  ;;  %v1268_v48 = vmul.f32 0.5, %v4208_v4  ;;  %v4464_v8 = vld [vmem:[#allocation4 + $0x4] ss:$16 sps:$4 sm:$0xff]  }
 0x527   :  { %v1278_v49 = vmul.f32 %v1273_v59, %v5069_v61  ;;  %v1271_v55 = vadd.f32 0.5, %v1265_v6  ;;  %v5132_v61 = vld [vmem:[#allocation4] ss:$16 sps:$4 sm:$0xff]  }
 0x528   :  { %4209 = vtanh.f32 %v5121_v58  ;;  %v1274_v12 = vadd.f32 0.5, %v1268_v48 }
 0x529   :  { %v5125_v0 = vadd.f32 %v1280_v45, %v1278_v49 }
 0x52b   :  { %4211 = vtanh.f32 %v5125_v0 }
 0x532   :  { %v4210_v63 = vpop.eup %4209 }
 0x533   :  { %v1285_v13 = vmul.f32 %v4210_v63, %v1271_v55 }
 0x535   :  { %v4212_v57 = vpop.eup %4211 }
 0x536   :  { %v1286_v15 = vmul.f32 %v4212_v57, %v1274_v12 }
 0x538   :  { %v5128_v18 = vpack.c.bf16 %v1286_v15, %v1285_v13 }
 0x53a   :  { %5910 = vst [vmem:[#allocation17_spill] sm:$0xff] %v5128_v18  ;;  %1330 = vmatmul.mubr.bf16.vlgmr.msra.gmra.mrb[20].mxu0 %v5128_v18  ;;  %1373 = vmatmul.mubr.bf16.vlgmr.msra.gmra.mrb[28].mxu1 %v5128_v18 }
 0x53b   :  { %1438 = vmatpush1.bf16.msra.mxu0 %v5132_v61  ;;  %1481 = vmatpush1.bf16.msra.mxu1 %v5077_v2 }
 0x53c   :  { %1439 = vmatprep.subr.bf16.mxu0 %v5136_v19  ;;  %1482 = vmatprep.subr.bf16.mxu1 %v5139_v20 }
 0x53d   :  { %1469 = vmatprep.mubr.bf16.mxu0 %v5908_v46  ;;  %1512 = vmatprep.mubr.bf16.mxu1 %v5908_v46 }
 0x53f   :  { %1440 = vmatpush1.bf16.msra.mxu0 %v5144_v21  ;;  %1483 = vmatpush1.bf16.msra.mxu1 %v5147_v22 }
 0x540   :  { %1441 = vmatprep.subr.bf16.mxu0 %v5150_v24  ;;  %1484 = vmatprep.subr.bf16.mxu1 %v5153_v25 }
 0x543   :  { %1442 = vmatpush1.bf16.msra.mxu0 %v5156_v26  ;;  %1485 = vmatpush1.bf16.msra.mxu1 %v5159_v27 }
 0x544   :  { %1443 = vmatprep.subr.bf16.mxu0 %v5162_v28  ;;  %1486 = vmatprep.subr.bf16.mxu1 %v5165_v14 }
 0x547   :  { %1444 = vmatpush1.bf16.msra.mxu0 %v5168_v29  ;;  %1487 = vmatpush1.bf16.msra.mxu1 %v5171_v30 }
 0x548   :  { %1445 = vmatprep.subr.bf16.mxu0 %v5174_v31  ;;  %1488 = vmatprep.subr.bf16.mxu1 %v5177_v32 }
 0x54b   :  { %1446 = vmatpush1.bf16.msra.mxu0 %v5180_v33  ;;  %1489 = vmatpush1.bf16.msra.mxu1 %v5183_v34 }
 0x54c   :  { %1447 = vmatprep.subr.bf16.mxu0 %v5186_v35  ;;  %1490 = vmatprep.subr.bf16.mxu1 %v5189_v36 }
 0x54f   :  { %1448 = vmatpush1.bf16.msra.mxu0 %v5192_v37  ;;  %1491 = vmatpush1.bf16.msra.mxu1 %v5195_v38 }
 0x550   :  { %1449 = vmatprep.subr.bf16.mxu0 %v5198_v39  ;;  %1492 = vmatprep.subr.bf16.mxu1 %v5201_v40 }
 0x553   :  { %1450 = vmatpush1.bf16.msra.mxu0 %v5204_v41  ;;  %1493 = vmatpush1.bf16.msra.mxu1 %v5207_v42 }
 0x554   :  { %1451 = vmatprep.subr.bf16.mxu0 %v5210_v43  ;;  %1494 = vmatprep.subr.bf16.mxu1 %v5213_v44 }
 0x557   :  { %1452 = vmatpush1.bf16.msra.mxu0 %v5216_v16  ;;  %1495 = vmatpush1.bf16.msra.mxu1 %v5219_v5 }
 0x558   :  { %1577 = vmatprep.subr.bf16.mxu0 %v4464_v8  ;;  %1620 = vmatprep.subr.bf16.mxu1 %v5053_v10 }
 0x60d   :  { %v1331_v7 = vpop.f32.mrb[20].mxu0  ;;  %v1374_v62 = vpop.f32.mrb[28].mxu1 }
 0x60e   :  { %v3731_v3 = vadd.f32 %v1331_v7, %v4862_v50  ;;  %v1333_v1 = vpop.f32.mrb[21].mxu0  ;;  %v1376_v59 = vpop.f32.mrb[29].mxu1  ;;  %v3767_v8 = vadd.f32 %v1374_v62, %v4896_v23 }
 0x60f   :  { %v3732_v45 = vadd.f32 %v1333_v1, %v4868_v52  ;;  %v1335_v49 = vpop.f32.mrb[22].mxu0  ;;  %v1378_v47 = vpop.f32.mrb[30].mxu1  ;;  %v3768_v10 = vadd.f32 %v1376_v59, %v4892_v17 }
 0x610   :  { %v1391_v4 = vmul.f32 0.5, %v3731_v3  ;;  %v3733_v6 = vadd.f32 %v1335_v49, %v4862_v50  ;;  %v1337_v48 = vpop.f32.mrb[23].mxu0  ;;  %v1380_v63 = vpop.f32.mrb[31].mxu1  ;;  %v3769_v7 = vadd.f32 %v1378_v47, %v4896_v23 }
 0x611   :  { %v1392_v55 = vmul.f32 0.5, %v3732_v45  ;;  %v3734_v12 = vadd.f32 %v1337_v48, %v4868_v52  ;;  %v3770_v15 = vadd.f32 %v1380_v63, %v4892_v17  ;;  %v1393_v45 = vmul.f32 0.5, %v3767_v8 }
 0x612   :  { %4213 = vtanh.f32 %v1391_v4  ;;  %v1394_v57 = vmul.f32 0.5, %v3733_v6  ;;  %v1396_v4 = vmul.f32 0.5, %v3769_v7 }
 0x613   :  { %v1395_v13 = vmul.f32 0.5, %v3734_v12  ;;  %4215 = vtanh.f32 %v1392_v55 }
 0x614   :  { %4217 = vtanh.f32 %v1394_v57 }
 0x615   :  { %4219 = vtanh.f32 %v3768_v10 }
 0x616   :  { %4221 = vtanh.f32 %v1395_v13 }
 0x617   :  { %4223 = vtanh.f32 %v3770_v15 }
 0x618   :  { %4225 = vtanh.f32 %v1393_v45 }
 0x619   :  { %4227 = vtanh.f32 %v1396_v4 }
 0x61c   :  { %v4214_v3 = vpop.eup %4213 }
 0x61d   :  { %v1403_v1 = vmul.f32 0.5, %v4214_v3  ;;  %v4216_v49 = vpop.eup %4215 }
 0x61e   :  { %v4218_v48 = vpop.eup %4217  ;;  %v1404_v6 = vmul.f32 0.5, %v4216_v49 }
 0x61f   :  { %v1409_v59 = vadd.f32 0.5, %v1403_v1  ;;  %v4220_v12 = vpop.eup %4219  ;;  %v1406_v55 = vmul.f32 0.5, %v4218_v48 }
 0x620   :  { %v4222_v57 = vpop.eup %4221  ;;  %v1410_v63 = vadd.f32 0.5, %v1404_v6 }
 0x621   :  { %v1419_v10 = vmul.f32 %v4220_v12, %v1409_v59  ;;  %v1412_v13 = vadd.f32 0.5, %v1406_v55  ;;  %v1407_v62 = vmul.f32 0.5, %v4222_v57  ;;  %v4224_v15 = vpop.eup %4223 }
 0x622   :  { %v1417_v47 = vmul.f32 %v1410_v63, %v5121_v58  ;;  %v4226_v45 = vpop.eup %4225 }
 0x623   :  { %v1413_v18 = vadd.f32 0.5, %v1407_v62  ;;  %v1420_v3 = vmul.f32 %v4224_v15, %v1412_v13  ;;  %v4228_v49 = vpop.eup %4227  ;;  %v1405_v48 = vmul.f32 0.5, %v4226_v45 }
 0x624   :  { %v5232_v8 = vadd.f32 %v1419_v10, %v1417_v47  ;;  %v1408_v4 = vmul.f32 0.5, %v4228_v49 }
 0x625   :  { %v1418_v7 = vmul.f32 %v1413_v18, %v5125_v0  ;;  %v1411_v6 = vadd.f32 0.5, %v1405_v48  ;;  %v4014_v0 = vld [vmem:[#allocation6 + $0xc] ss:$16 sps:$4 sm:$0xff]   ;;  %v328_v18 = vadd.f32 %v4864_v51, %v4862_v50 }
 0x626   :  { %4229 = vtanh.f32 %v5232_v8  ;;  %v1414_v12 = vadd.f32 0.5, %v1408_v4 }
 0x627   :  { %v5236_v1 = vadd.f32 %v1420_v3, %v1418_v7 }
 0x629   :  { %4231 = vtanh.f32 %v5236_v1 }
 0x630   :  { %v4230_v59 = vpop.eup %4229 }
 0x631   :  { %v1425_v55 = vmul.f32 %v4230_v59, %v1411_v6 }
 0x633   :  { %v4232_v58 = vpop.eup %4231 }
 0x634   :  { %v1426_v57 = vmul.f32 %v4232_v58, %v1414_v12 }
 0x636   :  { %v5239_v63 = vpack.c.bf16 %v1426_v57, %v1425_v55 }
 0x638   :  { %1470 = vmatmul.mubr.bf16.vlgmr.msra.gmra.mrb[24].mxu0 %v5239_v63  ;;  %1513 = vmatmul.mubr.bf16.vlgmr.msra.gmra.mrb[32].mxu1 %v5239_v63 }
 0x639   :  { %1578 = vmatpush1.bf16.msra.mxu0 %v5132_v61  ;;  %1621 = vmatpush1.bf16.msra.mxu1 %v5077_v2  ;;  %v4011_v2 = vld [vmem:[#allocation6 + $0x4] ss:$16 sps:$4 sm:$0xff]   ;;  %v330_v61 = vadd.f32 %v4870_v54, %v4868_v52 }
 0x63a   :  { %1579 = vmatprep.subr.bf16.mxu0 %v5136_v19  ;;  %1622 = vmatprep.subr.bf16.mxu1 %v5139_v20 }
 0x63b   :  { %1609 = vmatprep.mubr.bf16.mxu0 %v5908_v46  ;;  %1652 = vmatprep.mubr.bf16.mxu1 %v5908_v46 }
 0x63d   :  { %1580 = vmatpush1.bf16.msra.mxu0 %v5144_v21  ;;  %1623 = vmatpush1.bf16.msra.mxu1 %v5147_v22  ;;  %v332_v21 = vadd.f32 %v4872_v56, %v4862_v50 }
 0x63e   :  { %1581 = vmatprep.subr.bf16.mxu0 %v5150_v24  ;;  %1624 = vmatprep.subr.bf16.mxu1 %v5153_v25 }
 0x641   :  { %1582 = vmatpush1.bf16.msra.mxu0 %v5156_v26  ;;  %1625 = vmatpush1.bf16.msra.mxu1 %v5159_v27  ;;  %v334_v26 = vadd.f32 %v4876_v60, %v4868_v52 }
 0x642   :  { %1583 = vmatprep.subr.bf16.mxu0 %v5162_v28  ;;  %1626 = vmatprep.subr.bf16.mxu1 %v5165_v14 }
 0x645   :  { %1584 = vmatpush1.bf16.msra.mxu0 %v5168_v29  ;;  %1627 = vmatpush1.bf16.msra.mxu1 %v5171_v30 }
 0x646   :  { %1585 = vmatprep.subr.bf16.mxu0 %v5174_v31  ;;  %1628 = vmatprep.subr.bf16.mxu1 %v5177_v32 }
 0x649   :  { %1586 = vmatpush1.bf16.msra.mxu0 %v5180_v33  ;;  %1629 = vmatpush1.bf16.msra.mxu1 %v5183_v34 }
 0x64a   :  { %1587 = vmatprep.subr.bf16.mxu0 %v5186_v35  ;;  %1630 = vmatprep.subr.bf16.mxu1 %v5189_v36 }
 0x64d   :  { %1588 = vmatpush1.bf16.msra.mxu0 %v5192_v37  ;;  %1631 = vmatpush1.bf16.msra.mxu1 %v5195_v38 }
 0x64e   :  { %1589 = vmatprep.subr.bf16.mxu0 %v5198_v39  ;;  %1632 = vmatprep.subr.bf16.mxu1 %v5201_v40 }
 0x651   :  { %1590 = vmatpush1.bf16.msra.mxu0 %v5204_v41  ;;  %1633 = vmatpush1.bf16.msra.mxu1 %v5207_v42 }
 0x652   :  { %1591 = vmatprep.subr.bf16.mxu0 %v5210_v43  ;;  %1634 = vmatprep.subr.bf16.mxu1 %v5213_v44 }
 0x655   :  { %1592 = vmatpush1.bf16.msra.mxu0 %v5216_v16  ;;  %1635 = vmatpush1.bf16.msra.mxu1 %v5219_v5 }
 0x656   :  { %1963 = vmatprep.subr.bf16.mxu0 %v4011_v2  ;;  %2076 = vmatprep.subr.bf16.mxu1 %v4014_v0 }
 0x70b   :  { %v1471_v19 = vpop.f32.mrb[24].mxu0  ;;  %v1514_v20 = vpop.f32.mrb[32].mxu1 }
 0x70c   :  { %v1523_v22 = vadd.f32 %v1471_v19, %v328_v18  ;;  %v1473_v24 = vpop.f32.mrb[25].mxu0  ;;  %v1516_v25 = vpop.f32.mrb[33].mxu1  ;;  %v3771_v60 = vadd.f32 %v1514_v20, %v4896_v23  ;;  %v4009_v19 = vld [vmem:[#allocation6] ss:$16 sps:$4 sm:$0xff]   ;;  %v4012_v20 = vld [vmem:[#allocation6 + $0x8] ss:$16 sps:$4 sm:$0xff]  }
 0x70d   :  { %v1524_v27 = vadd.f32 %v1473_v24, %v330_v61  ;;  %v1475_v28 = vpop.f32.mrb[26].mxu0  ;;  %v1518_v14 = vpop.f32.mrb[34].mxu1  ;;  %v3772_v33 = vadd.f32 %v1516_v25, %v4892_v17  ;;  %v4015_v24 = vld [vmem:[#allocation6 + $0x20] ss:$16 sps:$4 sm:$0xff]   ;;  %v4018_v25 = vld [vmem:[#allocation6 + $0x28] ss:$16 sps:$4 sm:$0xff]  }
 0x70e   :  { %v1531_v29 = vmul.f32 0.5, %v1523_v22  ;;  %v1527_v30 = vadd.f32 %v1475_v28, %v332_v21  ;;  %v1477_v51 = vpop.f32.mrb[27].mxu0  ;;  %v1520_v31 = vpop.f32.mrb[35].mxu1  ;;  %v3773_v36 = vadd.f32 %v1518_v14, %v4896_v23  ;;  %v1533_v39 = vmul.f32 0.5, %v3771_v60  ;;  %v4020_v22 = vld [vmem:[#allocation6 + $0x2c] ss:$16 sps:$4 sm:$0xff]  }
 0x70f   :  { %v1532_v32 = vmul.f32 0.5, %v1524_v27  ;;  %v1528_v54 = vadd.f32 %v1477_v51, %v334_v26  ;;  %v3774_v35 = vadd.f32 %v1520_v31, %v4892_v17  ;;  %v4023_v26 = vld [vmem:[#allocation6 + $0x44] ss:$16 sps:$4 sm:$0xff]   ;;  %v4026_v27 = vld [vmem:[#allocation6 + $0x4c] ss:$16 sps:$4 sm:$0xff]  }
 0x710   :  { %4233 = vtanh.f32 %v1531_v29  ;;  %v1534_v34 = vmul.f32 0.5, %v1527_v30  ;;  %v1536_v41 = vmul.f32 0.5, %v3773_v36  ;;  %v4021_v28 = vld [vmem:[#allocation6 + $0x40] ss:$16 sps:$4 sm:$0xff]   ;;  %v4024_v14 = vld [vmem:[#allocation6 + $0x48] ss:$16 sps:$4 sm:$0xff]  }
 0x711   :  { %v1535_v56 = vmul.f32 0.5, %v1528_v54  ;;  %4235 = vtanh.f32 %v1532_v32  ;;  %v4029_v29 = vld [vmem:[#allocation6 + $0x64] ss:$16 sps:$4 sm:$0xff]   ;;  %v4032_v30 = vld [vmem:[#allocation6 + $0x6c] ss:$16 sps:$4 sm:$0xff]  }
 0x712   :  { %4237 = vtanh.f32 %v1534_v34  ;;  %v4027_v51 = vld [vmem:[#allocation6 + $0x60] ss:$16 sps:$4 sm:$0xff]   ;;  %v4030_v31 = vld [vmem:[#allocation6 + $0x68] ss:$16 sps:$4 sm:$0xff]   ;;  %v4035_v32 = vld [vmem:[#allocation6 + $0x84] ss:$16 sps:$4 sm:$0xff]  }
 0x713   :  { %4239 = vtanh.f32 %v3772_v33  ;;  %v4038_v54 = vld [vmem:[#allocation6 + $0x8c] ss:$16 sps:$4 sm:$0xff]   ;;  %v4033_v33 = vld [vmem:[#allocation6 + $0x80] ss:$16 sps:$4 sm:$0xff]   ;;  %v4036_v34 = vld [vmem:[#allocation6 + $0x88] ss:$16 sps:$4 sm:$0xff]  }
 0x714   :  { %4241 = vtanh.f32 %v1535_v56  ;;  %v4041_v56 = vld [vmem:[#allocation6 + $0xa4] ss:$16 sps:$4 sm:$0xff]   ;;  %v4039_v60 = vld [vmem:[#allocation6 + $0xa0] ss:$16 sps:$4 sm:$0xff]   ;;  %v4042_v36 = vld [vmem:[#allocation6 + $0xa8] ss:$16 sps:$4 sm:$0xff]  }
 0x715   :  { %4243 = vtanh.f32 %v3774_v35  ;;  %v4044_v35 = vld [vmem:[#allocation6 + $0xac] ss:$16 sps:$4 sm:$0xff]  }
 0x716   :  { %4245 = vtanh.f32 %v1533_v39  ;;  %v4045_v39 = vld [vmem:[#allocation6 + $0xc0] ss:$16 sps:$4 sm:$0xff]  }
 0x717   :  { %4247 = vtanh.f32 %v1536_v41  ;;  %v4053_v41 = vld [vmem:[#allocation6 + $0xe4] ss:$16 sps:$4 sm:$0xff]  }
 0x71a   :  { %v4234_v37 = vpop.eup %4233 }
 0x71b   :  { %v1543_v38 = vmul.f32 0.5, %v4234_v37  ;;  %v4236_v40 = vpop.eup %4235  ;;  %v4047_v37 = vld [vmem:[#allocation6 + $0xc4] ss:$16 sps:$4 sm:$0xff]  }
 0x71c   :  { %v4238_v42 = vpop.eup %4237  ;;  %v1544_v44 = vmul.f32 0.5, %v4236_v40  ;;  %v4048_v40 = vld [vmem:[#allocation6 + $0xc8] ss:$16 sps:$4 sm:$0xff]  }
 0x71d   :  { %v1549_v43 = vadd.f32 0.5, %v1543_v38  ;;  %v4240_v16 = vpop.eup %4239  ;;  %v1546_v5 = vmul.f32 0.5, %v4238_v42  ;;  %v4050_v38 = vld [vmem:[#allocation6 + $0xcc] ss:$16 sps:$4 sm:$0xff]  }
 0x71e   :  { %v4242_v10 = vpop.eup %4241  ;;  %v1550_v13 = vadd.f32 0.5, %v1544_v44  ;;  %v4056_v42 = vld [vmem:[#allocation6 + $0xec] ss:$16 sps:$4 sm:$0xff]   ;;  %v4054_v44 = vld [vmem:[#allocation6 + $0xe8] ss:$16 sps:$4 sm:$0xff]  }
 0x71f   :  { %v1559_v62 = vmul.f32 %v4240_v16, %v1549_v43  ;;  %v1552_v15 = vadd.f32 0.5, %v1546_v5  ;;  %v1547_v47 = vmul.f32 0.5, %v4242_v10  ;;  %v4244_v3 = vpop.eup %4243  ;;  %v4051_v43 = vld [vmem:[#allocation6 + $0xe0] ss:$16 sps:$4 sm:$0xff]   ;;  %v5911_v16 = vld [vmem:[#allocation16_spill] sm:$0xff] }
 0x720   :  { %v1557_v7 = vmul.f32 %v1550_v13, %v5232_v8  ;;  %v4246_v6 = vpop.eup %4245  ;;  %v5333_v5 = vld [vmem:[#allocation8 + $0xc] ss:$16 sps:$4 sm:$0xff]   ;;  %v5335_v10 = vld [vmem:[#allocation8 + $0x8] ss:$16 sps:$4 sm:$0xff]  }
 0x721   :  { %v1553_v45 = vadd.f32 0.5, %v1547_v47  ;;  %v1560_v49 = vmul.f32 %v4244_v3, %v1552_v15  ;;  %v4248_v12 = vpop.eup %4247  ;;  %v1545_v58 = vmul.f32 0.5, %v4246_v6  ;;  %v5341_v13 = vld [vmem:[#allocation8 + $0x2c] ss:$16 sps:$4 sm:$0xff]   ;;  %v5347_v15 = vld [vmem:[#allocation8 + $0x28] ss:$16 sps:$4 sm:$0xff]  }
 0x722   :  { %v5288_v48 = vadd.f32 %v1559_v62, %v1557_v7  ;;  %v1548_v55 = vmul.f32 0.5, %v4248_v12  ;;  %v5345_v62 = vld [vmem:[#allocation8 + $0x20] ss:$16 sps:$4 sm:$0xff]   ;;  %v5351_v47 = vld [vmem:[#allocation8 + $0x44] ss:$16 sps:$4 sm:$0xff]  }
 0x723   :  { %v1558_v4 = vmul.f32 %v1553_v45, %v5236_v1  ;;  %v1551_v2 = vadd.f32 0.5, %v1545_v58  ;;  %v4017_v1 = vld [vmem:[#allocation6 + $0x24] ss:$16 sps:$4 sm:$0xff]   ;;  %v5355_v3 = vld [vmem:[#allocation8 + $0x40] ss:$16 sps:$4 sm:$0xff]  }
 0x724   :  { %4249 = vtanh.f32 %v5288_v48  ;;  %v1554_v0 = vadd.f32 0.5, %v1548_v55  ;;  %v5359_v7 = vld [vmem:[#allocation8 + $0x4c] ss:$16 sps:$4 sm:$0xff]   ;;  %v5362_v45 = vld [vmem:[#allocation8 + $0x48] ss:$16 sps:$4 sm:$0xff]  }
 0x725   :  { %v5292_v59 = vadd.f32 %v1560_v49, %v1558_v4  ;;  %v5365_v49 = vld [vmem:[#allocation8 + $0x64] ss:$16 sps:$4 sm:$0xff]   ;;  %v5367_v4 = vld [vmem:[#allocation8 + $0x6c] ss:$16 sps:$4 sm:$0xff]   ;;  %v5370_v6 = vld [vmem:[#allocation8 + $0x60] ss:$16 sps:$4 sm:$0xff]  }
 0x726   :  { %v5372_v12 = vld [vmem:[#allocation8 + $0x68] ss:$16 sps:$4 sm:$0xff]   ;;  %v5377_v58 = vld [vmem:[#allocation8 + $0x84] ss:$16 sps:$4 sm:$0xff]   ;;  %v5379_v55 = vld [vmem:[#allocation8 + $0x80] ss:$16 sps:$4 sm:$0xff]  }
 0x727   :  { %4251 = vtanh.f32 %v5292_v59 }
 0x72e   :  { %v4250_v57 = vpop.eup %4249 }
 0x72f   :  { %v1565_v18 = vmul.f32 %v4250_v57, %v1551_v2  ;;  %v5381_v57 = vld [vmem:[#allocation8 + $0x8c] ss:$16 sps:$4 sm:$0xff]   ;;  %v5383_v2 = vld [vmem:[#allocation8 + $0x88] ss:$16 sps:$4 sm:$0xff]  }
 0x731   :  { %v4252_v8 = vpop.eup %4251 }
 0x732   :  { %v1566_v61 = vmul.f32 %v4252_v8, %v1554_v0  ;;  %v5385_v0 = vld [vmem:[#allocation8 + $0xa4] ss:$16 sps:$4 sm:$0xff]   ;;  %v5389_v8 = vld [vmem:[#allocation8 + $0xac] ss:$16 sps:$4 sm:$0xff]  }
 0x734   :  { %v5295_v21 = vpack.c.bf16 %v1566_v61, %v1565_v18  ;;  %v5393_v18 = vld [vmem:[#allocation8 + $0xa0] ss:$16 sps:$4 sm:$0xff]   ;;  %v5395_v61 = vld [vmem:[#allocation8 + $0xa8] ss:$16 sps:$4 sm:$0xff]  }
 0x736   :  { %1610 = vmatmul.mubr.bf16.vlgmr.msra.gmra.mrb[28].mxu0 %v5295_v21  ;;  %1653 = vmatmul.mubr.bf16.vlgmr.msra.gmra.mrb[36].mxu1 %v5295_v21 }
 0x737   :  { %1964 = vmatpush1.bf16.msra.mxu0 %v4009_v19  ;;  %2077 = vmatpush1.bf16.msra.mxu1 %v4012_v20  ;;  %v5399_v19 = vld [vmem:[#allocation8 + $0xc4] ss:$16 sps:$4 sm:$0xff]   ;;  %v5401_v20 = vld [vmem:[#allocation8 + $0xcc] ss:$16 sps:$4 sm:$0xff]  }
 0x738   :  { %1965 = vmatprep.subr.bf16.mxu0 %v4017_v1  ;;  %2078 = vmatprep.subr.bf16.mxu1 %v4020_v22  ;;  %v5407_v1 = vld [vmem:[#allocation8 + $0xc8] ss:$16 sps:$4 sm:$0xff]   ;;  %v5411_v22 = vld [vmem:[#allocation8 + $0xe4] ss:$16 sps:$4 sm:$0xff]  }
 0x739   :  { %1995 = vmatprep.mubr.bf16.mxu0 %v5908_v46  ;;  %2108 = vmatprep.mubr.bf16.mxu1 %v5908_v46 }
 0x73b   :  { %1966 = vmatpush1.bf16.msra.mxu0 %v4015_v24  ;;  %2079 = vmatpush1.bf16.msra.mxu1 %v4018_v25  ;;  %v5413_v24 = vld [vmem:[#allocation8 + $0xec] ss:$16 sps:$4 sm:$0xff]   ;;  %v5417_v25 = vld [vmem:[#allocation8 + $0xe0] ss:$16 sps:$4 sm:$0xff]  }
 0x73c   :  { %1967 = vmatprep.subr.bf16.mxu0 %v4023_v26  ;;  %2080 = vmatprep.subr.bf16.mxu1 %v4026_v27  ;;  %v5419_v26 = vld [vmem:[#allocation8 + $0xe8] ss:$16 sps:$4 sm:$0xff]  }
 0x73d   :  { %v5913_v27 = vld [vmem:[#allocation12_spill] sm:$0xff] }
 0x73f   :  { %1968 = vmatpush1.bf16.msra.mxu0 %v4021_v28  ;;  %2081 = vmatpush1.bf16.msra.mxu1 %v4024_v14  ;;  %v338_v28 = vadd.f32 %v5913_v27, %v4862_v50  ;;  %v5914_v14 = vld [vmem:[#allocation13_spill] sm:$0xff] }
 0x740   :  { %1969 = vmatprep.subr.bf16.mxu0 %v4029_v29  ;;  %2082 = vmatprep.subr.bf16.mxu1 %v4032_v30  ;;  %v340_v29 = vadd.f32 %v5914_v14, %v4868_v52 }
 0x743   :  { %1970 = vmatpush1.bf16.msra.mxu0 %v4027_v51  ;;  %2083 = vmatpush1.bf16.msra.mxu1 %v4030_v31  ;;  %v5915_v31 = vld [vmem:[#allocation14_spill] sm:$0xff] }
 0x744   :  { %1971 = vmatprep.subr.bf16.mxu0 %v4035_v32  ;;  %2084 = vmatprep.subr.bf16.mxu1 %v4038_v54  ;;  %v342_v32 = vadd.f32 %v5915_v31, %v4862_v50 }
 0x747   :  { %1972 = vmatpush1.bf16.msra.mxu0 %v4033_v33  ;;  %2085 = vmatpush1.bf16.msra.mxu1 %v4036_v34 }
 0x748   :  { %1973 = vmatprep.subr.bf16.mxu0 %v4041_v56  ;;  %2086 = vmatprep.subr.bf16.mxu1 %v4044_v35  ;;  %v5916_v56 = vld [vmem:[#allocation15_spill] sm:$0xff] }
 0x749   :  { %v344_v35 = vadd.f32 %v5916_v56, %v4868_v52 }
 0x74b   :  { %1974 = vmatpush1.bf16.msra.mxu0 %v4039_v60  ;;  %2087 = vmatpush1.bf16.msra.mxu1 %v4042_v36 }
 0x74c   :  { %1975 = vmatprep.subr.bf16.mxu0 %v4047_v37  ;;  %2088 = vmatprep.subr.bf16.mxu1 %v4050_v38 }
 0x74f   :  { %1976 = vmatpush1.bf16.msra.mxu0 %v4045_v39  ;;  %2089 = vmatpush1.bf16.msra.mxu1 %v4048_v40 }
 0x750   :  { %1977 = vmatprep.subr.bf16.mxu0 %v4053_v41  ;;  %2090 = vmatprep.subr.bf16.mxu1 %v4056_v42 }
 0x753   :  { %1978 = vmatpush1.bf16.msra.mxu0 %v4051_v43  ;;  %2091 = vmatpush1.bf16.msra.mxu1 %v4054_v44 }
 0x754   :  { %2509 = vmatprep.subr.bf16.mxu1 %v5333_v5 }
 0x756   :  { %1996 = vmatmul.mubr.bf16.vlgmr.msra.gmra.mrb[32].mxu0 %v4908_v11  ;;  %2109 = vmatmul.mubr.bf16.vlgmr.msra.gmra.mrb[40].mxu1 %v4908_v11  ;;  %v5912_v11 = vld [vmem:[#allocation17_spill] sm:$0xff] }
 0x757   :  { %2005 = vmatprep.mubr.bf16.mxu0 %v5908_v46  ;;  %2118 = vmatprep.mubr.bf16.mxu1 %v5908_v46 }
 0x758   :  { %2510 = vmatpush1.bf16.msra.mxu1 %v5335_v10 }
 0x759   :  { %2511 = vmatprep.subr.bf16.mxu1 %v5341_v13 }
 0x75c   :  { %2512 = vmatpush1.bf16.msra.mxu1 %v5347_v15 }
 0x75d   :  { %2513 = vmatprep.subr.bf16.mxu1 %v5359_v7 }
 0x75e   :  { %2006 = vmatmul.mubr.bf16.gmra.mrb[36].mxu0 %v4962_v9  ;;  %2119 = vmatmul.mubr.bf16.gmra.mrb[44].mxu1 %v4962_v9  ;;  %v5329_v9 = vld [vmem:[#allocation8 + $0x4] ss:$16 sps:$4 sm:$0xff]  }
 0x75f   :  { %2015 = vmatprep.mubr.bf16.mxu0 %v5908_v46  ;;  %2128 = vmatprep.mubr.bf16.mxu1 %v5908_v46 }
 0x760   :  { %2466 = vmatprep.subr.bf16.mxu0 %v5329_v9  ;;  %2514 = vmatpush1.bf16.msra.mxu1 %v5362_v45 }
 0x761   :  { %2515 = vmatprep.subr.bf16.mxu1 %v5367_v4 }
 0x764   :  { %2516 = vmatpush1.bf16.msra.mxu1 %v5372_v12 }
 0x765   :  { %2517 = vmatprep.subr.bf16.mxu1 %v5381_v57 }
 0x766   :  { %2016 = vmatmul.mubr.bf16.gmra.mrb[40].mxu0 %v5911_v16  ;;  %2129 = vmatmul.mubr.bf16.gmra.mrb[48].mxu1 %v5911_v16 }
 0x767   :  { %2025 = vmatprep.mubr.bf16.mxu0 %v5908_v46  ;;  %2138 = vmatprep.mubr.bf16.mxu1 %v5908_v46 }
 0x768   :  { %2518 = vmatpush1.bf16.msra.mxu1 %v5383_v2 }
 0x769   :  { %2519 = vmatprep.subr.bf16.mxu1 %v5389_v8 }
 0x76c   :  { %2520 = vmatpush1.bf16.msra.mxu1 %v5395_v61 }
 0x76d   :  { %2521 = vmatprep.subr.bf16.mxu1 %v5401_v20 }
 0x76e   :  { %2026 = vmatmul.mubr.bf16.gmra.mrb[44].mxu0 %v5072_v53  ;;  %2139 = vmatmul.mubr.bf16.gmra.mrb[52].mxu1 %v5072_v53  ;;  %v5331_v53 = vld [vmem:[#allocation8] ss:$16 sps:$4 sm:$0xff]  }
 0x76f   :  { %2035 = vmatprep.mubr.bf16.mxu0 %v5908_v46  ;;  %2148 = vmatprep.mubr.bf16.mxu1 %v5908_v46 }
 0x770   :  { %2467 = vmatpush1.bf16.msra.mxu0 %v5331_v53  ;;  %2522 = vmatpush1.bf16.msra.mxu1 %v5407_v1 }
 0x771   :  { %2523 = vmatprep.subr.bf16.mxu1 %v5413_v24 }
 0x774   :  { %2524 = vmatpush1.bf16.msra.mxu1 %v5419_v26 }
 0x775   :  { %2648 = vmatprep.subr.bf16.mxu1 %v5333_v5 }
 0x776   :  { %2036 = vmatmul.mubr.bf16.gmra.mrb[48].mxu0 %v5912_v11  ;;  %2149 = vmatmul.mubr.bf16.gmra.mrb[56].mxu1 %v5912_v11 }
 0x777   :  { %2045 = vmatprep.mubr.bf16.mxu0 %v5908_v46  ;;  %2158 = vmatprep.mubr.bf16.mxu1 %v5908_v46 }
 0x77e   :  { %2046 = vmatmul.mubr.bf16.gmra.mrb[52].mxu0 %v5239_v63  ;;  %2159 = vmatmul.mubr.bf16.gmra.mrb[60].mxu1 %v5239_v63  ;;  %v5337_v63 = vld [vmem:[#allocation8 + $0x24] ss:$16 sps:$4 sm:$0xff]  }
 0x77f   :  { %2055 = vmatprep.mubr.bf16.mxu0 %v5908_v46  ;;  %2168 = vmatprep.mubr.bf16.mxu1 %v5908_v46 }
 0x780   :  { %2468 = vmatprep.subr.bf16.mxu0 %v5337_v63 }
 0x781   :  { %2469 = vmatpush1.bf16.msra.mxu0 %v5345_v62 }
 0x782   :  { %2470 = vmatprep.subr.bf16.mxu0 %v5351_v47 }
 0x785   :  { %2471 = vmatpush1.bf16.msra.mxu0 %v5355_v3 }
 0x786   :  { %2056 = vmatmul.mubr.bf16.gmra.mrb[56].mxu0 %v5295_v21  ;;  %2169 = vmatmul.mubr.bf16.gmra.mrb[64].mxu1 %v5295_v21  ;;  %v5405_v21 = vld [vmem:[#allocation8 + $0xc0] ss:$16 sps:$4 sm:$0xff]  }
 0x787   :  { %2065 = vmatprep.mubr.bf16.mxu0 %v5908_v46  ;;  %2178 = vmatprep.mubr.bf16.mxu1 %v5908_v46 }
 0x788   :  { %2472 = vmatprep.subr.bf16.mxu0 %v5365_v49 }
 0x789   :  { %2473 = vmatpush1.bf16.msra.mxu0 %v5370_v6 }
 0x78a   :  { %2474 = vmatprep.subr.bf16.mxu0 %v5377_v58 }
 0x78d   :  { %2475 = vmatpush1.bf16.msra.mxu0 %v5379_v55 }
 0x78e   :  { %2476 = vmatprep.subr.bf16.mxu0 %v5385_v0 }
 0x791   :  { %2477 = vmatpush1.bf16.msra.mxu0 %v5393_v18 }
 0x792   :  { %2478 = vmatprep.subr.bf16.mxu0 %v5399_v19 }
 0x795   :  { %2479 = vmatpush1.bf16.msra.mxu0 %v5405_v21 }
 0x796   :  { %2480 = vmatprep.subr.bf16.mxu0 %v5411_v22 }
 0x799   :  { %2481 = vmatpush1.bf16.msra.mxu0 %v5417_v25 }
 0x79a   :  { %2605 = vmatprep.subr.bf16.mxu0 %v5329_v9 }
 0x809   :  { %v1611_v30 = vpop.f32.mrb[28].mxu0  ;;  %v1654_v51 = vpop.f32.mrb[36].mxu1 }
 0x80a   :  { %v1663_v54 = vadd.f32 %v1611_v30, %v338_v28  ;;  %v1613_v33 = vpop.f32.mrb[29].mxu0  ;;  %v1656_v34 = vpop.f32.mrb[37].mxu1  ;;  %v3775_v52 = vadd.f32 %v1654_v51, %v4896_v23 }
 0x80b   :  { %v1664_v60 = vadd.f32 %v1613_v33, %v340_v29  ;;  %v1615_v36 = vpop.f32.mrb[30].mxu0  ;;  %v1658_v37 = vpop.f32.mrb[38].mxu1  ;;  %v3776_v44 = vadd.f32 %v1656_v34, %v4892_v17 }
 0x80c   :  { %v1671_v38 = vmul.f32 0.5, %v1663_v54  ;;  %v1667_v39 = vadd.f32 %v1615_v36, %v342_v32  ;;  %v1617_v40 = vpop.f32.mrb[31].mxu0  ;;  %v1660_v41 = vpop.f32.mrb[39].mxu1  ;;  %v3777_v27 = vadd.f32 %v1658_v37, %v4896_v23  ;;  %v1673_v28 = vmul.f32 0.5, %v3775_v52 }
 0x80d   :  { %v1672_v42 = vmul.f32 0.5, %v1664_v60  ;;  %v1668_v43 = vadd.f32 %v1617_v40, %v344_v35  ;;  %v3778_v11 = vadd.f32 %v1660_v41, %v4892_v17 }
 0x80e   :  { %4253 = vtanh.f32 %v1671_v38  ;;  %v1674_v16 = vmul.f32 0.5, %v1667_v39  ;;  %v1676_v31 = vmul.f32 0.5, %v3777_v27 }
 0x80f   :  { %v1675_v50 = vmul.f32 0.5, %v1668_v43  ;;  %4255 = vtanh.f32 %v1672_v42  ;;  %v1773_v42 = vld [vmem:[%s5887_s6] sm:$0xf] }
 0x810   :  { %4257 = vtanh.f32 %v1674_v16  ;;  %v5917_v16 = vld [vmem:[#allocation11_spill] sm:$0xff] }
 0x811   :  { %4259 = vtanh.f32 %v3776_v44  ;;  %v5919_v52 = vsub.s32 1, %v5917_v16 }
 0x812   :  { %4261 = vtanh.f32 %v1675_v50  ;;  %v5918_v50 = vsub.s32 0, %v5917_v16 }
 0x813   :  { %4263 = vtanh.f32 %v3778_v11 }
 0x814   :  { %4265 = vtanh.f32 %v1673_v28  ;;  %v5446_v11 = vrot.slane %v1773_v42, %v5918_v50 }
 0x815   :  { %4267 = vtanh.f32 %v1676_v31  ;;  %v5920_v31 = vsub.s32 3, %v5917_v16 }
 0x818   :  { %v4254_v14 = vpop.eup %4253 }
 0x819   :  { %v1683_v29 = vmul.f32 0.5, %v4254_v14  ;;  %v4256_v30 = vpop.eup %4255 }
 0x81a   :  { %v4258_v32 = vpop.eup %4257  ;;  %v1684_v33 = vmul.f32 0.5, %v4256_v30 }
 0x81b   :  { %v1689_v54 = vadd.f32 0.5, %v1683_v29  ;;  %v4260_v34 = vpop.eup %4259  ;;  %v1686_v56 = vmul.f32 0.5, %v4258_v32  ;;  %v5455_v32 = vrot.slane %v1773_v42, %v5920_v31 }
 0x81c   :  { %v4262_v35 = vpop.eup %4261  ;;  %v1690_v17 = vadd.f32 0.5, %v1684_v33 }
 0x81d   :  { %v1699_v60 = vmul.f32 %v4260_v34, %v1689_v54  ;;  %v1692_v36 = vadd.f32 0.5, %v1686_v56  ;;  %v1687_v51 = vmul.f32 0.5, %v4262_v35  ;;  %v4264_v38 = vpop.eup %4263 }
 0x81e   :  { %v1697_v23 = vmul.f32 %v1690_v17, %v5288_v48  ;;  %v4266_v44 = vpop.eup %4265  ;;  %v5450_v48 = vrot.slane %v1773_v42, %v5919_v52 }
 0x81f   :  { %v1693_v37 = vadd.f32 0.5, %v1687_v51  ;;  %v1700_v39 = vmul.f32 %v4264_v38, %v1692_v36  ;;  %v4268_v27 = vpop.eup %4267  ;;  %v1685_v28 = vmul.f32 0.5, %v4266_v44 }
 0x820   :  { %v1701_v40 = vadd.f32 %v1699_v60, %v1697_v23  ;;  %v1688_v33 = vmul.f32 0.5, %v4268_v27  ;;  %v5921_v27 = vsub.s32 2, %v5917_v16 }
 0x821   :  { %v1698_v41 = vmul.f32 %v1693_v37, %v5292_v59  ;;  %v1691_v17 = vadd.f32 0.5, %v1685_v28 }
 0x822   :  { %4269 = vtanh.f32 %v1701_v40  ;;  %v1694_v44 = vadd.f32 0.5, %v1688_v33  ;;  %v5463_v28 = vrot.slane %v1773_v42, %v5921_v27 }
 0x823   :  { %v1702_v43 = vadd.f32 %v1700_v39, %v1698_v41 }
 0x825   :  { %4271 = vtanh.f32 %v1702_v43 }
 0x829   :  { %v1997_v14 = vpop.f32.mrb[32].mxu0  ;;  %v2110_v59 = vpop.f32.mrb[40].mxu1 }
 0x82a   :  { %v1998_v29 = vadd.f32 %v1997_v14, %v5446_v11  ;;  %v1999_v30 = vpop.f32.mrb[33].mxu0  ;;  %v2112_v54 = vpop.f32.mrb[41].mxu1  ;;  %v2111_v31 = vadd.f32 %v2110_v59, %v5463_v28 }
 0x82b   :  { %v2000_v34 = vadd.f32 %v1999_v30, %v5450_v48  ;;  %v2001_v56 = vpop.f32.mrb[34].mxu0  ;;  %v2114_v35 = vpop.f32.mrb[42].mxu1  ;;  %v2113_v40 = vadd.f32 %v2112_v54, %v5455_v32 }
 0x82c   :  { %v2261_v60 = vmul.f32 0.5, %v1998_v29  ;;  %v2002_v36 = vadd.f32 %v2001_v56, %v5446_v11  ;;  %v2003_v51 = vpop.f32.mrb[35].mxu0  ;;  %v2116_v38 = vpop.f32.mrb[43].mxu1  ;;  %v2115_v54 = vadd.f32 %v2114_v35, %v5463_v28  ;;  %v2263_v33 = vmul.f32 0.5, %v2111_v31 }
 0x82d   :  { %v4270_v23 = vpop.eup %4269  ;;  %v2262_v37 = vmul.f32 0.5, %v2000_v34  ;;  %v2004_v39 = vadd.f32 %v2003_v51, %v5450_v48  ;;  %v2117_v14 = vadd.f32 %v2116_v38, %v5455_v32 }
 0x82e   :  { %4273 = vtanh.f32 %v2261_v60  ;;  %v2264_v41 = vmul.f32 0.5, %v2002_v36  ;;  %v1705_v43 = vmul.f32 %v4270_v23, %v1691_v17  ;;  %v2266_v56 = vmul.f32 0.5, %v2115_v54 }
 0x82f   :  { %v2265_v50 = vmul.f32 0.5, %v2004_v39  ;;  %v4272_v52 = vpop.eup %4271  ;;  %4275 = vtanh.f32 %v2262_v37 }
 0x830   :  { %4277 = vtanh.f32 %v2264_v41  ;;  %v1706_v29 = vmul.f32 %v4272_v52, %v1694_v44 }
 0x831   :  { %4279 = vtanh.f32 %v2113_v40 }
 0x832   :  { %4281 = vtanh.f32 %v2265_v50  ;;  %v1707_v30 = vpack.c.bf16 %v1706_v29, %v1705_v43 }
 0x833   :  { %4283 = vtanh.f32 %v2117_v14 }
 0x834   :  { %2066 = vmatmul.mubr.bf16.gmra.mrb[60].mxu0 %v1707_v30  ;;  %2179 = vmatmul.mubr.bf16.gmra.mrb[68].mxu1 %v1707_v30  ;;  %4285 = vtanh.f32 %v2263_v33 }
 0x835   :  { %2498 = vmatprep.mubr.bf16.mxu0 %v5908_v46  ;;  %2541 = vmatprep.mubr.bf16.mxu1 %v5908_v46  ;;  %4287 = vtanh.f32 %v2266_v56 }
 0x838   :  { %v4274_v42 = vpop.eup %4273 }
 0x839   :  { %v2273_v16 = vmul.f32 0.5, %v4274_v42  ;;  %v4276_v34 = vpop.eup %4275 }
 0x83a   :  { %v4278_v17 = vpop.eup %4277  ;;  %v2274_v36 = vmul.f32 0.5, %v4276_v34 }
 0x83b   :  { %v2279_v60 = vadd.f32 0.5, %v2273_v16  ;;  %v4280_v51 = vpop.eup %4279  ;;  %v2276_v38 = vmul.f32 0.5, %v4278_v17 }
 0x83c   :  { %v4282_v59 = vpop.eup %4281  ;;  %v2280_v23 = vadd.f32 0.5, %v2274_v36 }
 0x83d   :  { %v2289_v37 = vmul.f32 %v4280_v51, %v2279_v60  ;;  %v2282_v39 = vadd.f32 0.5, %v2276_v38  ;;  %v2277_v35 = vmul.f32 0.5, %v4282_v59  ;;  %v4284_v40 = vpop.eup %4283 }
 0x83e   :  { %v2287_v41 = vmul.f32 0.0, %v2280_v23  ;;  %v4286_v14 = vpop.eup %4285 }
 0x83f   :  { %v2283_v43 = vadd.f32 0.5, %v2277_v35  ;;  %v2290_v44 = vmul.f32 %v4284_v40, %v2282_v39  ;;  %v4288_v29 = vpop.eup %4287  ;;  %v2275_v30 = vmul.f32 0.5, %v4286_v14 }
 0x840   :  { %v5470_v50 = vadd.f32 %v2289_v37, %v2287_v41  ;;  %v2278_v31 = vmul.f32 0.5, %v4288_v29 }
 0x841   :  { %v2288_v52 = vmul.f32 0.0, %v2283_v43  ;;  %v2281_v42 = vadd.f32 0.5, %v2275_v30 }
 0x842   :  { %4289 = vtanh.f32 %v5470_v50  ;;  %v2284_v16 = vadd.f32 0.5, %v2278_v31 }
 0x843   :  { %v5473_v27 = vadd.f32 %v2290_v44, %v2288_v52 }
 0x845   :  { %4291 = vtanh.f32 %v5473_v27 }
 0x84c   :  { %v4290_v54 = vpop.eup %4289 }
 0x84d   :  { %v2295_v34 = vmul.f32 %v4290_v54, %v2281_v42 }
 0x84f   :  { %v4292_v33 = vpop.eup %4291 }
 0x850   :  { %v2296_v56 = vmul.f32 %v4292_v33, %v2284_v16 }
 0x852   :  { %v2305_v17 = vpack.c.bf16 %v2296_v56, %v2295_v34 }
 0x854   :  { %2499 = vmatmul.mubr.bf16.vlgmr.msra.gmra.mrb[36].mxu0 %v2305_v17  ;;  %2542 = vmatmul.mubr.bf16.vlgmr.msra.gmra.mrb[44].mxu1 %v2305_v17 }
 0x855   :  { %2606 = vmatpush1.bf16.msra.mxu0 %v5331_v53  ;;  %2649 = vmatpush1.bf16.msra.mxu1 %v5335_v10 }
 0x856   :  { %2607 = vmatprep.subr.bf16.mxu0 %v5337_v63  ;;  %2650 = vmatprep.subr.bf16.mxu1 %v5341_v13 }
 0x857   :  { %2637 = vmatprep.mubr.bf16.mxu0 %v5908_v46  ;;  %2680 = vmatprep.mubr.bf16.mxu1 %v5908_v46 }
 0x859   :  { %2608 = vmatpush1.bf16.msra.mxu0 %v5345_v62  ;;  %2651 = vmatpush1.bf16.msra.mxu1 %v5347_v15 }
 0x85a   :  { %2609 = vmatprep.subr.bf16.mxu0 %v5351_v47  ;;  %2652 = vmatprep.subr.bf16.mxu1 %v5359_v7 }
 0x85d   :  { %2610 = vmatpush1.bf16.msra.mxu0 %v5355_v3  ;;  %2653 = vmatpush1.bf16.msra.mxu1 %v5362_v45 }
 0x85e   :  { %2611 = vmatprep.subr.bf16.mxu0 %v5365_v49  ;;  %2654 = vmatprep.subr.bf16.mxu1 %v5367_v4 }
 0x861   :  { %2612 = vmatpush1.bf16.msra.mxu0 %v5370_v6  ;;  %2655 = vmatpush1.bf16.msra.mxu1 %v5372_v12 }
 0x862   :  { %2613 = vmatprep.subr.bf16.mxu0 %v5377_v58  ;;  %2656 = vmatprep.subr.bf16.mxu1 %v5381_v57 }
 0x865   :  { %2614 = vmatpush1.bf16.msra.mxu0 %v5379_v55  ;;  %2657 = vmatpush1.bf16.msra.mxu1 %v5383_v2 }
 0x866   :  { %2615 = vmatprep.subr.bf16.mxu0 %v5385_v0  ;;  %2658 = vmatprep.subr.bf16.mxu1 %v5389_v8 }
 0x869   :  { %2616 = vmatpush1.bf16.msra.mxu0 %v5393_v18  ;;  %2659 = vmatpush1.bf16.msra.mxu1 %v5395_v61 }
 0x86a   :  { %2617 = vmatprep.subr.bf16.mxu0 %v5399_v19  ;;  %2660 = vmatprep.subr.bf16.mxu1 %v5401_v20 }
 0x86d   :  { %2618 = vmatpush1.bf16.msra.mxu0 %v5405_v21  ;;  %2661 = vmatpush1.bf16.msra.mxu1 %v5407_v1 }
 0x86e   :  { %2619 = vmatprep.subr.bf16.mxu0 %v5411_v22  ;;  %2662 = vmatprep.subr.bf16.mxu1 %v5413_v24 }
 0x871   :  { %2620 = vmatpush1.bf16.msra.mxu0 %v5417_v25  ;;  %2663 = vmatpush1.bf16.msra.mxu1 %v5419_v26 }
 0x872   :  { %2744 = vmatprep.subr.bf16.mxu0 %v5329_v9  ;;  %2787 = vmatprep.subr.bf16.mxu1 %v5333_v5 }
 0x927   :  { %v2500_v60 = vpop.f32.mrb[36].mxu0  ;;  %v2543_v36 = vpop.f32.mrb[44].mxu1 }
 0x928   :  { %v3779_v51 = vadd.f32 %v2500_v60, %v5446_v11  ;;  %v2502_v38 = vpop.f32.mrb[37].mxu0  ;;  %v2545_v59 = vpop.f32.mrb[45].mxu1  ;;  %v3807_v54 = vadd.f32 %v2543_v36, %v5463_v28 }
 0x929   :  { %v3780_v23 = vadd.f32 %v2502_v38, %v5450_v48  ;;  %v2504_v37 = vpop.f32.mrb[38].mxu0  ;;  %v2547_v39 = vpop.f32.mrb[46].mxu1  ;;  %v3808_v14 = vadd.f32 %v2545_v59, %v5455_v32 }
 0x92a   :  { %v2560_v35 = vmul.f32 0.5, %v3779_v51  ;;  %v3781_v40 = vadd.f32 %v2504_v37, %v5446_v11  ;;  %v2506_v41 = vpop.f32.mrb[39].mxu0  ;;  %v2549_v43 = vpop.f32.mrb[47].mxu1  ;;  %v3809_v42 = vadd.f32 %v2547_v39, %v5463_v28  ;;  %v2562_v34 = vmul.f32 0.5, %v3807_v54 }
 0x92b   :  { %v2561_v44 = vmul.f32 0.5, %v3780_v23  ;;  %v3782_v52 = vadd.f32 %v2506_v41, %v5450_v48  ;;  %v3810_v31 = vadd.f32 %v2549_v43, %v5455_v32 }
 0x92c   :  { %4293 = vtanh.f32 %v2560_v35  ;;  %v2563_v29 = vmul.f32 0.5, %v3781_v40  ;;  %v2565_v17 = vmul.f32 0.5, %v3809_v42 }
 0x92d   :  { %v2564_v30 = vmul.f32 0.5, %v3782_v52  ;;  %4295 = vtanh.f32 %v2561_v44 }
 0x92e   :  { %4297 = vtanh.f32 %v2563_v29 }
 0x92f   :  { %4299 = vtanh.f32 %v3808_v14 }
 0x930   :  { %4301 = vtanh.f32 %v2564_v30 }
 0x931   :  { %4303 = vtanh.f32 %v3810_v31 }
 0x932   :  { %4305 = vtanh.f32 %v2562_v34 }
 0x933   :  { %4307 = vtanh.f32 %v2565_v17 }
 0x936   :  { %v4294_v16 = vpop.eup %4293 }
 0x937   :  { %v2572_v33 = vmul.f32 0.5, %v4294_v16  ;;  %v4296_v56 = vpop.eup %4295 }
 0x938   :  { %v4298_v60 = vpop.eup %4297  ;;  %v2573_v38 = vmul.f32 0.5, %v4296_v56 }
 0x939   :  { %v2578_v51 = vadd.f32 0.5, %v2572_v33  ;;  %v4300_v59 = vpop.eup %4299  ;;  %v2575_v23 = vmul.f32 0.5, %v4298_v60 }
 0x93a   :  { %v4302_v37 = vpop.eup %4301  ;;  %v2579_v35 = vadd.f32 0.5, %v2573_v38 }
 0x93b   :  { %v2588_v40 = vmul.f32 %v4300_v59, %v2578_v51  ;;  %v2581_v41 = vadd.f32 0.5, %v2575_v23  ;;  %v2576_v36 = vmul.f32 0.5, %v4302_v37  ;;  %v4304_v43 = vpop.eup %4303 }
 0x93c   :  { %v2586_v39 = vmul.f32 %v2579_v35, %v5470_v50  ;;  %v4306_v31 = vpop.eup %4305 }
 0x93d   :  { %v2582_v44 = vadd.f32 0.5, %v2576_v36  ;;  %v2589_v52 = vmul.f32 %v4304_v43, %v2581_v41  ;;  %v4308_v54 = vpop.eup %4307  ;;  %v2574_v42 = vmul.f32 0.5, %v4306_v31 }
 0x93e   :  { %v5519_v14 = vadd.f32 %v2588_v40, %v2586_v39  ;;  %v2577_v16 = vmul.f32 0.5, %v4308_v54 }
 0x93f   :  { %v2587_v29 = vmul.f32 %v2582_v44, %v5473_v27  ;;  %v2580_v34 = vadd.f32 0.5, %v2574_v42 }
 0x940   :  { %4309 = vtanh.f32 %v5519_v14  ;;  %v2583_v56 = vadd.f32 0.5, %v2577_v16 }
 0x941   :  { %v5523_v30 = vadd.f32 %v2589_v52, %v2587_v29 }
 0x943   :  { %4311 = vtanh.f32 %v5523_v30 }
 0x94a   :  { %v4310_v33 = vpop.eup %4309 }
 0x94b   :  { %v2594_v17 = vmul.f32 %v4310_v33, %v2580_v34 }
 0x94d   :  { %v4312_v50 = vpop.eup %4311 }
 0x94e   :  { %v2595_v60 = vmul.f32 %v4312_v50, %v2583_v56 }
 0x950   :  { %v2604_v51 = vpack.c.bf16 %v2595_v60, %v2594_v17 }
 0x952   :  { %2638 = vmatmul.mubr.bf16.vlgmr.msra.gmra.mrb[40].mxu0 %v2604_v51  ;;  %2681 = vmatmul.mubr.bf16.vlgmr.msra.gmra.mrb[48].mxu1 %v2604_v51 }
 0x953   :  { %2745 = vmatpush1.bf16.msra.mxu0 %v5331_v53  ;;  %2788 = vmatpush1.bf16.msra.mxu1 %v5335_v10 }
 0x954   :  { %2746 = vmatprep.subr.bf16.mxu0 %v5337_v63  ;;  %2789 = vmatprep.subr.bf16.mxu1 %v5341_v13 }
 0x955   :  { %2776 = vmatprep.mubr.bf16.mxu0 %v5908_v46  ;;  %2819 = vmatprep.mubr.bf16.mxu1 %v5908_v46 }
 0x957   :  { %2747 = vmatpush1.bf16.msra.mxu0 %v5345_v62  ;;  %2790 = vmatpush1.bf16.msra.mxu1 %v5347_v15 }
 0x958   :  { %2748 = vmatprep.subr.bf16.mxu0 %v5351_v47  ;;  %2791 = vmatprep.subr.bf16.mxu1 %v5359_v7 }
 0x95b   :  { %2749 = vmatpush1.bf16.msra.mxu0 %v5355_v3  ;;  %2792 = vmatpush1.bf16.msra.mxu1 %v5362_v45 }
 0x95c   :  { %2750 = vmatprep.subr.bf16.mxu0 %v5365_v49  ;;  %2793 = vmatprep.subr.bf16.mxu1 %v5367_v4 }
 0x95f   :  { %2751 = vmatpush1.bf16.msra.mxu0 %v5370_v6  ;;  %2794 = vmatpush1.bf16.msra.mxu1 %v5372_v12 }
 0x960   :  { %2752 = vmatprep.subr.bf16.mxu0 %v5377_v58  ;;  %2795 = vmatprep.subr.bf16.mxu1 %v5381_v57 }
 0x963   :  { %2753 = vmatpush1.bf16.msra.mxu0 %v5379_v55  ;;  %2796 = vmatpush1.bf16.msra.mxu1 %v5383_v2 }
 0x964   :  { %2754 = vmatprep.subr.bf16.mxu0 %v5385_v0  ;;  %2797 = vmatprep.subr.bf16.mxu1 %v5389_v8 }
 0x967   :  { %2755 = vmatpush1.bf16.msra.mxu0 %v5393_v18  ;;  %2798 = vmatpush1.bf16.msra.mxu1 %v5395_v61 }
 0x968   :  { %2756 = vmatprep.subr.bf16.mxu0 %v5399_v19  ;;  %2799 = vmatprep.subr.bf16.mxu1 %v5401_v20 }
 0x96b   :  { %2757 = vmatpush1.bf16.msra.mxu0 %v5405_v21  ;;  %2800 = vmatpush1.bf16.msra.mxu1 %v5407_v1 }
 0x96c   :  { %2758 = vmatprep.subr.bf16.mxu0 %v5411_v22  ;;  %2801 = vmatprep.subr.bf16.mxu1 %v5413_v24 }
 0x96f   :  { %2759 = vmatpush1.bf16.msra.mxu0 %v5417_v25  ;;  %2802 = vmatpush1.bf16.msra.mxu1 %v5419_v26 }
 0x970   :  { %2883 = vmatprep.subr.bf16.mxu0 %v5329_v9  ;;  %2926 = vmatprep.subr.bf16.mxu1 %v5333_v5 }
 0xa25   :  { %v2639_v27 = vpop.f32.mrb[40].mxu0  ;;  %v2682_v38 = vpop.f32.mrb[48].mxu1 }
 0xa26   :  { %v3783_v59 = vadd.f32 %v2639_v27, %v5446_v11  ;;  %v2641_v23 = vpop.f32.mrb[41].mxu0  ;;  %v2684_v37 = vpop.f32.mrb[49].mxu1  ;;  %v3811_v33 = vadd.f32 %v2682_v38, %v5463_v28 }
 0xa27   :  { %v3784_v35 = vadd.f32 %v2641_v23, %v5450_v48  ;;  %v2643_v40 = vpop.f32.mrb[42].mxu0  ;;  %v2686_v41 = vpop.f32.mrb[50].mxu1  ;;  %v3812_v31 = vadd.f32 %v2684_v37, %v5455_v32 }
 0xa28   :  { %v2699_v36 = vmul.f32 0.5, %v3783_v59  ;;  %v3785_v43 = vadd.f32 %v2643_v40, %v5446_v11  ;;  %v2645_v39 = vpop.f32.mrb[43].mxu0  ;;  %v2688_v44 = vpop.f32.mrb[51].mxu1  ;;  %v3813_v34 = vadd.f32 %v2686_v41, %v5463_v28  ;;  %v2701_v17 = vmul.f32 0.5, %v3811_v33 }
 0xa29   :  { %v2700_v52 = vmul.f32 0.5, %v3784_v35  ;;  %v3786_v29 = vadd.f32 %v2645_v39, %v5450_v48  ;;  %v3814_v16 = vadd.f32 %v2688_v44, %v5455_v32 }
 0xa2a   :  { %4313 = vtanh.f32 %v2699_v36  ;;  %v2702_v54 = vmul.f32 0.5, %v3785_v43  ;;  %v2704_v51 = vmul.f32 0.5, %v3813_v34 }
 0xa2b   :  { %v2703_v42 = vmul.f32 0.5, %v3786_v29  ;;  %4315 = vtanh.f32 %v2700_v52 }
 0xa2c   :  { %4317 = vtanh.f32 %v2702_v54 }
 0xa2d   :  { %4319 = vtanh.f32 %v3812_v31 }
 0xa2e   :  { %4321 = vtanh.f32 %v2703_v42 }
 0xa2f   :  { %4323 = vtanh.f32 %v3814_v16 }
 0xa30   :  { %4325 = vtanh.f32 %v2701_v17 }
 0xa31   :  { %4327 = vtanh.f32 %v2704_v51 }
 0xa34   :  { %v4314_v56 = vpop.eup %4313 }
 0xa35   :  { %v2711_v50 = vmul.f32 0.5, %v4314_v56  ;;  %v4316_v60 = vpop.eup %4315 }
 0xa36   :  { %v4318_v27 = vpop.eup %4317  ;;  %v2712_v23 = vmul.f32 0.5, %v4316_v60 }
 0xa37   :  { %v2717_v59 = vadd.f32 0.5, %v2711_v50  ;;  %v4320_v37 = vpop.eup %4319  ;;  %v2714_v35 = vmul.f32 0.5, %v4318_v27 }
 0xa38   :  { %v4322_v40 = vpop.eup %4321  ;;  %v2718_v36 = vadd.f32 0.5, %v2712_v23 }
 0xa39   :  { %v2727_v43 = vmul.f32 %v4320_v37, %v2717_v59  ;;  %v2720_v39 = vadd.f32 0.5, %v2714_v35  ;;  %v2715_v38 = vmul.f32 0.5, %v4322_v40  ;;  %v4324_v44 = vpop.eup %4323 }
 0xa3a   :  { %v2725_v41 = vmul.f32 %v2718_v36, %v5519_v14  ;;  %v4326_v16 = vpop.eup %4325 }
 0xa3b   :  { %v2721_v52 = vadd.f32 0.5, %v2715_v38  ;;  %v2728_v29 = vmul.f32 %v4324_v44, %v2720_v39  ;;  %v4328_v33 = vpop.eup %4327  ;;  %v2713_v34 = vmul.f32 0.5, %v4326_v16 }
 0xa3c   :  { %v5569_v31 = vadd.f32 %v2727_v43, %v2725_v41  ;;  %v2716_v56 = vmul.f32 0.5, %v4328_v33 }
 0xa3d   :  { %v2726_v54 = vmul.f32 %v2721_v52, %v5523_v30  ;;  %v2719_v17 = vadd.f32 0.5, %v2713_v34 }
 0xa3e   :  { %4329 = vtanh.f32 %v5569_v31  ;;  %v2722_v60 = vadd.f32 0.5, %v2716_v56 }
 0xa3f   :  { %v5573_v42 = vadd.f32 %v2728_v29, %v2726_v54 }
 0xa41   :  { %4331 = vtanh.f32 %v5573_v42 }
 0xa48   :  { %v4330_v50 = vpop.eup %4329 }
 0xa49   :  { %v2733_v51 = vmul.f32 %v4330_v50, %v2719_v17 }
 0xa4b   :  { %v4332_v14 = vpop.eup %4331 }
 0xa4c   :  { %v2734_v27 = vmul.f32 %v4332_v14, %v2722_v60 }
 0xa4e   :  { %v2743_v59 = vpack.c.bf16 %v2734_v27, %v2733_v51 }
 0xa50   :  { %2777 = vmatmul.mubr.bf16.vlgmr.msra.gmra.mrb[44].mxu0 %v2743_v59  ;;  %2820 = vmatmul.mubr.bf16.vlgmr.msra.gmra.mrb[52].mxu1 %v2743_v59 }
 0xa51   :  { %2884 = vmatpush1.bf16.msra.mxu0 %v5331_v53  ;;  %2927 = vmatpush1.bf16.msra.mxu1 %v5335_v10 }
 0xa52   :  { %2885 = vmatprep.subr.bf16.mxu0 %v5337_v63  ;;  %2928 = vmatprep.subr.bf16.mxu1 %v5341_v13 }
 0xa53   :  { %2915 = vmatprep.mubr.bf16.mxu0 %v5908_v46  ;;  %2958 = vmatprep.mubr.bf16.mxu1 %v5908_v46 }
 0xa55   :  { %2886 = vmatpush1.bf16.msra.mxu0 %v5345_v62  ;;  %2929 = vmatpush1.bf16.msra.mxu1 %v5347_v15 }
 0xa56   :  { %2887 = vmatprep.subr.bf16.mxu0 %v5351_v47  ;;  %2930 = vmatprep.subr.bf16.mxu1 %v5359_v7 }
 0xa59   :  { %2888 = vmatpush1.bf16.msra.mxu0 %v5355_v3  ;;  %2931 = vmatpush1.bf16.msra.mxu1 %v5362_v45 }
 0xa5a   :  { %2889 = vmatprep.subr.bf16.mxu0 %v5365_v49  ;;  %2932 = vmatprep.subr.bf16.mxu1 %v5367_v4 }
 0xa5d   :  { %2890 = vmatpush1.bf16.msra.mxu0 %v5370_v6  ;;  %2933 = vmatpush1.bf16.msra.mxu1 %v5372_v12 }
 0xa5e   :  { %2891 = vmatprep.subr.bf16.mxu0 %v5377_v58  ;;  %2934 = vmatprep.subr.bf16.mxu1 %v5381_v57 }
 0xa61   :  { %2892 = vmatpush1.bf16.msra.mxu0 %v5379_v55  ;;  %2935 = vmatpush1.bf16.msra.mxu1 %v5383_v2 }
 0xa62   :  { %2893 = vmatprep.subr.bf16.mxu0 %v5385_v0  ;;  %2936 = vmatprep.subr.bf16.mxu1 %v5389_v8 }
 0xa65   :  { %2894 = vmatpush1.bf16.msra.mxu0 %v5393_v18  ;;  %2937 = vmatpush1.bf16.msra.mxu1 %v5395_v61 }
 0xa66   :  { %2895 = vmatprep.subr.bf16.mxu0 %v5399_v19  ;;  %2938 = vmatprep.subr.bf16.mxu1 %v5401_v20 }
 0xa69   :  { %2896 = vmatpush1.bf16.msra.mxu0 %v5405_v21  ;;  %2939 = vmatpush1.bf16.msra.mxu1 %v5407_v1 }
 0xa6a   :  { %2897 = vmatprep.subr.bf16.mxu0 %v5411_v22  ;;  %2940 = vmatprep.subr.bf16.mxu1 %v5413_v24 }
 0xa6d   :  { %2898 = vmatpush1.bf16.msra.mxu0 %v5417_v25  ;;  %2941 = vmatpush1.bf16.msra.mxu1 %v5419_v26 }
 0xa6e   :  { %3022 = vmatprep.subr.bf16.mxu0 %v5329_v9  ;;  %3065 = vmatprep.subr.bf16.mxu1 %v5333_v5 }
 0xb23   :  { %v2778_v30 = vpop.f32.mrb[44].mxu0  ;;  %v2821_v23 = vpop.f32.mrb[52].mxu1 }
 0xb24   :  { %v3787_v37 = vadd.f32 %v2778_v30, %v5446_v11  ;;  %v2780_v35 = vpop.f32.mrb[45].mxu0  ;;  %v2823_v40 = vpop.f32.mrb[53].mxu1  ;;  %v3815_v34 = vadd.f32 %v2821_v23, %v5463_v28 }
 0xb25   :  { %v3788_v36 = vadd.f32 %v2780_v35, %v5450_v48  ;;  %v2782_v43 = vpop.f32.mrb[46].mxu0  ;;  %v2825_v39 = vpop.f32.mrb[54].mxu1  ;;  %v3816_v5 = vadd.f32 %v2823_v40, %v5455_v32 }
 0xb26   :  { %v2838_v38 = vmul.f32 0.5, %v3787_v37  ;;  %v3789_v44 = vadd.f32 %v2782_v43, %v5446_v11  ;;  %v2784_v41 = vpop.f32.mrb[47].mxu0  ;;  %v2827_v52 = vpop.f32.mrb[55].mxu1  ;;  %v3817_v56 = vadd.f32 %v2825_v39, %v5463_v28  ;;  %v2840_v60 = vmul.f32 0.5, %v3815_v34 }
 0xb27   :  { %v2839_v29 = vmul.f32 0.5, %v3788_v36  ;;  %v3790_v9 = vadd.f32 %v2784_v41, %v5450_v48  ;;  %v3818_v33 = vadd.f32 %v2827_v52, %v5455_v32 }
 0xb28   :  { %4333 = vtanh.f32 %v2838_v38  ;;  %v2841_v54 = vmul.f32 0.5, %v3789_v44  ;;  %v2843_v51 = vmul.f32 0.5, %v3817_v56 }
 0xb29   :  { %v2842_v16 = vmul.f32 0.5, %v3790_v9  ;;  %4335 = vtanh.f32 %v2839_v29 }
 0xb2a   :  { %4337 = vtanh.f32 %v2841_v54 }
 0xb2b   :  { %4339 = vtanh.f32 %v3816_v5 }
 0xb2c   :  { %4341 = vtanh.f32 %v2842_v16 }
 0xb2d   :  { %4343 = vtanh.f32 %v3818_v33 }
 0xb2e   :  { %4345 = vtanh.f32 %v2840_v60 }
 0xb2f   :  { %4347 = vtanh.f32 %v2843_v51 }
 0xb32   :  { %v4334_v50 = vpop.eup %4333 }
 0xb33   :  { %v2850_v17 = vmul.f32 0.5, %v4334_v50  ;;  %v4336_v14 = vpop.eup %4335 }
 0xb34   :  { %v4338_v27 = vpop.eup %4337  ;;  %v2851_v30 = vmul.f32 0.5, %v4336_v14 }
 0xb35   :  { %v2856_v59 = vadd.f32 0.5, %v2850_v17  ;;  %v4340_v37 = vpop.eup %4339  ;;  %v2853_v35 = vmul.f32 0.5, %v4338_v27 }
 0xb36   :  { %v4342_v40 = vpop.eup %4341  ;;  %v2857_v36 = vadd.f32 0.5, %v2851_v30 }
 0xb37   :  { %v2866_v43 = vmul.f32 %v4340_v37, %v2856_v59  ;;  %v2859_v38 = vadd.f32 0.5, %v2853_v35  ;;  %v2854_v23 = vmul.f32 0.5, %v4342_v40  ;;  %v4344_v44 = vpop.eup %4343 }
 0xb38   :  { %v2864_v39 = vmul.f32 %v2857_v36, %v5569_v31  ;;  %v4346_v54 = vpop.eup %4345 }
 0xb39   :  { %v2860_v41 = vadd.f32 0.5, %v2854_v23  ;;  %v2867_v52 = vmul.f32 %v4344_v44, %v2859_v38  ;;  %v4348_v16 = vpop.eup %4347  ;;  %v2852_v33 = vmul.f32 0.5, %v4346_v54 }
 0xb3a   :  { %v5619_v29 = vadd.f32 %v2866_v43, %v2864_v39  ;;  %v2855_v34 = vmul.f32 0.5, %v4348_v16 }
 0xb3b   :  { %v2865_v9 = vmul.f32 %v2860_v41, %v5573_v42  ;;  %v2858_v50 = vadd.f32 0.5, %v2852_v33 }
 0xb3c   :  { %4349 = vtanh.f32 %v5619_v29  ;;  %v2861_v17 = vadd.f32 0.5, %v2855_v34 }
 0xb3d   :  { %v5623_v5 = vadd.f32 %v2867_v52, %v2865_v9 }
 0xb3f   :  { %4351 = vtanh.f32 %v5623_v5 }
 0xb46   :  { %v4350_v56 = vpop.eup %4349 }
 0xb47   :  { %v2872_v60 = vmul.f32 %v4350_v56, %v2858_v50 }
 0xb49   :  { %v4352_v31 = vpop.eup %4351 }
 0xb4a   :  { %v2873_v14 = vmul.f32 %v4352_v31, %v2861_v17 }
 0xb4c   :  { %v2882_v51 = vpack.c.bf16 %v2873_v14, %v2872_v60  ;;  %v5683_v60 = vld [vmem:[#allocation8 + $0x8] ss:$16 sps:$4 sm:$0xff]   ;;  %v5686_v14 = vld [vmem:[#allocation8 + $0x24] ss:$16 sps:$4 sm:$0xff]  }
 0xb4e   :  { %2916 = vmatmul.mubr.bf16.vlgmr.msra.gmra.mrb[48].mxu0 %v2882_v51  ;;  %2959 = vmatmul.mubr.bf16.vlgmr.msra.gmra.mrb[56].mxu1 %v2882_v51  ;;  %v5689_v51 = vld [vmem:[#allocation8 + $0x2c] ss:$16 sps:$4 sm:$0xff]  }
 0xb4f   :  { %3023 = vmatpush1.bf16.msra.mxu0 %v5331_v53  ;;  %3066 = vmatpush1.bf16.msra.mxu1 %v5335_v10  ;;  %v5658_v53 = vld [vmem:[#allocation8 + $0x4] ss:$16 sps:$4 sm:$0xff]   ;;  %v5661_v10 = vld [vmem:[#allocation8 + $0xc] ss:$16 sps:$4 sm:$0xff]  }
 0xb50   :  { %3024 = vmatprep.subr.bf16.mxu0 %v5337_v63  ;;  %3067 = vmatprep.subr.bf16.mxu1 %v5341_v13 }
 0xb51   :  { %3054 = vmatprep.mubr.bf16.mxu0 %v5908_v46  ;;  %3097 = vmatprep.mubr.bf16.mxu1 %v5908_v46 }
 0xb53   :  { %3025 = vmatpush1.bf16.msra.mxu0 %v5345_v62  ;;  %3068 = vmatpush1.bf16.msra.mxu1 %v5347_v15 }
 0xb54   :  { %3026 = vmatprep.subr.bf16.mxu0 %v5351_v47  ;;  %3069 = vmatprep.subr.bf16.mxu1 %v5359_v7 }
 0xb57   :  { %3027 = vmatpush1.bf16.msra.mxu0 %v5355_v3  ;;  %3070 = vmatpush1.bf16.msra.mxu1 %v5362_v45 }
 0xb58   :  { %3028 = vmatprep.subr.bf16.mxu0 %v5365_v49  ;;  %3071 = vmatprep.subr.bf16.mxu1 %v5367_v4 }
 0xb5b   :  { %3029 = vmatpush1.bf16.msra.mxu0 %v5370_v6  ;;  %3072 = vmatpush1.bf16.msra.mxu1 %v5372_v12 }
 0xb5c   :  { %3030 = vmatprep.subr.bf16.mxu0 %v5377_v58  ;;  %3073 = vmatprep.subr.bf16.mxu1 %v5381_v57 }
 0xb5f   :  { %3031 = vmatpush1.bf16.msra.mxu0 %v5379_v55  ;;  %3074 = vmatpush1.bf16.msra.mxu1 %v5383_v2 }
 0xb60   :  { %3032 = vmatprep.subr.bf16.mxu0 %v5385_v0  ;;  %3075 = vmatprep.subr.bf16.mxu1 %v5389_v8 }
 0xb63   :  { %3033 = vmatpush1.bf16.msra.mxu0 %v5393_v18  ;;  %3076 = vmatpush1.bf16.msra.mxu1 %v5395_v61 }
 0xb64   :  { %3034 = vmatprep.subr.bf16.mxu0 %v5399_v19  ;;  %3077 = vmatprep.subr.bf16.mxu1 %v5401_v20 }
 0xb67   :  { %3035 = vmatpush1.bf16.msra.mxu0 %v5405_v21  ;;  %3078 = vmatpush1.bf16.msra.mxu1 %v5407_v1 }
 0xb68   :  { %3036 = vmatprep.subr.bf16.mxu0 %v5411_v22  ;;  %3079 = vmatprep.subr.bf16.mxu1 %v5413_v24 }
 0xb6b   :  { %3037 = vmatpush1.bf16.msra.mxu0 %v5417_v25  ;;  %3080 = vmatpush1.bf16.msra.mxu1 %v5419_v26 }
 0xb6c   :  { %3161 = vmatprep.subr.bf16.mxu0 %v5658_v53  ;;  %3204 = vmatprep.subr.bf16.mxu1 %v5661_v10 }
 0xc21   :  { %v2917_v63 = vpop.f32.mrb[48].mxu0  ;;  %v2960_v13 = vpop.f32.mrb[56].mxu1 }
 0xc22   :  { %v3791_v62 = vadd.f32 %v2917_v63, %v5446_v11  ;;  %v2919_v15 = vpop.f32.mrb[49].mxu0  ;;  %v2962_v47 = vpop.f32.mrb[57].mxu1  ;;  %v3819_v18 = vadd.f32 %v2960_v13, %v5463_v28  ;;  %v5694_v63 = vld [vmem:[#allocation8 + $0x20] ss:$16 sps:$4 sm:$0xff]   ;;  %v5697_v13 = vld [vmem:[#allocation8 + $0x28] ss:$16 sps:$4 sm:$0xff]  }
 0xc23   :  { %v3792_v3 = vadd.f32 %v2919_v15, %v5450_v48  ;;  %v2921_v7 = vpop.f32.mrb[50].mxu0  ;;  %v2964_v45 = vpop.f32.mrb[58].mxu1  ;;  %v3820_v57 = vadd.f32 %v2962_v47, %v5455_v32  ;;  %v5703_v15 = vld [vmem:[#allocation8 + $0x4c] ss:$16 sps:$4 sm:$0xff]   ;;  %v5706_v47 = vld [vmem:[#allocation8 + $0x40] ss:$16 sps:$4 sm:$0xff]  }
 0xc24   :  { %v2977_v49 = vmul.f32 0.5, %v3791_v62  ;;  %v3793_v4 = vadd.f32 %v2921_v7, %v5446_v11  ;;  %v2923_v6 = vpop.f32.mrb[51].mxu0  ;;  %v2966_v12 = vpop.f32.mrb[59].mxu1  ;;  %v3821_v61 = vadd.f32 %v2964_v45, %v5463_v28  ;;  %v2979_v21 = vmul.f32 0.5, %v3819_v18  ;;  %v5700_v62 = vld [vmem:[#allocation8 + $0x44] ss:$16 sps:$4 sm:$0xff]  }
 0xc25   :  { %v2978_v58 = vmul.f32 0.5, %v3792_v3  ;;  %v3794_v55 = vadd.f32 %v2923_v6, %v5450_v48  ;;  %v3822_v8 = vadd.f32 %v2966_v12, %v5455_v32  ;;  %v5709_v3 = vld [vmem:[#allocation8 + $0x48] ss:$16 sps:$4 sm:$0xff]   ;;  %v5712_v7 = vld [vmem:[#allocation8 + $0x64] ss:$16 sps:$4 sm:$0xff]  }
 0xc26   :  { %4353 = vtanh.f32 %v2977_v49  ;;  %v2980_v2 = vmul.f32 0.5, %v3793_v4  ;;  %v2982_v22 = vmul.f32 0.5, %v3821_v61  ;;  %v5715_v45 = vld [vmem:[#allocation8 + $0x6c] ss:$16 sps:$4 sm:$0xff]   ;;  %v5718_v49 = vld [vmem:[#allocation8 + $0x60] ss:$16 sps:$4 sm:$0xff]  }
 0xc27   :  { %v2981_v0 = vmul.f32 0.5, %v3794_v55  ;;  %4355 = vtanh.f32 %v2978_v58  ;;  %v5721_v4 = vld [vmem:[#allocation8 + $0x68] ss:$16 sps:$4 sm:$0xff]   ;;  %v5724_v6 = vld [vmem:[#allocation8 + $0x84] ss:$16 sps:$4 sm:$0xff]  }
 0xc28   :  { %4357 = vtanh.f32 %v2980_v2  ;;  %v5727_v12 = vld [vmem:[#allocation8 + $0x8c] ss:$16 sps:$4 sm:$0xff]   ;;  %v5730_v58 = vld [vmem:[#allocation8 + $0x80] ss:$16 sps:$4 sm:$0xff]   ;;  %v5733_v55 = vld [vmem:[#allocation8 + $0x88] ss:$16 sps:$4 sm:$0xff]  }
 0xc29   :  { %4359 = vtanh.f32 %v3820_v57  ;;  %v5736_v57 = vld [vmem:[#allocation8 + $0xa4] ss:$16 sps:$4 sm:$0xff]   ;;  %v5739_v2 = vld [vmem:[#allocation8 + $0xac] ss:$16 sps:$4 sm:$0xff]  }
 0xc2a   :  { %4361 = vtanh.f32 %v2981_v0  ;;  %v5742_v0 = vld [vmem:[#allocation8 + $0xa0] ss:$16 sps:$4 sm:$0xff]   ;;  %v5748_v18 = vld [vmem:[#allocation8 + $0xc4] ss:$16 sps:$4 sm:$0xff]   ;;  %v5751_v61 = vld [vmem:[#allocation8 + $0xcc] ss:$16 sps:$4 sm:$0xff]  }
 0xc2b   :  { %4363 = vtanh.f32 %v3822_v8  ;;  %v5745_v8 = vld [vmem:[#allocation8 + $0xa8] ss:$16 sps:$4 sm:$0xff]  }
 0xc2c   :  { %4365 = vtanh.f32 %v2979_v21  ;;  %v5760_v21 = vld [vmem:[#allocation8 + $0xe4] ss:$16 sps:$4 sm:$0xff]  }
 0xc2d   :  { %4367 = vtanh.f32 %v2982_v22  ;;  %v5766_v22 = vld [vmem:[#allocation8 + $0xe0] ss:$16 sps:$4 sm:$0xff]  }
 0xc30   :  { %v4354_v19 = vpop.eup %4353 }
 0xc31   :  { %v2989_v20 = vmul.f32 0.5, %v4354_v19  ;;  %v4356_v1 = vpop.eup %4355  ;;  %v5754_v19 = vld [vmem:[#allocation8 + $0xc0] ss:$16 sps:$4 sm:$0xff]  }
 0xc32   :  { %v4358_v24 = vpop.eup %4357  ;;  %v2990_v26 = vmul.f32 0.5, %v4356_v1  ;;  %v5763_v1 = vld [vmem:[#allocation8 + $0xec] ss:$16 sps:$4 sm:$0xff]  }
 0xc33   :  { %v2995_v25 = vadd.f32 0.5, %v2989_v20  ;;  %v4360_v42 = vpop.eup %4359  ;;  %v2992_v27 = vmul.f32 0.5, %v4358_v24  ;;  %v5757_v20 = vld [vmem:[#allocation8 + $0xc8] ss:$16 sps:$4 sm:$0xff]  }
 0xc34   :  { %v4362_v59 = vpop.eup %4361  ;;  %v2996_v30 = vadd.f32 0.5, %v2990_v26  ;;  %v5769_v24 = vld [vmem:[#allocation8 + $0xe8] ss:$16 sps:$4 sm:$0xff]  }
 0xc35   :  { %v3005_v37 = vmul.f32 %v4360_v42, %v2995_v25  ;;  %v2998_v35 = vadd.f32 0.5, %v2992_v27  ;;  %v2993_v40 = vmul.f32 0.5, %v4362_v59  ;;  %v4364_v36 = vpop.eup %4363 }
 0xc36   :  { %v3003_v43 = vmul.f32 %v2996_v30, %v5619_v29  ;;  %v4366_v52 = vpop.eup %4365 }
 0xc37   :  { %v2999_v38 = vadd.f32 0.5, %v2993_v40  ;;  %v3006_v23 = vmul.f32 %v4364_v36, %v2998_v35  ;;  %v4368_v9 = vpop.eup %4367  ;;  %v2991_v54 = vmul.f32 0.5, %v4366_v52 }
 0xc38   :  { %v5673_v44 = vadd.f32 %v3005_v37, %v3003_v43  ;;  %v2994_v16 = vmul.f32 0.5, %v4368_v9 }
 0xc39   :  { %v3004_v39 = vmul.f32 %v2999_v38, %v5623_v5  ;;  %v2997_v34 = vadd.f32 0.5, %v2991_v54  ;;  %v5680_v5 = vld [vmem:[#allocation8] ss:$16 sps:$4 sm:$0xff]  }
 0xc3a   :  { %4369 = vtanh.f32 %v5673_v44  ;;  %v3000_v56 = vadd.f32 0.5, %v2994_v16 }
 0xc3b   :  { %v5677_v41 = vadd.f32 %v3006_v23, %v3004_v39 }
 0xc3d   :  { %4371 = vtanh.f32 %v5677_v41 }
 0xc44   :  { %v4370_v33 = vpop.eup %4369 }
 0xc45   :  { %v3011_v50 = vmul.f32 %v4370_v33, %v2997_v34 }
 0xc47   :  { %v4372_v29 = vpop.eup %4371 }
 0xc48   :  { %v3012_v17 = vmul.f32 %v4372_v29, %v3000_v56 }
 0xc4a   :  { %v3021_v31 = vpack.c.bf16 %v3012_v17, %v3011_v50 }
 0xc4c   :  { %3055 = vmatmul.mubr.bf16.vlgmr.msra.gmra.mrb[52].mxu0 %v3021_v31  ;;  %3098 = vmatmul.mubr.bf16.vlgmr.msra.gmra.mrb[60].mxu1 %v3021_v31 }
 0xc4d   :  { %3162 = vmatpush1.bf16.msra.mxu0 %v5680_v5  ;;  %3205 = vmatpush1.bf16.msra.mxu1 %v5683_v60 }
 0xc4e   :  { %3163 = vmatprep.subr.bf16.mxu0 %v5686_v14  ;;  %3206 = vmatprep.subr.bf16.mxu1 %v5689_v51 }
 0xc4f   :  { %3193 = vmatprep.mubr.bf16.mxu0 %v5908_v46  ;;  %3236 = vmatprep.mubr.bf16.mxu1 %v5908_v46 }
 0xc51   :  { %3164 = vmatpush1.bf16.msra.mxu0 %v5694_v63  ;;  %3207 = vmatpush1.bf16.msra.mxu1 %v5697_v13 }
 0xc52   :  { %3165 = vmatprep.subr.bf16.mxu0 %v5700_v62  ;;  %3208 = vmatprep.subr.bf16.mxu1 %v5703_v15 }
 0xc55   :  { %3166 = vmatpush1.bf16.msra.mxu0 %v5706_v47  ;;  %3209 = vmatpush1.bf16.msra.mxu1 %v5709_v3 }
 0xc56   :  { %3167 = vmatprep.subr.bf16.mxu0 %v5712_v7  ;;  %3210 = vmatprep.subr.bf16.mxu1 %v5715_v45 }
 0xc59   :  { %3168 = vmatpush1.bf16.msra.mxu0 %v5718_v49  ;;  %3211 = vmatpush1.bf16.msra.mxu1 %v5721_v4 }
 0xc5a   :  { %3169 = vmatprep.subr.bf16.mxu0 %v5724_v6  ;;  %3212 = vmatprep.subr.bf16.mxu1 %v5727_v12 }
 0xc5d   :  { %3170 = vmatpush1.bf16.msra.mxu0 %v5730_v58  ;;  %3213 = vmatpush1.bf16.msra.mxu1 %v5733_v55 }
 0xc5e   :  { %3171 = vmatprep.subr.bf16.mxu0 %v5736_v57  ;;  %3214 = vmatprep.subr.bf16.mxu1 %v5739_v2 }
 0xc61   :  { %3172 = vmatpush1.bf16.msra.mxu0 %v5742_v0  ;;  %3215 = vmatpush1.bf16.msra.mxu1 %v5745_v8 }
 0xc62   :  { %3173 = vmatprep.subr.bf16.mxu0 %v5748_v18  ;;  %3216 = vmatprep.subr.bf16.mxu1 %v5751_v61 }
 0xc65   :  { %3174 = vmatpush1.bf16.msra.mxu0 %v5754_v19  ;;  %3217 = vmatpush1.bf16.msra.mxu1 %v5757_v20 }
 0xc66   :  { %3175 = vmatprep.subr.bf16.mxu0 %v5760_v21  ;;  %3218 = vmatprep.subr.bf16.mxu1 %v5763_v1 }
 0xc69   :  { %3176 = vmatpush1.bf16.msra.mxu0 %v5766_v22  ;;  %3219 = vmatpush1.bf16.msra.mxu1 %v5769_v24 }
 0xc6a   :  { %3300 = vmatprep.subr.bf16.mxu0 %v5658_v53  ;;  %3343 = vmatprep.subr.bf16.mxu1 %v5661_v10 }
 0xd1f   :  { %v3056_v25 = vpop.f32.mrb[52].mxu0  ;;  %v3099_v26 = vpop.f32.mrb[60].mxu1 }
 0xd20   :  { %v3795_v42 = vadd.f32 %v3056_v25, %v5446_v11  ;;  %v3058_v27 = vpop.f32.mrb[53].mxu0  ;;  %v3101_v59 = vpop.f32.mrb[61].mxu1  ;;  %v3823_v54 = vadd.f32 %v3099_v26, %v5463_v28 }
 0xd21   :  { %v3796_v30 = vadd.f32 %v3058_v27, %v5450_v48  ;;  %v3060_v37 = vpop.f32.mrb[54].mxu0  ;;  %v3103_v35 = vpop.f32.mrb[62].mxu1  ;;  %v3824_v10 = vadd.f32 %v3101_v59, %v5455_v32 }
 0xd22   :  { %v3116_v40 = vmul.f32 0.5, %v3795_v42  ;;  %v3797_v36 = vadd.f32 %v3060_v37, %v5446_v11  ;;  %v3062_v43 = vpop.f32.mrb[55].mxu0  ;;  %v3105_v38 = vpop.f32.mrb[63].mxu1  ;;  %v3825_v16 = vadd.f32 %v3103_v35, %v5463_v28  ;;  %v3118_v56 = vmul.f32 0.5, %v3823_v54 }
 0xd23   :  { %v3117_v23 = vmul.f32 0.5, %v3796_v30  ;;  %v3798_v53 = vadd.f32 %v3062_v43, %v5450_v48  ;;  %v3826_v9 = vadd.f32 %v3105_v38, %v5455_v32 }
 0xd24   :  { %4373 = vtanh.f32 %v3116_v40  ;;  %v3119_v39 = vmul.f32 0.5, %v3797_v36  ;;  %v3121_v50 = vmul.f32 0.5, %v3825_v16 }
 0xd25   :  { %v3120_v52 = vmul.f32 0.5, %v3798_v53  ;;  %4375 = vtanh.f32 %v3117_v23 }
 0xd26   :  { %4377 = vtanh.f32 %v3119_v39 }
 0xd27   :  { %4379 = vtanh.f32 %v3824_v10 }
 0xd28   :  { %4381 = vtanh.f32 %v3120_v52 }
 0xd29   :  { %4383 = vtanh.f32 %v3826_v9 }
 0xd2a   :  { %4385 = vtanh.f32 %v3118_v56 }
 0xd2b   :  { %4387 = vtanh.f32 %v3121_v50 }
 0xd2e   :  { %v4374_v33 = vpop.eup %4373 }
 0xd2f   :  { %v3128_v34 = vmul.f32 0.5, %v4374_v33  ;;  %v4376_v29 = vpop.eup %4375 }
 0xd30   :  { %v4378_v17 = vpop.eup %4377  ;;  %v3129_v25 = vmul.f32 0.5, %v4376_v29 }
 0xd31   :  { %v3134_v31 = vadd.f32 0.5, %v3128_v34  ;;  %v4380_v42 = vpop.eup %4379  ;;  %v3131_v27 = vmul.f32 0.5, %v4378_v17 }
 0xd32   :  { %v4382_v59 = vpop.eup %4381  ;;  %v3135_v30 = vadd.f32 0.5, %v3129_v25 }
 0xd33   :  { %v3144_v37 = vmul.f32 %v4380_v42, %v3134_v31  ;;  %v3137_v40 = vadd.f32 0.5, %v3131_v27  ;;  %v3132_v26 = vmul.f32 0.5, %v4382_v59  ;;  %v4384_v36 = vpop.eup %4383 }
 0xd34   :  { %v3142_v35 = vmul.f32 %v3135_v30, %v5673_v44  ;;  %v4386_v39 = vpop.eup %4385 }
 0xd35   :  { %v3138_v43 = vadd.f32 0.5, %v3132_v26  ;;  %v3145_v38 = vmul.f32 %v4384_v36, %v3137_v40  ;;  %v4388_v52 = vpop.eup %4387  ;;  %v3130_v9 = vmul.f32 0.5, %v4386_v39 }
 0xd36   :  { %v5783_v23 = vadd.f32 %v3144_v37, %v3142_v35  ;;  %v3133_v54 = vmul.f32 0.5, %v4388_v52 }
 0xd37   :  { %v3143_v53 = vmul.f32 %v3138_v43, %v5677_v41  ;;  %v3136_v33 = vadd.f32 0.5, %v3130_v9 }
 0xd38   :  { %4389 = vtanh.f32 %v5783_v23  ;;  %v3139_v34 = vadd.f32 0.5, %v3133_v54 }
 0xd39   :  { %v5787_v10 = vadd.f32 %v3145_v38, %v3143_v53 }
 0xd3b   :  { %4391 = vtanh.f32 %v5787_v10 }
 0xd42   :  { %v4390_v16 = vpop.eup %4389 }
 0xd43   :  { %v3150_v56 = vmul.f32 %v4390_v16, %v3136_v33  ;;  %v4573_v33 = vmov 0.0  }
 0xd45   :  { %v4392_v44 = vpop.eup %4391 }
 0xd46   :  { %v3151_v29 = vmul.f32 %v4392_v44, %v3139_v34  ;;  %v4106_v34 = vld [vmem:[%s5888_s7 + $0x8] sm:$0xff]   ;;  %v4107_v44 = vld [vmem:[%s5888_s7 + $0x10] sm:$0xff]  }
 0xd48   :  { %v3160_v50 = vpack.c.bf16 %v3151_v29, %v3150_v56  ;;  %v4108_v56 = vld [vmem:[%s5888_s7 + $0x18] sm:$0xff]   ;;  %v4109_v29 = vld [vmem:[%s5888_s7 + $0x20] sm:$0xff]  }
 0xd4a   :  { %3194 = vmatmul.mubr.bf16.vlgmr.msra.gmra.mrb[56].mxu0 %v3160_v50  ;;  %3237 = vmatmul.mubr.bf16.vlgmr.msra.gmra.mrb[64].mxu1 %v3160_v50  ;;  %v4110_v50 = vld [vmem:[%s5888_s7 + $0x28] sm:$0xff]  }
 0xd4b   :  { %3301 = vmatpush1.bf16.msra.mxu0 %v5680_v5  ;;  %3344 = vmatpush1.bf16.msra.mxu1 %v5683_v60 }
 0xd4c   :  { %3302 = vmatprep.subr.bf16.mxu0 %v5686_v14  ;;  %3345 = vmatprep.subr.bf16.mxu1 %v5689_v51 }
 0xd4d   :  { %3332 = vmatprep.mubr.bf16.mxu0 %v5908_v46  ;;  %3375 = vmatprep.mubr.bf16.mxu1 %v5908_v46 }
 0xd4f   :  { %3303 = vmatpush1.bf16.msra.mxu0 %v5694_v63  ;;  %3346 = vmatpush1.bf16.msra.mxu1 %v5697_v13 }
 0xd50   :  { %3304 = vmatprep.subr.bf16.mxu0 %v5700_v62  ;;  %3347 = vmatprep.subr.bf16.mxu1 %v5703_v15 }
 0xd53   :  { %3305 = vmatpush1.bf16.msra.mxu0 %v5706_v47  ;;  %3348 = vmatpush1.bf16.msra.mxu1 %v5709_v3 }
 0xd54   :  { %3306 = vmatprep.subr.bf16.mxu0 %v5712_v7  ;;  %3349 = vmatprep.subr.bf16.mxu1 %v5715_v45 }
 0xd57   :  { %3307 = vmatpush1.bf16.msra.mxu0 %v5718_v49  ;;  %3350 = vmatpush1.bf16.msra.mxu1 %v5721_v4 }
 0xd58   :  { %3308 = vmatprep.subr.bf16.mxu0 %v5724_v6  ;;  %3351 = vmatprep.subr.bf16.mxu1 %v5727_v12 }
 0xd5b   :  { %3309 = vmatpush1.bf16.msra.mxu0 %v5730_v58  ;;  %3352 = vmatpush1.bf16.msra.mxu1 %v5733_v55 }
 0xd5c   :  { %3310 = vmatprep.subr.bf16.mxu0 %v5736_v57  ;;  %3353 = vmatprep.subr.bf16.mxu1 %v5739_v2 }
 0xd5f   :  { %3311 = vmatpush1.bf16.msra.mxu0 %v5742_v0  ;;  %3354 = vmatpush1.bf16.msra.mxu1 %v5745_v8 }
 0xd60   :  { %3312 = vmatprep.subr.bf16.mxu0 %v5748_v18  ;;  %3355 = vmatprep.subr.bf16.mxu1 %v5751_v61 }
 0xd63   :  { %3313 = vmatpush1.bf16.msra.mxu0 %v5754_v19  ;;  %3356 = vmatpush1.bf16.msra.mxu1 %v5757_v20 }
 0xd64   :  { %3314 = vmatprep.subr.bf16.mxu0 %v5760_v21  ;;  %3357 = vmatprep.subr.bf16.mxu1 %v5763_v1 }
 0xd67   :  { %3315 = vmatpush1.bf16.msra.mxu0 %v5766_v22  ;;  %3358 = vmatpush1.bf16.msra.mxu1 %v5769_v24 }
 0xd68   :  { %3693 = vmatprep.subr.bf16.mxu0 %v4573_v33 }
 0xe1d   :  { %v3195_v46 = vpop.f32.mrb[56].mxu0  ;;  %v3238_v41 = vpop.f32.mrb[64].mxu1 }
 0xe1e   :  { %v3799_v5 = vadd.f32 %v3195_v46, %v5446_v11  ;;  %v3197_v60 = vpop.f32.mrb[57].mxu0  ;;  %v3240_v14 = vpop.f32.mrb[65].mxu1  ;;  %v3827_v58 = vadd.f32 %v3238_v41, %v5463_v28  ;;  %v4111_v46 = vld [vmem:[%s5888_s7 + $0x30] sm:$0xff]   ;;  %v4112_v41 = vld [vmem:[%s5888_s7 + $0x38] sm:$0xff]  }
 0xe1f   :  { %v3800_v51 = vadd.f32 %v3197_v60, %v5450_v48  ;;  %v3199_v63 = vpop.f32.mrb[58].mxu0  ;;  %v3242_v13 = vpop.f32.mrb[66].mxu1  ;;  %v3828_v49 = vadd.f32 %v3240_v14, %v5455_v32 }
 0xe20   :  { %v3255_v62 = vmul.f32 0.5, %v3799_v5  ;;  %v3801_v15 = vadd.f32 %v3199_v63, %v5446_v11  ;;  %v3201_v47 = vpop.f32.mrb[59].mxu0  ;;  %v3244_v3 = vpop.f32.mrb[67].mxu1  ;;  %v3829_v55 = vadd.f32 %v3242_v13, %v5463_v28  ;;  %v3257_v0 = vmul.f32 0.5, %v3827_v58 }
 0xe21   :  { %v3256_v7 = vmul.f32 0.5, %v3800_v51  ;;  %v3802_v45 = vadd.f32 %v3201_v47, %v5450_v48  ;;  %v3830_v12 = vadd.f32 %v3244_v3, %v5455_v32 }
 0xe22   :  { %4393 = vtanh.f32 %v3255_v62  ;;  %v3258_v4 = vmul.f32 0.5, %v3801_v15  ;;  %v3260_v18 = vmul.f32 0.5, %v3829_v55 }
 0xe23   :  { %v3259_v6 = vmul.f32 0.5, %v3802_v45  ;;  %4395 = vtanh.f32 %v3256_v7 }
 0xe24   :  { %4397 = vtanh.f32 %v3258_v4 }
 0xe25   :  { %4399 = vtanh.f32 %v3828_v49 }
 0xe26   :  { %4401 = vtanh.f32 %v3259_v6 }
 0xe27   :  { %4403 = vtanh.f32 %v3830_v12 }
 0xe28   :  { %4405 = vtanh.f32 %v3257_v0 }
 0xe29   :  { %4407 = vtanh.f32 %v3260_v18 }
 0xe2c   :  { %v4394_v57 = vpop.eup %4393 }
 0xe2d   :  { %v3267_v2 = vmul.f32 0.5, %v4394_v57  ;;  %v4396_v8 = vpop.eup %4395 }
 0xe2e   :  { %v4398_v61 = vpop.eup %4397  ;;  %v3268_v20 = vmul.f32 0.5, %v4396_v8 }
 0xe2f   :  { %v3273_v19 = vadd.f32 0.5, %v3267_v2  ;;  %v4400_v21 = vpop.eup %4399  ;;  %v3270_v1 = vmul.f32 0.5, %v4398_v61 }
 0xe30   :  { %v4402_v22 = vpop.eup %4401  ;;  %v3274_v24 = vadd.f32 0.5, %v3268_v20 }
 0xe31   :  { %v3283_v17 = vmul.f32 %v4400_v21, %v3273_v19  ;;  %v3276_v31 = vadd.f32 0.5, %v3270_v1  ;;  %v3271_v25 = vmul.f32 0.5, %v4402_v22  ;;  %v4404_v42 = vpop.eup %4403 }
 0xe32   :  { %v3281_v27 = vmul.f32 %v3274_v24, %v5783_v23  ;;  %v4406_v36 = vpop.eup %4405 }
 0xe33   :  { %v3277_v59 = vadd.f32 0.5, %v3271_v25  ;;  %v3284_v30 = vmul.f32 %v4404_v42, %v3276_v31  ;;  %v4408_v35 = vpop.eup %4407  ;;  %v3269_v43 = vmul.f32 0.5, %v4406_v36 }
 0xe34   :  { %v5831_v37 = vadd.f32 %v3283_v17, %v3281_v27  ;;  %v3272_v38 = vmul.f32 0.5, %v4408_v35 }
 0xe35   :  { %v3282_v40 = vmul.f32 %v3277_v59, %v5787_v10  ;;  %v3275_v39 = vadd.f32 0.5, %v3269_v43  ;;  %v4105_v10 = vld [vmem:[%s5888_s7] sm:$0xff]  }
 0xe36   :  { %4409 = vtanh.f32 %v5831_v37  ;;  %v3278_v52 = vadd.f32 0.5, %v3272_v38 }
 0xe37   :  { %v5835_v26 = vadd.f32 %v3284_v30, %v3282_v40 }
 0xe39   :  { %4411 = vtanh.f32 %v5835_v26 }
 0xe40   :  { %v4410_v53 = vpop.eup %4409 }
 0xe41   :  { %v3289_v9 = vmul.f32 %v4410_v53, %v3275_v39 }
 0xe43   :  { %v4412_v23 = vpop.eup %4411 }
 0xe44   :  { %v3290_v54 = vmul.f32 %v4412_v23, %v3278_v52 }
 0xe46   :  { %v3299_v16 = vpack.c.bf16 %v3290_v54, %v3289_v9 }
 0xe48   :  { %3333 = vmatmul.mubr.bf16.vlgmr.msra.gmra.mrb[60].mxu0 %v3299_v16  ;;  %3376 = vmatmul.mubr.bf16.vlgmr.msra.gmra.mrb[68].mxu1 %v3299_v16 }
 0xe49   :  { %3694 = vmatpush3.bf16.msra.mxu0 %v4105_v10  ;;  %3709 = vmatprep.mubr.msk.bf16.mxu0 %vm4574_vm1, %v4573_v33 }
 0xe4a   :  { %3695 = vmatprep.subr.bf16.mxu0 %v4573_v33 }
 0xe4d   :  { %3696 = vmatpush3.bf16.msra.mxu0 %v4106_v34 }
 0xe4e   :  { %3697 = vmatprep.subr.bf16.mxu0 %v4573_v33 }
 0xe51   :  { %3698 = vmatpush3.bf16.msra.mxu0 %v4107_v44 }
 0xe52   :  { %3699 = vmatprep.subr.bf16.mxu0 %v4573_v33 }
 0xe55   :  { %3700 = vmatpush3.bf16.msra.mxu0 %v4108_v56 }
 0xe56   :  { %3701 = vmatprep.subr.bf16.mxu0 %v4573_v33 }
 0xe59   :  { %3702 = vmatpush3.bf16.msra.mxu0 %v4109_v29 }
 0xe5a   :  { %3703 = vmatprep.subr.bf16.mxu0 %v4573_v33 }
 0xe5d   :  { %3704 = vmatpush3.bf16.msra.mxu0 %v4110_v50 }
 0xe5e   :  { %3705 = vmatprep.subr.bf16.mxu0 %v4573_v33 }
 0xe61   :  { %3706 = vmatpush3.bf16.msra.mxu0 %v4111_v46 }
 0xe62   :  { %3707 = vmatprep.subr.bf16.mxu0 %v4573_v33 }
 0xe65   :  { %3708 = vmatpush3.bf16.msra.mxu0 %v4112_v41 }
 0xf1b   :  { %v3334_v5 = vpop.f32.mrb[60].mxu0  ;;  %v3377_v60 = vpop.f32.mrb[68].mxu1 }
 0xf1c   :  { %v3803_v14 = vadd.f32 %v3334_v5, %v5446_v11  ;;  %v3336_v51 = vpop.f32.mrb[61].mxu0  ;;  %v3379_v63 = vpop.f32.mrb[69].mxu1  ;;  %v3831_v57 = vadd.f32 %v3377_v60, %v5463_v28 }
 0xf1d   :  { %v3804_v13 = vadd.f32 %v3336_v51, %v5450_v48  ;;  %v3338_v62 = vpop.f32.mrb[62].mxu0  ;;  %v3381_v15 = vpop.f32.mrb[70].mxu1  ;;  %v3832_v6 = vadd.f32 %v3379_v63, %v5455_v32 }
 0xf1e   :  { %v3394_v47 = vmul.f32 0.5, %v3803_v14  ;;  %v3805_v3 = vadd.f32 %v3338_v62, %v5446_v11  ;;  %v3340_v7 = vpop.f32.mrb[63].mxu0  ;;  %v3383_v45 = vpop.f32.mrb[71].mxu1  ;;  %v3833_v11 = vadd.f32 %v3381_v15, %v5463_v28  ;;  %v3396_v2 = vmul.f32 0.5, %v3831_v57 }
 0xf1f   :  { %v3395_v49 = vmul.f32 0.5, %v3804_v13  ;;  %v3806_v4 = vadd.f32 %v3340_v7, %v5450_v48  ;;  %v3834_v55 = vadd.f32 %v3383_v45, %v5455_v32 }
 0xf20   :  { %4413 = vtanh.f32 %v3394_v47  ;;  %v3397_v12 = vmul.f32 0.5, %v3805_v3  ;;  %v3399_v18 = vmul.f32 0.5, %v3833_v11 }
 0xf21   :  { %v3398_v58 = vmul.f32 0.5, %v3806_v4  ;;  %4415 = vtanh.f32 %v3395_v49 }
 0xf22   :  { %4417 = vtanh.f32 %v3397_v12 }
 0xf23   :  { %4419 = vtanh.f32 %v3832_v6 }
 0xf24   :  { %4421 = vtanh.f32 %v3398_v58 }
 0xf25   :  { %4423 = vtanh.f32 %v3834_v55 }
 0xf26   :  { %4425 = vtanh.f32 %v3396_v2 }
 0xf27   :  { %4427 = vtanh.f32 %v3399_v18 }
 0xf2a   :  { %v4414_v0 = vpop.eup %4413 }
 0xf2b   :  { %v3406_v8 = vmul.f32 0.5, %v4414_v0  ;;  %v4416_v48 = vpop.eup %4415 }
 0xf2c   :  { %v4418_v61 = vpop.eup %4417  ;;  %v3407_v20 = vmul.f32 0.5, %v4416_v48 }
 0xf2d   :  { %v3412_v19 = vadd.f32 0.5, %v3406_v8  ;;  %v4420_v21 = vpop.eup %4419  ;;  %v3409_v1 = vmul.f32 0.5, %v4418_v61 }
 0xf2e   :  { %v4422_v22 = vpop.eup %4421  ;;  %v3413_v32 = vadd.f32 0.5, %v3407_v20 }
 0xf2f   :  { %v3422_v24 = vmul.f32 %v4420_v21, %v3412_v19  ;;  %v3415_v17 = vadd.f32 0.5, %v3409_v1  ;;  %v3410_v31 = vmul.f32 0.5, %v4422_v22  ;;  %v4424_v25 = vpop.eup %4423 }
 0xf30   :  { %v3420_v28 = vmul.f32 %v3413_v32, %v5831_v37  ;;  %v4426_v36 = vpop.eup %4425  ;;  %v3675_v37 = vld [vmem:[%s5889_s8] ss:$0 sm:$0xff] }
 0xf31   :  { %v3416_v42 = vadd.f32 0.5, %v3410_v31  ;;  %v3423_v27 = vmul.f32 %v4424_v25, %v3415_v17  ;;  %v4428_v35 = vpop.eup %4427  ;;  %v3408_v43 = vmul.f32 0.5, %v4426_v36 }
 0xf32   :  { %v3424_v59 = vadd.f32 %v3422_v24, %v3420_v28  ;;  %v3411_v38 = vmul.f32 0.5, %v4428_v35 }
 0xf33   :  { %v3421_v30 = vmul.f32 %v3416_v42, %v5835_v26  ;;  %v3414_v53 = vadd.f32 0.5, %v3408_v43 }
 0xf34   :  { %4429 = vtanh.f32 %v3424_v59  ;;  %v3417_v23 = vadd.f32 0.5, %v3411_v38 }
 0xf35   :  { %v3425_v40 = vadd.f32 %v3423_v27, %v3421_v30 }
 0xf37   :  { %4431 = vtanh.f32 %v3425_v40 }
 0xf3e   :  { %v4430_v39 = vpop.eup %4429 }
 0xf3f   :  { %v3428_v52 = vmul.f32 %v4430_v39, %v3414_v53 }
 0xf41   :  { %v4432_v9 = vpop.eup %4431 }
 0xf42   :  { %v3429_v54 = vmul.f32 %v4432_v9, %v3417_v23 }
 0xf44   :  { %v3430_v16 = vpack.c.bf16 %v3429_v54, %v3428_v52 }
 0xf46   :  { %3710 = vmatmul.mubr.bf16.vlgmr.msra.gmra.mrb[64].mxu0 %v3430_v16 }
0x1019   :  { %v3536_v26 = vpop.f32.mrb[64].mxu0 }
0x101a   :  { %v3537_v10 = vadd.f32 %v3675_v37, %v3536_v26  ;;  %v3711_v33 = vpop.f32.mrb[65].mxu0 }
0x101b   :  { %v3539_v34 = vpop.f32.mrb[66].mxu0 }
0x101c   :  { %3543 = vst [vmem:[%s5890_s9] sm:$0xff] %v3537_v10  ;;  %v3540_v44 = vadd.f32 %v3675_v37, %v3539_v34  ;;  %v3712_v56 = vpop.f32.mrb[67].mxu0 }
0x101e   :  { %3544 = vst [vmem:[%s5890_s9 + $0x8] sm:$0xff] %v3540_v44 }
0x101f   :  { %3549 = vsyncpa [#allocation5], 1 }
0x1020   :  { %3550 = vsyncpa [#allocation7], 1 }

</bundles_post_ra>
